<compile_context>
chip_gen: v6e
topology: v6e:2x2x1
jax: 0.10.0
libtpu: 0.0.40
codegen_flags: <defaults>
</compile_context>

<pallas_src>
import math
from functools import partial

import jax
import jax.numpy as jnp
import numpy as np
from jax.experimental import pallas as pl
from jax.experimental.pallas import tpu as pltpu

LN_EPS = 1e-5  # torch.nn.LayerNorm default


# ----------------------------------------------------------------------------
# Fused kernel: one (batch, H-band) step, channel-major.
#   x_ref   : (1, Cin, Hp, W)   zero-H-padded input, whole image (VMEM,
#                               fetched once per batch element)
#   p_ref   : (P,)              packed parameters (SMEM, scalar reads)
#   o_ref   : (1, Cout, TH, W)  output band
#   fea_ref : (Cout, TH+2, W)   pointwise result for the band + 1-row halo
# ----------------------------------------------------------------------------
def _bsconvs_kernel(x_ref, p_ref, o_ref, fea_ref, *,
                    H, W, TH, Cin, mid, Cout, OFF):
    f32 = jnp.float32
    t = pl.program_id(1)

    row0 = t * TH
    if TH % 8 == 0:
        row0 = pl.multiple_of(row0, 8)
    # (Cin, TH+2, W) window = original rows t*TH-1 .. t*TH+TH (the wrapper's
    # zero H-padding keeps the load in bounds; out-of-image rows are masked to
    # zero after the pointwise path below).
    xw = x_ref[0, :, pl.ds(row0, TH + 2), :].astype(f32)

    def par(i):                       # scalar parameter read (SMEM -> sreg)
        return p_ref[i]

    # ---- pw1 (Linear Cin->mid) + LayerNorm(mid), channel-major -------------
    # Channel counts are tiny in BSConvS, so the pointwise "matmuls" are
    # unrolled scalar x vector FMAs over the (TH+2, W) band (VPU lane-dense).
    h1 = []
    for m in range(mid):
        acc = xw[0] * par(OFF["w1"] + 0 * mid + m)
        for ci in range(1, Cin):
            acc = acc + xw[ci] * par(OFF["w1"] + ci * mid + m)
        h1.append(acc + par(OFF["b1"] + m))
    mu = h1[0]
    for m in range(1, mid):
        mu = mu + h1[m]
    mu = mu * (1.0 / mid)
    d1 = [h - mu for h in h1]
    var1 = d1[0] * d1[0]
    for m in range(1, mid):
        var1 = var1 + d1[m] * d1[m]
    inv1 = jax.lax.rsqrt(var1 * (1.0 / mid) + LN_EPS)
    h1n = [d1[m] * inv1 * par(OFF["g1"] + m) + par(OFF["be1"] + m)
           for m in range(mid)]

    # ---- pw2 (Linear mid->Cout) + LayerNorm(Cout) ---------------------------
    h2 = []
    for co in range(Cout):
        acc = h1n[0] * par(OFF["w2"] + 0 * Cout + co)
        for m in range(1, mid):
            acc = acc + h1n[m] * par(OFF["w2"] + m * Cout + co)
        h2.append(acc + par(OFF["b2"] + co))
    mu2 = h2[0]
    for co in range(1, Cout):
        mu2 = mu2 + h2[co]
    mu2 = mu2 * (1.0 / Cout)
    d2 = [h - mu2 for h in h2]
    var2 = d2[0] * d2[0]
    for co in range(1, Cout):
        var2 = var2 + d2[co] * d2[co]
    inv2 = jax.lax.rsqrt(var2 * (1.0 / Cout) + LN_EPS)

    # Rows outside the image must give fea == 0 (the depthwise conv zero-pads
    # fea, not its input): mask once with the global (padded) row index.
    local = jax.lax.broadcasted_iota(jnp.int32, (TH + 2, W), 0)
    prow = t * TH + local
    valid = jnp.logical_and(prow >= 1, prow <= H)

    for co in range(Cout):
        fea_c = d2[co] * inv2 * par(OFF["g2"] + co) + par(OFF["be2"] + co)
        fea_ref[co] = jnp.where(valid, fea_c, 0.0)    # aligned full-row store

    # ---- depthwise 3x3 conv, stride 1, zero padding -------------------------
    # out[c,i,j] = b[c] + sum_{kh,kw} w[c,kh,kw] * fea[c, i+kh-1, j+kw-1]
    # Row taps: sublane-offset slices of the scratch.  Column taps: accumulate
    # over kh first, then one zero-column shift per side per channel.
    zcol = jnp.zeros((TH, 1), f32)
    for co in range(Cout):
        rows = [fea_ref[co, kh:kh + TH, :] for kh in range(3)]
        g = []
        for kw in range(3):
            acc = rows[0] * par(OFF["dww"] + (0 * 3 + kw) * Cout + co)
            for kh in range(1, 3):
                acc = acc + rows[kh] * par(OFF["dww"] + (kh * 3 + kw) * Cout + co)
            g.append(acc)
        left = jnp.concatenate([zcol, g[0][:, :W - 1]], axis=1)    # fea[.., j-1]
        right = jnp.concatenate([g[2][:, 1:], zcol], axis=1)       # fea[.., j+1]
        out_c = left + g[1] + right + par(OFF["dwb"] + co)
        o_ref[0, co, :, :] = out_c.astype(o_ref.dtype)


# ----------------------------------------------------------------------------
# Generation-aware VMEM budget and H-tile selection
# ----------------------------------------------------------------------------
def _round_up(x, m):
    return -(-x // m) * m


def _vmem_budget_and_limit():
    cap = 128 * 1024 * 1024
    try:
        info = pltpu.get_tpu_info()
        cap = int(getattr(info, "vmem_capacity_bytes", cap) or cap)
    except Exception:
        pass
    budget = min(cap // 2, 80 * 1024 * 1024)         # tile-selection budget
    limit = min((cap * 3) // 4, 100 * 1024 * 1024)   # scoped VMEM limit
    return budget, limit                             # v7x: 32/48 MiB, v5e/v6e: 64/96 MiB


def _choose_h_tile(H, W, Cin, Cout, B, budget_bytes):
    Wp = _round_up(max(W, 1), 128)                   # f32 lane padding

    def est(th, nb):
        hp = nb * th + 2
        x_blk = 2 * Cin * _round_up(hp, 8) * Wp * 4         # double-buffered input
        out_blk = 2 * Cout * _round_up(th, 8) * Wp * 4      # double-buffered output
        scratch = Cout * _round_up(th + 2, 8) * Wp * 4      # fea scratch
        live = 4 * max(Cin, Cout) * _round_up(th + 2, 8) * Wp * 4  # temporaries
        return x_blk + out_blk + scratch + live

    cands = [H] + list(range(_round_up(H, 8) - 8, 0, -8))
    th = min(H, 8)
    for c in cands:
        if c <= 0:
            continue
        nb = pl.cdiv(H, c)
        if est(c, nb) <= budget_bytes:
            th = c
            break
    nb = pl.cdiv(H, th)
    if B * nb < 2 and H >= 16:       # keep both v7x TensorCores busy
        th = _round_up(pl.cdiv(H, 2), 8)
        nb = pl.cdiv(H, th)
    return th, nb


# ----------------------------------------------------------------------------
# Parameter packing (10 tiny tensors -> one SMEM array)
# ----------------------------------------------------------------------------
_PARAM_ORDER = ("w1", "b1", "g1", "be1", "w2", "b2", "g2", "be2", "dww", "dwb")
_PARAM_KEYS = {"w1": "w1", "b1": "b1", "g1": "g1", "be1": "beta1",
               "w2": "w2", "b2": "b2", "g2": "g2", "be2": "beta2",
               "dww": "dw_w", "dwb": "dw_b"}


def _pack_params(params):
    flats, offs, o = [], {}, 0
    for name in _PARAM_ORDER:
        a = params[_PARAM_KEYS[name]].astype(jnp.float32).reshape(-1)
        offs[name] = o
        o += a.shape[0]
        flats.append(a)
    return jnp.concatenate(flats), offs


# ----------------------------------------------------------------------------
# Wrapper (NCHW in, NCHW out — no layout transposes)
# ----------------------------------------------------------------------------
def bsconvs_forward(x_nchw, params, *, h_tile=None):
    B, Cin, H, W = x_nchw.shape
    mid = params["w1"].shape[1]
    Cout = params["w2"].shape[1]
    # TODO(synk): wide-channel shapes would want an MXU pointwise path and
    # band-tiled input DMAs for very large images; the unrolled scalar-FMA
    # pointwise + whole-image-resident input below target BSConvS's tiny dims.
    assert Cin * mid + mid * Cout + 9 * Cout <= 4096, "channel counts too large"

    budget, vmem_limit = _vmem_budget_and_limit()
    if h_tile is None:
        TH, nb = _choose_h_tile(H, W, Cin, Cout, B, budget)
    else:
        TH = int(h_tile)
        assert TH == H or TH % 8 == 0, "h_tile must equal H or be a multiple of 8"
        nb = pl.cdiv(H, TH)

    # Zero-pad H by 1 on top and (1 + ragged tail) at the bottom so every band
    # reads a full, in-bounds (TH+2)-row window with an aligned pl.ds.  The
    # kernel's row mask makes the pad rows produce exactly-zero fea.
    pad_bot = nb * TH - H + 1
    x_pad = jnp.pad(x_nchw, ((0, 0), (0, 0), (1, pad_bot), (0, 0)))
    Hp = H + 1 + pad_bot

    packed, OFF = _pack_params(params)

    kernel = partial(_bsconvs_kernel, H=H, W=W, TH=TH,
                     Cin=Cin, mid=mid, Cout=Cout, OFF=OFF)

    return pl.pallas_call(
        kernel,
        out_shape=jax.ShapeDtypeStruct((B, Cout, H, W), x_nchw.dtype),
        grid=(B, nb),
        in_specs=[
            # whole (padded-H) image per batch element; the block index does
            # not depend on t, so Pallas fetches it once per batch element.
            pl.BlockSpec((1, Cin, Hp, W), lambda b, t: (b, 0, 0, 0)),
            # all 10 parameter tensors packed into one small SMEM array
            pl.BlockSpec(memory_space=pltpu.MemorySpace.SMEM),
        ],
        out_specs=pl.BlockSpec((1, Cout, TH, W), lambda b, t: (b, 0, t, 0)),
        scratch_shapes=[pltpu.VMEM((Cout, TH + 2, W), jnp.float32)],
        compiler_params=pltpu.CompilerParams(
            dimension_semantics=("parallel", "parallel"),
            vmem_limit_bytes=vmem_limit),
    )(x_pad, packed)


# ----------------------------------------------------------------------------
# Pure-JAX reference (independent implementation for verification)
# ----------------------------------------------------------------------------
def bsconvs_reference(x_nchw, params):
    Cout = params["w2"].shape[1]

    def ln(h, g, b):
        mu = jnp.mean(h, axis=-1, keepdims=True)
        var = jnp.mean(jnp.square(h - mu), axis=-1, keepdims=True)
        return (h - mu) * jax.lax.rsqrt(var + LN_EPS) * g + b

    x = jnp.transpose(x_nchw, (0, 2, 3, 1))
    h = x @ params["w1"] + params["b1"][0]
    h = ln(h, params["g1"][0], params["beta1"][0])
    h = h @ params["w2"] + params["b2"][0]
    h = ln(h, params["g2"][0], params["beta2"][0])
    h_nchw = jnp.transpose(h, (0, 3, 1, 2))

    w_oihw = jnp.transpose(params["dw_w"].reshape(3, 3, Cout), (2, 0, 1))[:, None, :, :]
    out = jax.lax.conv_general_dilated(
        h_nchw, w_oihw, window_strides=(1, 1), padding=((1, 1), (1, 1)),
        feature_group_count=Cout, dimension_numbers=("NCHW", "OIHW", "NCHW"))
    return out + params["dw_b"][0][None, :, None, None]


# ----------------------------------------------------------------------------
# Deterministic parameter construction (shapes per BSConvS.__init__)
# ----------------------------------------------------------------------------
def init_params(key, in_channels, out_channels, p=0.25, min_mid_channels=4):
    mid = min(in_channels, max(min_mid_channels, math.ceil(p * in_channels)))
    ks = jax.random.split(key, 10)
    f32 = jnp.float32
    params = {
        "w1": 0.3 * jax.random.normal(ks[0], (in_channels, mid), f32),
        "b1": 0.1 * jax.random.normal(ks[1], (1, mid), f32),
        "g1": 1.0 + 0.1 * jax.random.normal(ks[2], (1, mid), f32),
        "beta1": 0.1 * jax.random.normal(ks[3], (1, mid), f32),
        "w2": 0.3 * jax.random.normal(ks[4], (mid, out_channels), f32),
        "b2": 0.1 * jax.random.normal(ks[5], (1, out_channels), f32),
        "g2": 1.0 + 0.1 * jax.random.normal(ks[6], (1, out_channels), f32),
        "beta2": 0.1 * jax.random.normal(ks[7], (1, out_channels), f32),
        "dw_w": 0.3 * jax.random.normal(ks[8], (9, out_channels), f32),
        "dw_b": 0.1 * jax.random.normal(ks[9], (1, out_channels), f32),
    }
    return params, mid


if __name__ == "__main__":
    B, Cin, H, W = 2, 4, 16, 16
    Cout = 8

    key = jax.random.PRNGKey(0)
    k_param, k_x = jax.random.split(key)
    params, mid = init_params(k_param, Cin, Cout)
    x = jax.random.normal(k_x, (B, Cin, H, W), jnp.float32)

    ref = jax.block_until_ready(bsconvs_reference(x, params))

    # Auto-chosen H tile (whole image per band at this small size).
    out = jax.block_until_ready(jax.jit(bsconvs_forward)(x, params))
    assert out.shape == (B, Cout, H, W), out.shape
    np.testing.assert_allclose(np.asarray(out), np.asarray(ref),
                               rtol=1e-4, atol=1e-4)

    # Forced smaller H tile to exercise the multi-band / halo-mask path.
    out_tiled = jax.block_until_ready(
        jax.jit(partial(bsconvs_forward, h_tile=8))(x, params))
    np.testing.assert_allclose(np.asarray(out_tiled), np.asarray(ref),
                               rtol=1e-4, atol=1e-4)

    print("KERNEL_OK")
</pallas_src>

<mosaic_0001>
module attributes {stable_mosaic.version = 11 : i64} {
  func.func @_bsconvs_kernel(%arg0: i32, %arg1: i32, %arg2: memref<1x4x18x16xf32, #tpu.memory_space<vmem>>, %arg3: memref<164xf32, #tpu.memory_space<smem>>, %arg4: memref<1x8x16x16xf32, #tpu.memory_space<vmem>>, %arg5: memref<8x18x16xf32, #tpu.memory_space<vmem>>) attributes {dimension_semantics = [#tpu.dimension_semantics<parallel>, #tpu.dimension_semantics<parallel>], iteration_bounds = array<i64: 2, 1>, scalar_prefetch = 0 : i64, scratch_operands = 1 : i64, tpu.core_type = #tpu.core_type<tc>, window_params = [{transform_indices = @transform_0, window_bounds = array<i64: 1, 4, 18, 16>}, {transform_indices = @transform_1, window_bounds = array<i64: 164>}, {transform_indices = @transform_2, window_bounds = array<i64: 1, 8, 16, 16>}]} {
    %c16_i32 = arith.constant 16 : i32
    %0 = arith.muli %arg1, %c16_i32 : i32
    %1 = tpu.assume_multiple %0, 8 : i32
    %c0 = arith.constant 0 : index
    %c0_0 = arith.constant 0 : index
    %2 = arith.index_cast %1 : i32 to index
    %c0_1 = arith.constant 0 : index
    %3 = vector.load %arg2[%c0, %c0_0, %2, %c0_1] : memref<1x4x18x16xf32, #tpu.memory_space<vmem>>, vector<1x4x18x16xf32>
    %4 = vector.shape_cast %3 : vector<1x4x18x16xf32> to vector<4x18x16xf32>
    %5 = vector.extract_strided_slice %4 {offsets = [0, 0, 0], sizes = [1, 18, 16], strides = [1, 1, 1]} : vector<4x18x16xf32> to vector<1x18x16xf32>
    %6 = vector.shape_cast %5 : vector<1x18x16xf32> to vector<18x16xf32>
    %c0_2 = arith.constant 0 : index
    %7 = memref.load %arg3[%c0_2] : memref<164xf32, #tpu.memory_space<smem>>
    %8 = vector.broadcast %7 : f32 to vector<18x16xf32>
    %9 = arith.mulf %6, %8 : vector<18x16xf32>
    %10 = vector.extract_strided_slice %4 {offsets = [1, 0, 0], sizes = [1, 18, 16], strides = [1, 1, 1]} : vector<4x18x16xf32> to vector<1x18x16xf32>
    %11 = vector.shape_cast %10 : vector<1x18x16xf32> to vector<18x16xf32>
    %c4 = arith.constant 4 : index
    %12 = memref.load %arg3[%c4] : memref<164xf32, #tpu.memory_space<smem>>
    %13 = vector.broadcast %12 : f32 to vector<18x16xf32>
    %14 = arith.mulf %11, %13 : vector<18x16xf32>
    %15 = arith.addf %9, %14 : vector<18x16xf32>
    %16 = vector.extract_strided_slice %4 {offsets = [2, 0, 0], sizes = [1, 18, 16], strides = [1, 1, 1]} : vector<4x18x16xf32> to vector<1x18x16xf32>
    %17 = vector.shape_cast %16 : vector<1x18x16xf32> to vector<18x16xf32>
    %c8 = arith.constant 8 : index
    %18 = memref.load %arg3[%c8] : memref<164xf32, #tpu.memory_space<smem>>
    %19 = vector.broadcast %18 : f32 to vector<18x16xf32>
    %20 = arith.mulf %17, %19 : vector<18x16xf32>
    %21 = arith.addf %15, %20 : vector<18x16xf32>
    %22 = vector.extract_strided_slice %4 {offsets = [3, 0, 0], sizes = [1, 18, 16], strides = [1, 1, 1]} : vector<4x18x16xf32> to vector<1x18x16xf32>
    %23 = vector.shape_cast %22 : vector<1x18x16xf32> to vector<18x16xf32>
    %c12 = arith.constant 12 : index
    %24 = memref.load %arg3[%c12] : memref<164xf32, #tpu.memory_space<smem>>
    %25 = vector.broadcast %24 : f32 to vector<18x16xf32>
    %26 = arith.mulf %23, %25 : vector<18x16xf32>
    %27 = arith.addf %21, %26 : vector<18x16xf32>
    %c16 = arith.constant 16 : index
    %28 = memref.load %arg3[%c16] : memref<164xf32, #tpu.memory_space<smem>>
    %29 = vector.broadcast %28 : f32 to vector<18x16xf32>
    %30 = arith.addf %27, %29 : vector<18x16xf32>
    %31 = vector.extract_strided_slice %4 {offsets = [0, 0, 0], sizes = [1, 18, 16], strides = [1, 1, 1]} : vector<4x18x16xf32> to vector<1x18x16xf32>
    %32 = vector.shape_cast %31 : vector<1x18x16xf32> to vector<18x16xf32>
    %c1 = arith.constant 1 : index
    %33 = memref.load %arg3[%c1] : memref<164xf32, #tpu.memory_space<smem>>
    %34 = vector.broadcast %33 : f32 to vector<18x16xf32>
    %35 = arith.mulf %32, %34 : vector<18x16xf32>
    %36 = vector.extract_strided_slice %4 {offsets = [1, 0, 0], sizes = [1, 18, 16], strides = [1, 1, 1]} : vector<4x18x16xf32> to vector<1x18x16xf32>
    %37 = vector.shape_cast %36 : vector<1x18x16xf32> to vector<18x16xf32>
    %c5 = arith.constant 5 : index
    %38 = memref.load %arg3[%c5] : memref<164xf32, #tpu.memory_space<smem>>
    %39 = vector.broadcast %38 : f32 to vector<18x16xf32>
    %40 = arith.mulf %37, %39 : vector<18x16xf32>
    %41 = arith.addf %35, %40 : vector<18x16xf32>
    %42 = vector.extract_strided_slice %4 {offsets = [2, 0, 0], sizes = [1, 18, 16], strides = [1, 1, 1]} : vector<4x18x16xf32> to vector<1x18x16xf32>
    %43 = vector.shape_cast %42 : vector<1x18x16xf32> to vector<18x16xf32>
    %c9 = arith.constant 9 : index
    %44 = memref.load %arg3[%c9] : memref<164xf32, #tpu.memory_space<smem>>
    %45 = vector.broadcast %44 : f32 to vector<18x16xf32>
    %46 = arith.mulf %43, %45 : vector<18x16xf32>
    %47 = arith.addf %41, %46 : vector<18x16xf32>
    %48 = vector.extract_strided_slice %4 {offsets = [3, 0, 0], sizes = [1, 18, 16], strides = [1, 1, 1]} : vector<4x18x16xf32> to vector<1x18x16xf32>
    %49 = vector.shape_cast %48 : vector<1x18x16xf32> to vector<18x16xf32>
    %c13 = arith.constant 13 : index
    %50 = memref.load %arg3[%c13] : memref<164xf32, #tpu.memory_space<smem>>
    %51 = vector.broadcast %50 : f32 to vector<18x16xf32>
    %52 = arith.mulf %49, %51 : vector<18x16xf32>
    %53 = arith.addf %47, %52 : vector<18x16xf32>
    %c17 = arith.constant 17 : index
    %54 = memref.load %arg3[%c17] : memref<164xf32, #tpu.memory_space<smem>>
    %55 = vector.broadcast %54 : f32 to vector<18x16xf32>
    %56 = arith.addf %53, %55 : vector<18x16xf32>
    %57 = vector.extract_strided_slice %4 {offsets = [0, 0, 0], sizes = [1, 18, 16], strides = [1, 1, 1]} : vector<4x18x16xf32> to vector<1x18x16xf32>
    %58 = vector.shape_cast %57 : vector<1x18x16xf32> to vector<18x16xf32>
    %c2 = arith.constant 2 : index
    %59 = memref.load %arg3[%c2] : memref<164xf32, #tpu.memory_space<smem>>
    %60 = vector.broadcast %59 : f32 to vector<18x16xf32>
    %61 = arith.mulf %58, %60 : vector<18x16xf32>
    %62 = vector.extract_strided_slice %4 {offsets = [1, 0, 0], sizes = [1, 18, 16], strides = [1, 1, 1]} : vector<4x18x16xf32> to vector<1x18x16xf32>
    %63 = vector.shape_cast %62 : vector<1x18x16xf32> to vector<18x16xf32>
    %c6 = arith.constant 6 : index
    %64 = memref.load %arg3[%c6] : memref<164xf32, #tpu.memory_space<smem>>
    %65 = vector.broadcast %64 : f32 to vector<18x16xf32>
    %66 = arith.mulf %63, %65 : vector<18x16xf32>
    %67 = arith.addf %61, %66 : vector<18x16xf32>
    %68 = vector.extract_strided_slice %4 {offsets = [2, 0, 0], sizes = [1, 18, 16], strides = [1, 1, 1]} : vector<4x18x16xf32> to vector<1x18x16xf32>
    %69 = vector.shape_cast %68 : vector<1x18x16xf32> to vector<18x16xf32>
    %c10 = arith.constant 10 : index
    %70 = memref.load %arg3[%c10] : memref<164xf32, #tpu.memory_space<smem>>
    %71 = vector.broadcast %70 : f32 to vector<18x16xf32>
    %72 = arith.mulf %69, %71 : vector<18x16xf32>
    %73 = arith.addf %67, %72 : vector<18x16xf32>
    %74 = vector.extract_strided_slice %4 {offsets = [3, 0, 0], sizes = [1, 18, 16], strides = [1, 1, 1]} : vector<4x18x16xf32> to vector<1x18x16xf32>
    %75 = vector.shape_cast %74 : vector<1x18x16xf32> to vector<18x16xf32>
    %c14 = arith.constant 14 : index
    %76 = memref.load %arg3[%c14] : memref<164xf32, #tpu.memory_space<smem>>
    %77 = vector.broadcast %76 : f32 to vector<18x16xf32>
    %78 = arith.mulf %75, %77 : vector<18x16xf32>
    %79 = arith.addf %73, %78 : vector<18x16xf32>
    %c18 = arith.constant 18 : index
    %80 = memref.load %arg3[%c18] : memref<164xf32, #tpu.memory_space<smem>>
    %81 = vector.broadcast %80 : f32 to vector<18x16xf32>
    %82 = arith.addf %79, %81 : vector<18x16xf32>
    %83 = vector.extract_strided_slice %4 {offsets = [0, 0, 0], sizes = [1, 18, 16], strides = [1, 1, 1]} : vector<4x18x16xf32> to vector<1x18x16xf32>
    %84 = vector.shape_cast %83 : vector<1x18x16xf32> to vector<18x16xf32>
    %c3 = arith.constant 3 : index
    %85 = memref.load %arg3[%c3] : memref<164xf32, #tpu.memory_space<smem>>
    %86 = vector.broadcast %85 : f32 to vector<18x16xf32>
    %87 = arith.mulf %84, %86 : vector<18x16xf32>
    %88 = vector.extract_strided_slice %4 {offsets = [1, 0, 0], sizes = [1, 18, 16], strides = [1, 1, 1]} : vector<4x18x16xf32> to vector<1x18x16xf32>
    %89 = vector.shape_cast %88 : vector<1x18x16xf32> to vector<18x16xf32>
    %c7 = arith.constant 7 : index
    %90 = memref.load %arg3[%c7] : memref<164xf32, #tpu.memory_space<smem>>
    %91 = vector.broadcast %90 : f32 to vector<18x16xf32>
    %92 = arith.mulf %89, %91 : vector<18x16xf32>
    %93 = arith.addf %87, %92 : vector<18x16xf32>
    %94 = vector.extract_strided_slice %4 {offsets = [2, 0, 0], sizes = [1, 18, 16], strides = [1, 1, 1]} : vector<4x18x16xf32> to vector<1x18x16xf32>
    %95 = vector.shape_cast %94 : vector<1x18x16xf32> to vector<18x16xf32>
    %c11 = arith.constant 11 : index
    %96 = memref.load %arg3[%c11] : memref<164xf32, #tpu.memory_space<smem>>
    %97 = vector.broadcast %96 : f32 to vector<18x16xf32>
    %98 = arith.mulf %95, %97 : vector<18x16xf32>
    %99 = arith.addf %93, %98 : vector<18x16xf32>
    %100 = vector.extract_strided_slice %4 {offsets = [3, 0, 0], sizes = [1, 18, 16], strides = [1, 1, 1]} : vector<4x18x16xf32> to vector<1x18x16xf32>
    %101 = vector.shape_cast %100 : vector<1x18x16xf32> to vector<18x16xf32>
    %c15 = arith.constant 15 : index
    %102 = memref.load %arg3[%c15] : memref<164xf32, #tpu.memory_space<smem>>
    %103 = vector.broadcast %102 : f32 to vector<18x16xf32>
    %104 = arith.mulf %101, %103 : vector<18x16xf32>
    %105 = arith.addf %99, %104 : vector<18x16xf32>
    %c19 = arith.constant 19 : index
    %106 = memref.load %arg3[%c19] : memref<164xf32, #tpu.memory_space<smem>>
    %107 = vector.broadcast %106 : f32 to vector<18x16xf32>
    %108 = arith.addf %105, %107 : vector<18x16xf32>
    %109 = arith.addf %30, %56 : vector<18x16xf32>
    %110 = arith.addf %109, %82 : vector<18x16xf32>
    %111 = arith.addf %110, %108 : vector<18x16xf32>
    %cst = arith.constant 2.500000e-01 : f32
    %112 = vector.broadcast %cst : f32 to vector<18x16xf32>
    %113 = arith.mulf %111, %112 : vector<18x16xf32>
    %114 = arith.subf %30, %113 : vector<18x16xf32>
    %115 = arith.subf %56, %113 : vector<18x16xf32>
    %116 = arith.subf %82, %113 : vector<18x16xf32>
    %117 = arith.subf %108, %113 : vector<18x16xf32>
    %118 = arith.mulf %114, %114 : vector<18x16xf32>
    %119 = arith.mulf %115, %115 : vector<18x16xf32>
    %120 = arith.addf %118, %119 : vector<18x16xf32>
    %121 = arith.mulf %116, %116 : vector<18x16xf32>
    %122 = arith.addf %120, %121 : vector<18x16xf32>
    %123 = arith.mulf %117, %117 : vector<18x16xf32>
    %124 = arith.addf %122, %123 : vector<18x16xf32>
    %cst_3 = arith.constant 2.500000e-01 : f32
    %125 = vector.broadcast %cst_3 : f32 to vector<18x16xf32>
    %126 = arith.mulf %124, %125 : vector<18x16xf32>
    %cst_4 = arith.constant 9.99999974E-6 : f32
    %127 = vector.broadcast %cst_4 : f32 to vector<18x16xf32>
    %128 = arith.addf %126, %127 : vector<18x16xf32>
    %129 = math.rsqrt %128 : vector<18x16xf32>
    %130 = arith.mulf %114, %129 : vector<18x16xf32>
    %c20 = arith.constant 20 : index
    %131 = memref.load %arg3[%c20] : memref<164xf32, #tpu.memory_space<smem>>
    %132 = vector.broadcast %131 : f32 to vector<18x16xf32>
    %133 = arith.mulf %130, %132 : vector<18x16xf32>
    %c24 = arith.constant 24 : index
    %134 = memref.load %arg3[%c24] : memref<164xf32, #tpu.memory_space<smem>>
    %135 = vector.broadcast %134 : f32 to vector<18x16xf32>
    %136 = arith.addf %133, %135 : vector<18x16xf32>
    %137 = arith.mulf %115, %129 : vector<18x16xf32>
    %c21 = arith.constant 21 : index
    %138 = memref.load %arg3[%c21] : memref<164xf32, #tpu.memory_space<smem>>
    %139 = vector.broadcast %138 : f32 to vector<18x16xf32>
    %140 = arith.mulf %137, %139 : vector<18x16xf32>
    %c25 = arith.constant 25 : index
    %141 = memref.load %arg3[%c25] : memref<164xf32, #tpu.memory_space<smem>>
    %142 = vector.broadcast %141 : f32 to vector<18x16xf32>
    %143 = arith.addf %140, %142 : vector<18x16xf32>
    %144 = arith.mulf %116, %129 : vector<18x16xf32>
    %c22 = arith.constant 22 : index
    %145 = memref.load %arg3[%c22] : memref<164xf32, #tpu.memory_space<smem>>
    %146 = vector.broadcast %145 : f32 to vector<18x16xf32>
    %147 = arith.mulf %144, %146 : vector<18x16xf32>
    %c26 = arith.constant 26 : index
    %148 = memref.load %arg3[%c26] : memref<164xf32, #tpu.memory_space<smem>>
    %149 = vector.broadcast %148 : f32 to vector<18x16xf32>
    %150 = arith.addf %147, %149 : vector<18x16xf32>
    %151 = arith.mulf %117, %129 : vector<18x16xf32>
    %c23 = arith.constant 23 : index
    %152 = memref.load %arg3[%c23] : memref<164xf32, #tpu.memory_space<smem>>
    %153 = vector.broadcast %152 : f32 to vector<18x16xf32>
    %154 = arith.mulf %151, %153 : vector<18x16xf32>
    %c27 = arith.constant 27 : index
    %155 = memref.load %arg3[%c27] : memref<164xf32, #tpu.memory_space<smem>>
    %156 = vector.broadcast %155 : f32 to vector<18x16xf32>
    %157 = arith.addf %154, %156 : vector<18x16xf32>
    %c28 = arith.constant 28 : index
    %158 = memref.load %arg3[%c28] : memref<164xf32, #tpu.memory_space<smem>>
    %159 = vector.broadcast %158 : f32 to vector<18x16xf32>
    %160 = arith.mulf %136, %159 : vector<18x16xf32>
    %c36 = arith.constant 36 : index
    %161 = memref.load %arg3[%c36] : memref<164xf32, #tpu.memory_space<smem>>
    %162 = vector.broadcast %161 : f32 to vector<18x16xf32>
    %163 = arith.mulf %143, %162 : vector<18x16xf32>
    %164 = arith.addf %160, %163 : vector<18x16xf32>
    %c44 = arith.constant 44 : index
    %165 = memref.load %arg3[%c44] : memref<164xf32, #tpu.memory_space<smem>>
    %166 = vector.broadcast %165 : f32 to vector<18x16xf32>
    %167 = arith.mulf %150, %166 : vector<18x16xf32>
    %168 = arith.addf %164, %167 : vector<18x16xf32>
    %c52 = arith.constant 52 : index
    %169 = memref.load %arg3[%c52] : memref<164xf32, #tpu.memory_space<smem>>
    %170 = vector.broadcast %169 : f32 to vector<18x16xf32>
    %171 = arith.mulf %157, %170 : vector<18x16xf32>
    %172 = arith.addf %168, %171 : vector<18x16xf32>
    %c60 = arith.constant 60 : index
    %173 = memref.load %arg3[%c60] : memref<164xf32, #tpu.memory_space<smem>>
    %174 = vector.broadcast %173 : f32 to vector<18x16xf32>
    %175 = arith.addf %172, %174 : vector<18x16xf32>
    %c29 = arith.constant 29 : index
    %176 = memref.load %arg3[%c29] : memref<164xf32, #tpu.memory_space<smem>>
    %177 = vector.broadcast %176 : f32 to vector<18x16xf32>
    %178 = arith.mulf %136, %177 : vector<18x16xf32>
    %c37 = arith.constant 37 : index
    %179 = memref.load %arg3[%c37] : memref<164xf32, #tpu.memory_space<smem>>
    %180 = vector.broadcast %179 : f32 to vector<18x16xf32>
    %181 = arith.mulf %143, %180 : vector<18x16xf32>
    %182 = arith.addf %178, %181 : vector<18x16xf32>
    %c45 = arith.constant 45 : index
    %183 = memref.load %arg3[%c45] : memref<164xf32, #tpu.memory_space<smem>>
    %184 = vector.broadcast %183 : f32 to vector<18x16xf32>
    %185 = arith.mulf %150, %184 : vector<18x16xf32>
    %186 = arith.addf %182, %185 : vector<18x16xf32>
    %c53 = arith.constant 53 : index
    %187 = memref.load %arg3[%c53] : memref<164xf32, #tpu.memory_space<smem>>
    %188 = vector.broadcast %187 : f32 to vector<18x16xf32>
    %189 = arith.mulf %157, %188 : vector<18x16xf32>
    %190 = arith.addf %186, %189 : vector<18x16xf32>
    %c61 = arith.constant 61 : index
    %191 = memref.load %arg3[%c61] : memref<164xf32, #tpu.memory_space<smem>>
    %192 = vector.broadcast %191 : f32 to vector<18x16xf32>
    %193 = arith.addf %190, %192 : vector<18x16xf32>
    %c30 = arith.constant 30 : index
    %194 = memref.load %arg3[%c30] : memref<164xf32, #tpu.memory_space<smem>>
    %195 = vector.broadcast %194 : f32 to vector<18x16xf32>
    %196 = arith.mulf %136, %195 : vector<18x16xf32>
    %c38 = arith.constant 38 : index
    %197 = memref.load %arg3[%c38] : memref<164xf32, #tpu.memory_space<smem>>
    %198 = vector.broadcast %197 : f32 to vector<18x16xf32>
    %199 = arith.mulf %143, %198 : vector<18x16xf32>
    %200 = arith.addf %196, %199 : vector<18x16xf32>
    %c46 = arith.constant 46 : index
    %201 = memref.load %arg3[%c46] : memref<164xf32, #tpu.memory_space<smem>>
    %202 = vector.broadcast %201 : f32 to vector<18x16xf32>
    %203 = arith.mulf %150, %202 : vector<18x16xf32>
    %204 = arith.addf %200, %203 : vector<18x16xf32>
    %c54 = arith.constant 54 : index
    %205 = memref.load %arg3[%c54] : memref<164xf32, #tpu.memory_space<smem>>
    %206 = vector.broadcast %205 : f32 to vector<18x16xf32>
    %207 = arith.mulf %157, %206 : vector<18x16xf32>
    %208 = arith.addf %204, %207 : vector<18x16xf32>
    %c62 = arith.constant 62 : index
    %209 = memref.load %arg3[%c62] : memref<164xf32, #tpu.memory_space<smem>>
    %210 = vector.broadcast %209 : f32 to vector<18x16xf32>
    %211 = arith.addf %208, %210 : vector<18x16xf32>
    %c31 = arith.constant 31 : index
    %212 = memref.load %arg3[%c31] : memref<164xf32, #tpu.memory_space<smem>>
    %213 = vector.broadcast %212 : f32 to vector<18x16xf32>
    %214 = arith.mulf %136, %213 : vector<18x16xf32>
    %c39 = arith.constant 39 : index
    %215 = memref.load %arg3[%c39] : memref<164xf32, #tpu.memory_space<smem>>
    %216 = vector.broadcast %215 : f32 to vector<18x16xf32>
    %217 = arith.mulf %143, %216 : vector<18x16xf32>
    %218 = arith.addf %214, %217 : vector<18x16xf32>
    %c47 = arith.constant 47 : index
    %219 = memref.load %arg3[%c47] : memref<164xf32, #tpu.memory_space<smem>>
    %220 = vector.broadcast %219 : f32 to vector<18x16xf32>
    %221 = arith.mulf %150, %220 : vector<18x16xf32>
    %222 = arith.addf %218, %221 : vector<18x16xf32>
    %c55 = arith.constant 55 : index
    %223 = memref.load %arg3[%c55] : memref<164xf32, #tpu.memory_space<smem>>
    %224 = vector.broadcast %223 : f32 to vector<18x16xf32>
    %225 = arith.mulf %157, %224 : vector<18x16xf32>
    %226 = arith.addf %222, %225 : vector<18x16xf32>
    %c63 = arith.constant 63 : index
    %227 = memref.load %arg3[%c63] : memref<164xf32, #tpu.memory_space<smem>>
    %228 = vector.broadcast %227 : f32 to vector<18x16xf32>
    %229 = arith.addf %226, %228 : vector<18x16xf32>
    %c32 = arith.constant 32 : index
    %230 = memref.load %arg3[%c32] : memref<164xf32, #tpu.memory_space<smem>>
    %231 = vector.broadcast %230 : f32 to vector<18x16xf32>
    %232 = arith.mulf %136, %231 : vector<18x16xf32>
    %c40 = arith.constant 40 : index
    %233 = memref.load %arg3[%c40] : memref<164xf32, #tpu.memory_space<smem>>
    %234 = vector.broadcast %233 : f32 to vector<18x16xf32>
    %235 = arith.mulf %143, %234 : vector<18x16xf32>
    %236 = arith.addf %232, %235 : vector<18x16xf32>
    %c48 = arith.constant 48 : index
    %237 = memref.load %arg3[%c48] : memref<164xf32, #tpu.memory_space<smem>>
    %238 = vector.broadcast %237 : f32 to vector<18x16xf32>
    %239 = arith.mulf %150, %238 : vector<18x16xf32>
    %240 = arith.addf %236, %239 : vector<18x16xf32>
    %c56 = arith.constant 56 : index
    %241 = memref.load %arg3[%c56] : memref<164xf32, #tpu.memory_space<smem>>
    %242 = vector.broadcast %241 : f32 to vector<18x16xf32>
    %243 = arith.mulf %157, %242 : vector<18x16xf32>
    %244 = arith.addf %240, %243 : vector<18x16xf32>
    %c64 = arith.constant 64 : index
    %245 = memref.load %arg3[%c64] : memref<164xf32, #tpu.memory_space<smem>>
    %246 = vector.broadcast %245 : f32 to vector<18x16xf32>
    %247 = arith.addf %244, %246 : vector<18x16xf32>
    %c33 = arith.constant 33 : index
    %248 = memref.load %arg3[%c33] : memref<164xf32, #tpu.memory_space<smem>>
    %249 = vector.broadcast %248 : f32 to vector<18x16xf32>
    %250 = arith.mulf %136, %249 : vector<18x16xf32>
    %c41 = arith.constant 41 : index
    %251 = memref.load %arg3[%c41] : memref<164xf32, #tpu.memory_space<smem>>
    %252 = vector.broadcast %251 : f32 to vector<18x16xf32>
    %253 = arith.mulf %143, %252 : vector<18x16xf32>
    %254 = arith.addf %250, %253 : vector<18x16xf32>
    %c49 = arith.constant 49 : index
    %255 = memref.load %arg3[%c49] : memref<164xf32, #tpu.memory_space<smem>>
    %256 = vector.broadcast %255 : f32 to vector<18x16xf32>
    %257 = arith.mulf %150, %256 : vector<18x16xf32>
    %258 = arith.addf %254, %257 : vector<18x16xf32>
    %c57 = arith.constant 57 : index
    %259 = memref.load %arg3[%c57] : memref<164xf32, #tpu.memory_space<smem>>
    %260 = vector.broadcast %259 : f32 to vector<18x16xf32>
    %261 = arith.mulf %157, %260 : vector<18x16xf32>
    %262 = arith.addf %258, %261 : vector<18x16xf32>
    %c65 = arith.constant 65 : index
    %263 = memref.load %arg3[%c65] : memref<164xf32, #tpu.memory_space<smem>>
    %264 = vector.broadcast %263 : f32 to vector<18x16xf32>
    %265 = arith.addf %262, %264 : vector<18x16xf32>
    %c34 = arith.constant 34 : index
    %266 = memref.load %arg3[%c34] : memref<164xf32, #tpu.memory_space<smem>>
    %267 = vector.broadcast %266 : f32 to vector<18x16xf32>
    %268 = arith.mulf %136, %267 : vector<18x16xf32>
    %c42 = arith.constant 42 : index
    %269 = memref.load %arg3[%c42] : memref<164xf32, #tpu.memory_space<smem>>
    %270 = vector.broadcast %269 : f32 to vector<18x16xf32>
    %271 = arith.mulf %143, %270 : vector<18x16xf32>
    %272 = arith.addf %268, %271 : vector<18x16xf32>
    %c50 = arith.constant 50 : index
    %273 = memref.load %arg3[%c50] : memref<164xf32, #tpu.memory_space<smem>>
    %274 = vector.broadcast %273 : f32 to vector<18x16xf32>
    %275 = arith.mulf %150, %274 : vector<18x16xf32>
    %276 = arith.addf %272, %275 : vector<18x16xf32>
    %c58 = arith.constant 58 : index
    %277 = memref.load %arg3[%c58] : memref<164xf32, #tpu.memory_space<smem>>
    %278 = vector.broadcast %277 : f32 to vector<18x16xf32>
    %279 = arith.mulf %157, %278 : vector<18x16xf32>
    %280 = arith.addf %276, %279 : vector<18x16xf32>
    %c66 = arith.constant 66 : index
    %281 = memref.load %arg3[%c66] : memref<164xf32, #tpu.memory_space<smem>>
    %282 = vector.broadcast %281 : f32 to vector<18x16xf32>
    %283 = arith.addf %280, %282 : vector<18x16xf32>
    %c35 = arith.constant 35 : index
    %284 = memref.load %arg3[%c35] : memref<164xf32, #tpu.memory_space<smem>>
    %285 = vector.broadcast %284 : f32 to vector<18x16xf32>
    %286 = arith.mulf %136, %285 : vector<18x16xf32>
    %c43 = arith.constant 43 : index
    %287 = memref.load %arg3[%c43] : memref<164xf32, #tpu.memory_space<smem>>
    %288 = vector.broadcast %287 : f32 to vector<18x16xf32>
    %289 = arith.mulf %143, %288 : vector<18x16xf32>
    %290 = arith.addf %286, %289 : vector<18x16xf32>
    %c51 = arith.constant 51 : index
    %291 = memref.load %arg3[%c51] : memref<164xf32, #tpu.memory_space<smem>>
    %292 = vector.broadcast %291 : f32 to vector<18x16xf32>
    %293 = arith.mulf %150, %292 : vector<18x16xf32>
    %294 = arith.addf %290, %293 : vector<18x16xf32>
    %c59 = arith.constant 59 : index
    %295 = memref.load %arg3[%c59] : memref<164xf32, #tpu.memory_space<smem>>
    %296 = vector.broadcast %295 : f32 to vector<18x16xf32>
    %297 = arith.mulf %157, %296 : vector<18x16xf32>
    %298 = arith.addf %294, %297 : vector<18x16xf32>
    %c67 = arith.constant 67 : index
    %299 = memref.load %arg3[%c67] : memref<164xf32, #tpu.memory_space<smem>>
    %300 = vector.broadcast %299 : f32 to vector<18x16xf32>
    %301 = arith.addf %298, %300 : vector<18x16xf32>
    %302 = arith.addf %175, %193 : vector<18x16xf32>
    %303 = arith.addf %302, %211 : vector<18x16xf32>
    %304 = arith.addf %303, %229 : vector<18x16xf32>
    %305 = arith.addf %304, %247 : vector<18x16xf32>
    %306 = arith.addf %305, %265 : vector<18x16xf32>
    %307 = arith.addf %306, %283 : vector<18x16xf32>
    %308 = arith.addf %307, %301 : vector<18x16xf32>
    %cst_5 = arith.constant 1.250000e-01 : f32
    %309 = vector.broadcast %cst_5 : f32 to vector<18x16xf32>
    %310 = arith.mulf %308, %309 : vector<18x16xf32>
    %311 = arith.subf %175, %310 : vector<18x16xf32>
    %312 = arith.subf %193, %310 : vector<18x16xf32>
    %313 = arith.subf %211, %310 : vector<18x16xf32>
    %314 = arith.subf %229, %310 : vector<18x16xf32>
    %315 = arith.subf %247, %310 : vector<18x16xf32>
    %316 = arith.subf %265, %310 : vector<18x16xf32>
    %317 = arith.subf %283, %310 : vector<18x16xf32>
    %318 = arith.subf %301, %310 : vector<18x16xf32>
    %319 = arith.mulf %311, %311 : vector<18x16xf32>
    %320 = arith.mulf %312, %312 : vector<18x16xf32>
    %321 = arith.addf %319, %320 : vector<18x16xf32>
    %322 = arith.mulf %313, %313 : vector<18x16xf32>
    %323 = arith.addf %321, %322 : vector<18x16xf32>
    %324 = arith.mulf %314, %314 : vector<18x16xf32>
    %325 = arith.addf %323, %324 : vector<18x16xf32>
    %326 = arith.mulf %315, %315 : vector<18x16xf32>
    %327 = arith.addf %325, %326 : vector<18x16xf32>
    %328 = arith.mulf %316, %316 : vector<18x16xf32>
    %329 = arith.addf %327, %328 : vector<18x16xf32>
    %330 = arith.mulf %317, %317 : vector<18x16xf32>
    %331 = arith.addf %329, %330 : vector<18x16xf32>
    %332 = arith.mulf %318, %318 : vector<18x16xf32>
    %333 = arith.addf %331, %332 : vector<18x16xf32>
    %cst_6 = arith.constant 1.250000e-01 : f32
    %334 = vector.broadcast %cst_6 : f32 to vector<18x16xf32>
    %335 = arith.mulf %333, %334 : vector<18x16xf32>
    %cst_7 = arith.constant 9.99999974E-6 : f32
    %336 = vector.broadcast %cst_7 : f32 to vector<18x16xf32>
    %337 = arith.addf %335, %336 : vector<18x16xf32>
    %338 = math.rsqrt %337 : vector<18x16xf32>
    %339 = tpu.iota {dimensions = array<i32: 0>} : vector<18x16xi32>
    %c16_i32_8 = arith.constant 16 : i32
    %340 = arith.muli %arg1, %c16_i32_8 : i32
    %341 = vector.broadcast %340 : i32 to vector<18x16xi32>
    %342 = arith.addi %341, %339 : vector<18x16xi32>
    %c1_i32 = arith.constant 1 : i32
    %343 = vector.broadcast %c1_i32 : i32 to vector<18x16xi32>
    %344 = arith.cmpi sge, %342, %343 : vector<18x16xi32>
    %c16_i32_9 = arith.constant 16 : i32
    %345 = vector.broadcast %c16_i32_9 : i32 to vector<18x16xi32>
    %346 = arith.cmpi sle, %342, %345 : vector<18x16xi32>
    %347 = arith.andi %344, %346 : vector<18x16xi1>
    %348 = arith.mulf %311, %338 : vector<18x16xf32>
    %c68 = arith.constant 68 : index
    %349 = memref.load %arg3[%c68] : memref<164xf32, #tpu.memory_space<smem>>
    %350 = vector.broadcast %349 : f32 to vector<18x16xf32>
    %351 = arith.mulf %348, %350 : vector<18x16xf32>
    %c76 = arith.constant 76 : index
    %352 = memref.load %arg3[%c76] : memref<164xf32, #tpu.memory_space<smem>>
    %353 = vector.broadcast %352 : f32 to vector<18x16xf32>
    %354 = arith.addf %351, %353 : vector<18x16xf32>
    %cst_10 = arith.constant 0.000000e+00 : f32
    %355 = vector.broadcast %cst_10 : f32 to vector<18x16xf32>
    %356 = arith.select %347, %354, %355 : vector<18x16xi1>, vector<18x16xf32>
    %c0_11 = arith.constant 0 : index
    %c0_12 = arith.constant 0 : index
    %c0_13 = arith.constant 0 : index
    %357 = vector.load %arg5[%c0_11, %c0_12, %c0_13] : memref<8x18x16xf32, #tpu.memory_space<vmem>>, vector<1x18x16xf32>
    %358 = vector.shape_cast %357 : vector<1x18x16xf32> to vector<18x16xf32>
    %359 = vector.shape_cast %356 : vector<18x16xf32> to vector<1x18x16xf32>
    tpu.vector_store %arg5[%c0_11, %c0_12, %c0_13], %359 {strides = array<i32>} : memref<8x18x16xf32, #tpu.memory_space<vmem>>, vector<1x18x16xf32>,
    %360 = arith.mulf %312, %338 : vector<18x16xf32>
    %c69 = arith.constant 69 : index
    %361 = memref.load %arg3[%c69] : memref<164xf32, #tpu.memory_space<smem>>
    %362 = vector.broadcast %361 : f32 to vector<18x16xf32>
    %363 = arith.mulf %360, %362 : vector<18x16xf32>
    %c77 = arith.constant 77 : index
    %364 = memref.load %arg3[%c77] : memref<164xf32, #tpu.memory_space<smem>>
    %365 = vector.broadcast %364 : f32 to vector<18x16xf32>
    %366 = arith.addf %363, %365 : vector<18x16xf32>
    %cst_14 = arith.constant 0.000000e+00 : f32
    %367 = vector.broadcast %cst_14 : f32 to vector<18x16xf32>
    %368 = arith.select %347, %366, %367 : vector<18x16xi1>, vector<18x16xf32>
    %c1_15 = arith.constant 1 : index
    %c0_16 = arith.constant 0 : index
    %c0_17 = arith.constant 0 : index
    %369 = vector.load %arg5[%c1_15, %c0_16, %c0_17] : memref<8x18x16xf32, #tpu.memory_space<vmem>>, vector<1x18x16xf32>
    %370 = vector.shape_cast %369 : vector<1x18x16xf32> to vector<18x16xf32>
    %371 = vector.shape_cast %368 : vector<18x16xf32> to vector<1x18x16xf32>
    tpu.vector_store %arg5[%c1_15, %c0_16, %c0_17], %371 {strides = array<i32>} : memref<8x18x16xf32, #tpu.memory_space<vmem>>, vector<1x18x16xf32>,
    %372 = arith.mulf %313, %338 : vector<18x16xf32>
    %c70 = arith.constant 70 : index
    %373 = memref.load %arg3[%c70] : memref<164xf32, #tpu.memory_space<smem>>
    %374 = vector.broadcast %373 : f32 to vector<18x16xf32>
    %375 = arith.mulf %372, %374 : vector<18x16xf32>
    %c78 = arith.constant 78 : index
    %376 = memref.load %arg3[%c78] : memref<164xf32, #tpu.memory_space<smem>>
    %377 = vector.broadcast %376 : f32 to vector<18x16xf32>
    %378 = arith.addf %375, %377 : vector<18x16xf32>
    %cst_18 = arith.constant 0.000000e+00 : f32
    %379 = vector.broadcast %cst_18 : f32 to vector<18x16xf32>
    %380 = arith.select %347, %378, %379 : vector<18x16xi1>, vector<18x16xf32>
    %c2_19 = arith.constant 2 : index
    %c0_20 = arith.constant 0 : index
    %c0_21 = arith.constant 0 : index
    %381 = vector.load %arg5[%c2_19, %c0_20, %c0_21] : memref<8x18x16xf32, #tpu.memory_space<vmem>>, vector<1x18x16xf32>
    %382 = vector.shape_cast %381 : vector<1x18x16xf32> to vector<18x16xf32>
    %383 = vector.shape_cast %380 : vector<18x16xf32> to vector<1x18x16xf32>
    tpu.vector_store %arg5[%c2_19, %c0_20, %c0_21], %383 {strides = array<i32>} : memref<8x18x16xf32, #tpu.memory_space<vmem>>, vector<1x18x16xf32>,
    %384 = arith.mulf %314, %338 : vector<18x16xf32>
    %c71 = arith.constant 71 : index
    %385 = memref.load %arg3[%c71] : memref<164xf32, #tpu.memory_space<smem>>
    %386 = vector.broadcast %385 : f32 to vector<18x16xf32>
    %387 = arith.mulf %384, %386 : vector<18x16xf32>
    %c79 = arith.constant 79 : index
    %388 = memref.load %arg3[%c79] : memref<164xf32, #tpu.memory_space<smem>>
    %389 = vector.broadcast %388 : f32 to vector<18x16xf32>
    %390 = arith.addf %387, %389 : vector<18x16xf32>
    %cst_22 = arith.constant 0.000000e+00 : f32
    %391 = vector.broadcast %cst_22 : f32 to vector<18x16xf32>
    %392 = arith.select %347, %390, %391 : vector<18x16xi1>, vector<18x16xf32>
    %c3_23 = arith.constant 3 : index
    %c0_24 = arith.constant 0 : index
    %c0_25 = arith.constant 0 : index
    %393 = vector.load %arg5[%c3_23, %c0_24, %c0_25] : memref<8x18x16xf32, #tpu.memory_space<vmem>>, vector<1x18x16xf32>
    %394 = vector.shape_cast %393 : vector<1x18x16xf32> to vector<18x16xf32>
    %395 = vector.shape_cast %392 : vector<18x16xf32> to vector<1x18x16xf32>
    tpu.vector_store %arg5[%c3_23, %c0_24, %c0_25], %395 {strides = array<i32>} : memref<8x18x16xf32, #tpu.memory_space<vmem>>, vector<1x18x16xf32>,
    %396 = arith.mulf %315, %338 : vector<18x16xf32>
    %c72 = arith.constant 72 : index
    %397 = memref.load %arg3[%c72] : memref<164xf32, #tpu.memory_space<smem>>
    %398 = vector.broadcast %397 : f32 to vector<18x16xf32>
    %399 = arith.mulf %396, %398 : vector<18x16xf32>
    %c80 = arith.constant 80 : index
    %400 = memref.load %arg3[%c80] : memref<164xf32, #tpu.memory_space<smem>>
    %401 = vector.broadcast %400 : f32 to vector<18x16xf32>
    %402 = arith.addf %399, %401 : vector<18x16xf32>
    %cst_26 = arith.constant 0.000000e+00 : f32
    %403 = vector.broadcast %cst_26 : f32 to vector<18x16xf32>
    %404 = arith.select %347, %402, %403 : vector<18x16xi1>, vector<18x16xf32>
    %c4_27 = arith.constant 4 : index
    %c0_28 = arith.constant 0 : index
    %c0_29 = arith.constant 0 : index
    %405 = vector.load %arg5[%c4_27, %c0_28, %c0_29] : memref<8x18x16xf32, #tpu.memory_space<vmem>>, vector<1x18x16xf32>
    %406 = vector.shape_cast %405 : vector<1x18x16xf32> to vector<18x16xf32>
    %407 = vector.shape_cast %404 : vector<18x16xf32> to vector<1x18x16xf32>
    tpu.vector_store %arg5[%c4_27, %c0_28, %c0_29], %407 {strides = array<i32>} : memref<8x18x16xf32, #tpu.memory_space<vmem>>, vector<1x18x16xf32>,
    %408 = arith.mulf %316, %338 : vector<18x16xf32>
    %c73 = arith.constant 73 : index
    %409 = memref.load %arg3[%c73] : memref<164xf32, #tpu.memory_space<smem>>
    %410 = vector.broadcast %409 : f32 to vector<18x16xf32>
    %411 = arith.mulf %408, %410 : vector<18x16xf32>
    %c81 = arith.constant 81 : index
    %412 = memref.load %arg3[%c81] : memref<164xf32, #tpu.memory_space<smem>>
    %413 = vector.broadcast %412 : f32 to vector<18x16xf32>
    %414 = arith.addf %411, %413 : vector<18x16xf32>
    %cst_30 = arith.constant 0.000000e+00 : f32
    %415 = vector.broadcast %cst_30 : f32 to vector<18x16xf32>
    %416 = arith.select %347, %414, %415 : vector<18x16xi1>, vector<18x16xf32>
    %c5_31 = arith.constant 5 : index
    %c0_32 = arith.constant 0 : index
    %c0_33 = arith.constant 0 : index
    %417 = vector.load %arg5[%c5_31, %c0_32, %c0_33] : memref<8x18x16xf32, #tpu.memory_space<vmem>>, vector<1x18x16xf32>
    %418 = vector.shape_cast %417 : vector<1x18x16xf32> to vector<18x16xf32>
    %419 = vector.shape_cast %416 : vector<18x16xf32> to vector<1x18x16xf32>
    tpu.vector_store %arg5[%c5_31, %c0_32, %c0_33], %419 {strides = array<i32>} : memref<8x18x16xf32, #tpu.memory_space<vmem>>, vector<1x18x16xf32>,
    %420 = arith.mulf %317, %338 : vector<18x16xf32>
    %c74 = arith.constant 74 : index
    %421 = memref.load %arg3[%c74] : memref<164xf32, #tpu.memory_space<smem>>
    %422 = vector.broadcast %421 : f32 to vector<18x16xf32>
    %423 = arith.mulf %420, %422 : vector<18x16xf32>
    %c82 = arith.constant 82 : index
    %424 = memref.load %arg3[%c82] : memref<164xf32, #tpu.memory_space<smem>>
    %425 = vector.broadcast %424 : f32 to vector<18x16xf32>
    %426 = arith.addf %423, %425 : vector<18x16xf32>
    %cst_34 = arith.constant 0.000000e+00 : f32
    %427 = vector.broadcast %cst_34 : f32 to vector<18x16xf32>
    %428 = arith.select %347, %426, %427 : vector<18x16xi1>, vector<18x16xf32>
    %c6_35 = arith.constant 6 : index
    %c0_36 = arith.constant 0 : index
    %c0_37 = arith.constant 0 : index
    %429 = vector.load %arg5[%c6_35, %c0_36, %c0_37] : memref<8x18x16xf32, #tpu.memory_space<vmem>>, vector<1x18x16xf32>
    %430 = vector.shape_cast %429 : vector<1x18x16xf32> to vector<18x16xf32>
    %431 = vector.shape_cast %428 : vector<18x16xf32> to vector<1x18x16xf32>
    tpu.vector_store %arg5[%c6_35, %c0_36, %c0_37], %431 {strides = array<i32>} : memref<8x18x16xf32, #tpu.memory_space<vmem>>, vector<1x18x16xf32>,
    %432 = arith.mulf %318, %338 : vector<18x16xf32>
    %c75 = arith.constant 75 : index
    %433 = memref.load %arg3[%c75] : memref<164xf32, #tpu.memory_space<smem>>
    %434 = vector.broadcast %433 : f32 to vector<18x16xf32>
    %435 = arith.mulf %432, %434 : vector<18x16xf32>
    %c83 = arith.constant 83 : index
    %436 = memref.load %arg3[%c83] : memref<164xf32, #tpu.memory_space<smem>>
    %437 = vector.broadcast %436 : f32 to vector<18x16xf32>
    %438 = arith.addf %435, %437 : vector<18x16xf32>
    %cst_38 = arith.constant 0.000000e+00 : f32
    %439 = vector.broadcast %cst_38 : f32 to vector<18x16xf32>
    %440 = arith.select %347, %438, %439 : vector<18x16xi1>, vector<18x16xf32>
    %c7_39 = arith.constant 7 : index
    %c0_40 = arith.constant 0 : index
    %c0_41 = arith.constant 0 : index
    %441 = vector.load %arg5[%c7_39, %c0_40, %c0_41] : memref<8x18x16xf32, #tpu.memory_space<vmem>>, vector<1x18x16xf32>
    %442 = vector.shape_cast %441 : vector<1x18x16xf32> to vector<18x16xf32>
    %443 = vector.shape_cast %440 : vector<18x16xf32> to vector<1x18x16xf32>
    tpu.vector_store %arg5[%c7_39, %c0_40, %c0_41], %443 {strides = array<i32>} : memref<8x18x16xf32, #tpu.memory_space<vmem>>, vector<1x18x16xf32>,
    %cst_42 = arith.constant 0.000000e+00 : f32
    %444 = vector.broadcast %cst_42 : f32 to vector<16x1xf32>
    %c0_43 = arith.constant 0 : index
    %c0_44 = arith.constant 0 : index
    %c0_45 = arith.constant 0 : index
    %445 = vector.load %arg5[%c0_43, %c0_44, %c0_45] : memref<8x18x16xf32, #tpu.memory_space<vmem>>, vector<1x16x16xf32>
    %446 = vector.shape_cast %445 : vector<1x16x16xf32> to vector<16x16xf32>
    %c0_46 = arith.constant 0 : index
    %c1_47 = arith.constant 1 : index
    %c0_48 = arith.constant 0 : index
    %447 = vector.load %arg5[%c0_46, %c1_47, %c0_48] : memref<8x18x16xf32, #tpu.memory_space<vmem>>, vector<1x16x16xf32>
    %448 = vector.shape_cast %447 : vector<1x16x16xf32> to vector<16x16xf32>
    %c0_49 = arith.constant 0 : index
    %c2_50 = arith.constant 2 : index
    %c0_51 = arith.constant 0 : index
    %449 = vector.load %arg5[%c0_49, %c2_50, %c0_51] : memref<8x18x16xf32, #tpu.memory_space<vmem>>, vector<1x16x16xf32>
    %450 = vector.shape_cast %449 : vector<1x16x16xf32> to vector<16x16xf32>
    %c84 = arith.constant 84 : index
    %451 = memref.load %arg3[%c84] : memref<164xf32, #tpu.memory_space<smem>>
    %452 = vector.broadcast %451 : f32 to vector<16x16xf32>
    %453 = arith.mulf %446, %452 : vector<16x16xf32>
    %c108 = arith.constant 108 : index
    %454 = memref.load %arg3[%c108] : memref<164xf32, #tpu.memory_space<smem>>
    %455 = vector.broadcast %454 : f32 to vector<16x16xf32>
    %456 = arith.mulf %448, %455 : vector<16x16xf32>
    %457 = arith.addf %453, %456 : vector<16x16xf32>
    %c132 = arith.constant 132 : index
    %458 = memref.load %arg3[%c132] : memref<164xf32, #tpu.memory_space<smem>>
    %459 = vector.broadcast %458 : f32 to vector<16x16xf32>
    %460 = arith.mulf %450, %459 : vector<16x16xf32>
    %461 = arith.addf %457, %460 : vector<16x16xf32>
    %c92 = arith.constant 92 : index
    %462 = memref.load %arg3[%c92] : memref<164xf32, #tpu.memory_space<smem>>
    %463 = vector.broadcast %462 : f32 to vector<16x16xf32>
    %464 = arith.mulf %446, %463 : vector<16x16xf32>
    %c116 = arith.constant 116 : index
    %465 = memref.load %arg3[%c116] : memref<164xf32, #tpu.memory_space<smem>>
    %466 = vector.broadcast %465 : f32 to vector<16x16xf32>
    %467 = arith.mulf %448, %466 : vector<16x16xf32>
    %468 = arith.addf %464, %467 : vector<16x16xf32>
    %c140 = arith.constant 140 : index
    %469 = memref.load %arg3[%c140] : memref<164xf32, #tpu.memory_space<smem>>
    %470 = vector.broadcast %469 : f32 to vector<16x16xf32>
    %471 = arith.mulf %450, %470 : vector<16x16xf32>
    %472 = arith.addf %468, %471 : vector<16x16xf32>
    %c100 = arith.constant 100 : index
    %473 = memref.load %arg3[%c100] : memref<164xf32, #tpu.memory_space<smem>>
    %474 = vector.broadcast %473 : f32 to vector<16x16xf32>
    %475 = arith.mulf %446, %474 : vector<16x16xf32>
    %c124 = arith.constant 124 : index
    %476 = memref.load %arg3[%c124] : memref<164xf32, #tpu.memory_space<smem>>
    %477 = vector.broadcast %476 : f32 to vector<16x16xf32>
    %478 = arith.mulf %448, %477 : vector<16x16xf32>
    %479 = arith.addf %475, %478 : vector<16x16xf32>
    %c148 = arith.constant 148 : index
    %480 = memref.load %arg3[%c148] : memref<164xf32, #tpu.memory_space<smem>>
    %481 = vector.broadcast %480 : f32 to vector<16x16xf32>
    %482 = arith.mulf %450, %481 : vector<16x16xf32>
    %483 = arith.addf %479, %482 : vector<16x16xf32>
    %484 = vector.extract_strided_slice %461 {offsets = [0, 0], sizes = [16, 15], strides = [1, 1]} : vector<16x16xf32> to vector<16x15xf32>
    %485 = tpu.concatenate %444, %484 in 1 : vector<16x1xf32>, vector<16x15xf32> -> vector<16x16xf32>
    %486 = vector.extract_strided_slice %483 {offsets = [0, 1], sizes = [16, 15], strides = [1, 1]} : vector<16x16xf32> to vector<16x15xf32>
    %487 = tpu.concatenate %486, %444 in 1 : vector<16x15xf32>, vector<16x1xf32> -> vector<16x16xf32>
    %488 = arith.addf %485, %472 : vector<16x16xf32>
    %489 = arith.addf %488, %487 : vector<16x16xf32>
    %c156 = arith.constant 156 : index
    %490 = memref.load %arg3[%c156] : memref<164xf32, #tpu.memory_space<smem>>
    %491 = vector.broadcast %490 : f32 to vector<16x16xf32>
    %492 = arith.addf %489, %491 : vector<16x16xf32>
    %c0_52 = arith.constant 0 : index
    %c0_53 = arith.constant 0 : index
    %c0_54 = arith.constant 0 : index
    %c0_55 = arith.constant 0 : index
    %493 = vector.load %arg4[%c0_52, %c0_53, %c0_54, %c0_55] : memref<1x8x16x16xf32, #tpu.memory_space<vmem>>, vector<1x1x16x16xf32>
    %494 = vector.shape_cast %493 : vector<1x1x16x16xf32> to vector<16x16xf32>
    %495 = vector.shape_cast %492 : vector<16x16xf32> to vector<1x1x16x16xf32>
    tpu.vector_store %arg4[%c0_52, %c0_53, %c0_54, %c0_55], %495 {strides = array<i32>} : memref<1x8x16x16xf32, #tpu.memory_space<vmem>>, vector<1x1x16x16xf32>,
    %c1_56 = arith.constant 1 : index
    %c0_57 = arith.constant 0 : index
    %c0_58 = arith.constant 0 : index
    %496 = vector.load %arg5[%c1_56, %c0_57, %c0_58] : memref<8x18x16xf32, #tpu.memory_space<vmem>>, vector<1x16x16xf32>
    %497 = vector.shape_cast %496 : vector<1x16x16xf32> to vector<16x16xf32>
    %c1_59 = arith.constant 1 : index
    %c1_60 = arith.constant 1 : index
    %c0_61 = arith.constant 0 : index
    %498 = vector.load %arg5[%c1_59, %c1_60, %c0_61] : memref<8x18x16xf32, #tpu.memory_space<vmem>>, vector<1x16x16xf32>
    %499 = vector.shape_cast %498 : vector<1x16x16xf32> to vector<16x16xf32>
    %c1_62 = arith.constant 1 : index
    %c2_63 = arith.constant 2 : index
    %c0_64 = arith.constant 0 : index
    %500 = vector.load %arg5[%c1_62, %c2_63, %c0_64] : memref<8x18x16xf32, #tpu.memory_space<vmem>>, vector<1x16x16xf32>
    %501 = vector.shape_cast %500 : vector<1x16x16xf32> to vector<16x16xf32>
    %c85 = arith.constant 85 : index
    %502 = memref.load %arg3[%c85] : memref<164xf32, #tpu.memory_space<smem>>
    %503 = vector.broadcast %502 : f32 to vector<16x16xf32>
    %504 = arith.mulf %497, %503 : vector<16x16xf32>
    %c109 = arith.constant 109 : index
    %505 = memref.load %arg3[%c109] : memref<164xf32, #tpu.memory_space<smem>>
    %506 = vector.broadcast %505 : f32 to vector<16x16xf32>
    %507 = arith.mulf %499, %506 : vector<16x16xf32>
    %508 = arith.addf %504, %507 : vector<16x16xf32>
    %c133 = arith.constant 133 : index
    %509 = memref.load %arg3[%c133] : memref<164xf32, #tpu.memory_space<smem>>
    %510 = vector.broadcast %509 : f32 to vector<16x16xf32>
    %511 = arith.mulf %501, %510 : vector<16x16xf32>
    %512 = arith.addf %508, %511 : vector<16x16xf32>
    %c93 = arith.constant 93 : index
    %513 = memref.load %arg3[%c93] : memref<164xf32, #tpu.memory_space<smem>>
    %514 = vector.broadcast %513 : f32 to vector<16x16xf32>
    %515 = arith.mulf %497, %514 : vector<16x16xf32>
    %c117 = arith.constant 117 : index
    %516 = memref.load %arg3[%c117] : memref<164xf32, #tpu.memory_space<smem>>
    %517 = vector.broadcast %516 : f32 to vector<16x16xf32>
    %518 = arith.mulf %499, %517 : vector<16x16xf32>
    %519 = arith.addf %515, %518 : vector<16x16xf32>
    %c141 = arith.constant 141 : index
    %520 = memref.load %arg3[%c141] : memref<164xf32, #tpu.memory_space<smem>>
    %521 = vector.broadcast %520 : f32 to vector<16x16xf32>
    %522 = arith.mulf %501, %521 : vector<16x16xf32>
    %523 = arith.addf %519, %522 : vector<16x16xf32>
    %c101 = arith.constant 101 : index
    %524 = memref.load %arg3[%c101] : memref<164xf32, #tpu.memory_space<smem>>
    %525 = vector.broadcast %524 : f32 to vector<16x16xf32>
    %526 = arith.mulf %497, %525 : vector<16x16xf32>
    %c125 = arith.constant 125 : index
    %527 = memref.load %arg3[%c125] : memref<164xf32, #tpu.memory_space<smem>>
    %528 = vector.broadcast %527 : f32 to vector<16x16xf32>
    %529 = arith.mulf %499, %528 : vector<16x16xf32>
    %530 = arith.addf %526, %529 : vector<16x16xf32>
    %c149 = arith.constant 149 : index
    %531 = memref.load %arg3[%c149] : memref<164xf32, #tpu.memory_space<smem>>
    %532 = vector.broadcast %531 : f32 to vector<16x16xf32>
    %533 = arith.mulf %501, %532 : vector<16x16xf32>
    %534 = arith.addf %530, %533 : vector<16x16xf32>
    %535 = vector.extract_strided_slice %512 {offsets = [0, 0], sizes = [16, 15], strides = [1, 1]} : vector<16x16xf32> to vector<16x15xf32>
    %536 = tpu.concatenate %444, %535 in 1 : vector<16x1xf32>, vector<16x15xf32> -> vector<16x16xf32>
    %537 = vector.extract_strided_slice %534 {offsets = [0, 1], sizes = [16, 15], strides = [1, 1]} : vector<16x16xf32> to vector<16x15xf32>
    %538 = tpu.concatenate %537, %444 in 1 : vector<16x15xf32>, vector<16x1xf32> -> vector<16x16xf32>
    %539 = arith.addf %536, %523 : vector<16x16xf32>
    %540 = arith.addf %539, %538 : vector<16x16xf32>
    %c157 = arith.constant 157 : index
    %541 = memref.load %arg3[%c157] : memref<164xf32, #tpu.memory_space<smem>>
    %542 = vector.broadcast %541 : f32 to vector<16x16xf32>
    %543 = arith.addf %540, %542 : vector<16x16xf32>
    %c0_65 = arith.constant 0 : index
    %c1_66 = arith.constant 1 : index
    %c0_67 = arith.constant 0 : index
    %c0_68 = arith.constant 0 : index
    %544 = vector.load %arg4[%c0_65, %c1_66, %c0_67, %c0_68] : memref<1x8x16x16xf32, #tpu.memory_space<vmem>>, vector<1x1x16x16xf32>
    %545 = vector.shape_cast %544 : vector<1x1x16x16xf32> to vector<16x16xf32>
    %546 = vector.shape_cast %543 : vector<16x16xf32> to vector<1x1x16x16xf32>
    tpu.vector_store %arg4[%c0_65, %c1_66, %c0_67, %c0_68], %546 {strides = array<i32>} : memref<1x8x16x16xf32, #tpu.memory_space<vmem>>, vector<1x1x16x16xf32>,
    %c2_69 = arith.constant 2 : index
    %c0_70 = arith.constant 0 : index
    %c0_71 = arith.constant 0 : index
    %547 = vector.load %arg5[%c2_69, %c0_70, %c0_71] : memref<8x18x16xf32, #tpu.memory_space<vmem>>, vector<1x16x16xf32>
    %548 = vector.shape_cast %547 : vector<1x16x16xf32> to vector<16x16xf32>
    %c2_72 = arith.constant 2 : index
    %c1_73 = arith.constant 1 : index
    %c0_74 = arith.constant 0 : index
    %549 = vector.load %arg5[%c2_72, %c1_73, %c0_74] : memref<8x18x16xf32, #tpu.memory_space<vmem>>, vector<1x16x16xf32>
    %550 = vector.shape_cast %549 : vector<1x16x16xf32> to vector<16x16xf32>
    %c2_75 = arith.constant 2 : index
    %c2_76 = arith.constant 2 : index
    %c0_77 = arith.constant 0 : index
    %551 = vector.load %arg5[%c2_75, %c2_76, %c0_77] : memref<8x18x16xf32, #tpu.memory_space<vmem>>, vector<1x16x16xf32>
    %552 = vector.shape_cast %551 : vector<1x16x16xf32> to vector<16x16xf32>
    %c86 = arith.constant 86 : index
    %553 = memref.load %arg3[%c86] : memref<164xf32, #tpu.memory_space<smem>>
    %554 = vector.broadcast %553 : f32 to vector<16x16xf32>
    %555 = arith.mulf %548, %554 : vector<16x16xf32>
    %c110 = arith.constant 110 : index
    %556 = memref.load %arg3[%c110] : memref<164xf32, #tpu.memory_space<smem>>
    %557 = vector.broadcast %556 : f32 to vector<16x16xf32>
    %558 = arith.mulf %550, %557 : vector<16x16xf32>
    %559 = arith.addf %555, %558 : vector<16x16xf32>
    %c134 = arith.constant 134 : index
    %560 = memref.load %arg3[%c134] : memref<164xf32, #tpu.memory_space<smem>>
    %561 = vector.broadcast %560 : f32 to vector<16x16xf32>
    %562 = arith.mulf %552, %561 : vector<16x16xf32>
    %563 = arith.addf %559, %562 : vector<16x16xf32>
    %c94 = arith.constant 94 : index
    %564 = memref.load %arg3[%c94] : memref<164xf32, #tpu.memory_space<smem>>
    %565 = vector.broadcast %564 : f32 to vector<16x16xf32>
    %566 = arith.mulf %548, %565 : vector<16x16xf32>
    %c118 = arith.constant 118 : index
    %567 = memref.load %arg3[%c118] : memref<164xf32, #tpu.memory_space<smem>>
    %568 = vector.broadcast %567 : f32 to vector<16x16xf32>
    %569 = arith.mulf %550, %568 : vector<16x16xf32>
    %570 = arith.addf %566, %569 : vector<16x16xf32>
    %c142 = arith.constant 142 : index
    %571 = memref.load %arg3[%c142] : memref<164xf32, #tpu.memory_space<smem>>
    %572 = vector.broadcast %571 : f32 to vector<16x16xf32>
    %573 = arith.mulf %552, %572 : vector<16x16xf32>
    %574 = arith.addf %570, %573 : vector<16x16xf32>
    %c102 = arith.constant 102 : index
    %575 = memref.load %arg3[%c102] : memref<164xf32, #tpu.memory_space<smem>>
    %576 = vector.broadcast %575 : f32 to vector<16x16xf32>
    %577 = arith.mulf %548, %576 : vector<16x16xf32>
    %c126 = arith.constant 126 : index
    %578 = memref.load %arg3[%c126] : memref<164xf32, #tpu.memory_space<smem>>
    %579 = vector.broadcast %578 : f32 to vector<16x16xf32>
    %580 = arith.mulf %550, %579 : vector<16x16xf32>
    %581 = arith.addf %577, %580 : vector<16x16xf32>
    %c150 = arith.constant 150 : index
    %582 = memref.load %arg3[%c150] : memref<164xf32, #tpu.memory_space<smem>>
    %583 = vector.broadcast %582 : f32 to vector<16x16xf32>
    %584 = arith.mulf %552, %583 : vector<16x16xf32>
    %585 = arith.addf %581, %584 : vector<16x16xf32>
    %586 = vector.extract_strided_slice %563 {offsets = [0, 0], sizes = [16, 15], strides = [1, 1]} : vector<16x16xf32> to vector<16x15xf32>
    %587 = tpu.concatenate %444, %586 in 1 : vector<16x1xf32>, vector<16x15xf32> -> vector<16x16xf32>
    %588 = vector.extract_strided_slice %585 {offsets = [0, 1], sizes = [16, 15], strides = [1, 1]} : vector<16x16xf32> to vector<16x15xf32>
    %589 = tpu.concatenate %588, %444 in 1 : vector<16x15xf32>, vector<16x1xf32> -> vector<16x16xf32>
    %590 = arith.addf %587, %574 : vector<16x16xf32>
    %591 = arith.addf %590, %589 : vector<16x16xf32>
    %c158 = arith.constant 158 : index
    %592 = memref.load %arg3[%c158] : memref<164xf32, #tpu.memory_space<smem>>
    %593 = vector.broadcast %592 : f32 to vector<16x16xf32>
    %594 = arith.addf %591, %593 : vector<16x16xf32>
    %c0_78 = arith.constant 0 : index
    %c2_79 = arith.constant 2 : index
    %c0_80 = arith.constant 0 : index
    %c0_81 = arith.constant 0 : index
    %595 = vector.load %arg4[%c0_78, %c2_79, %c0_80, %c0_81] : memref<1x8x16x16xf32, #tpu.memory_space<vmem>>, vector<1x1x16x16xf32>
    %596 = vector.shape_cast %595 : vector<1x1x16x16xf32> to vector<16x16xf32>
    %597 = vector.shape_cast %594 : vector<16x16xf32> to vector<1x1x16x16xf32>
    tpu.vector_store %arg4[%c0_78, %c2_79, %c0_80, %c0_81], %597 {strides = array<i32>} : memref<1x8x16x16xf32, #tpu.memory_space<vmem>>, vector<1x1x16x16xf32>,
    %c3_82 = arith.constant 3 : index
    %c0_83 = arith.constant 0 : index
    %c0_84 = arith.constant 0 : index
    %598 = vector.load %arg5[%c3_82, %c0_83, %c0_84] : memref<8x18x16xf32, #tpu.memory_space<vmem>>, vector<1x16x16xf32>
    %599 = vector.shape_cast %598 : vector<1x16x16xf32> to vector<16x16xf32>
    %c3_85 = arith.constant 3 : index
    %c1_86 = arith.constant 1 : index
    %c0_87 = arith.constant 0 : index
    %600 = vector.load %arg5[%c3_85, %c1_86, %c0_87] : memref<8x18x16xf32, #tpu.memory_space<vmem>>, vector<1x16x16xf32>
    %601 = vector.shape_cast %600 : vector<1x16x16xf32> to vector<16x16xf32>
    %c3_88 = arith.constant 3 : index
    %c2_89 = arith.constant 2 : index
    %c0_90 = arith.constant 0 : index
    %602 = vector.load %arg5[%c3_88, %c2_89, %c0_90] : memref<8x18x16xf32, #tpu.memory_space<vmem>>, vector<1x16x16xf32>
    %603 = vector.shape_cast %602 : vector<1x16x16xf32> to vector<16x16xf32>
    %c87 = arith.constant 87 : index
    %604 = memref.load %arg3[%c87] : memref<164xf32, #tpu.memory_space<smem>>
    %605 = vector.broadcast %604 : f32 to vector<16x16xf32>
    %606 = arith.mulf %599, %605 : vector<16x16xf32>
    %c111 = arith.constant 111 : index
    %607 = memref.load %arg3[%c111] : memref<164xf32, #tpu.memory_space<smem>>
    %608 = vector.broadcast %607 : f32 to vector<16x16xf32>
    %609 = arith.mulf %601, %608 : vector<16x16xf32>
    %610 = arith.addf %606, %609 : vector<16x16xf32>
    %c135 = arith.constant 135 : index
    %611 = memref.load %arg3[%c135] : memref<164xf32, #tpu.memory_space<smem>>
    %612 = vector.broadcast %611 : f32 to vector<16x16xf32>
    %613 = arith.mulf %603, %612 : vector<16x16xf32>
    %614 = arith.addf %610, %613 : vector<16x16xf32>
    %c95 = arith.constant 95 : index
    %615 = memref.load %arg3[%c95] : memref<164xf32, #tpu.memory_space<smem>>
    %616 = vector.broadcast %615 : f32 to vector<16x16xf32>
    %617 = arith.mulf %599, %616 : vector<16x16xf32>
    %c119 = arith.constant 119 : index
    %618 = memref.load %arg3[%c119] : memref<164xf32, #tpu.memory_space<smem>>
    %619 = vector.broadcast %618 : f32 to vector<16x16xf32>
    %620 = arith.mulf %601, %619 : vector<16x16xf32>
    %621 = arith.addf %617, %620 : vector<16x16xf32>
    %c143 = arith.constant 143 : index
    %622 = memref.load %arg3[%c143] : memref<164xf32, #tpu.memory_space<smem>>
    %623 = vector.broadcast %622 : f32 to vector<16x16xf32>
    %624 = arith.mulf %603, %623 : vector<16x16xf32>
    %625 = arith.addf %621, %624 : vector<16x16xf32>
    %c103 = arith.constant 103 : index
    %626 = memref.load %arg3[%c103] : memref<164xf32, #tpu.memory_space<smem>>
    %627 = vector.broadcast %626 : f32 to vector<16x16xf32>
    %628 = arith.mulf %599, %627 : vector<16x16xf32>
    %c127 = arith.constant 127 : index
    %629 = memref.load %arg3[%c127] : memref<164xf32, #tpu.memory_space<smem>>
    %630 = vector.broadcast %629 : f32 to vector<16x16xf32>
    %631 = arith.mulf %601, %630 : vector<16x16xf32>
    %632 = arith.addf %628, %631 : vector<16x16xf32>
    %c151 = arith.constant 151 : index
    %633 = memref.load %arg3[%c151] : memref<164xf32, #tpu.memory_space<smem>>
    %634 = vector.broadcast %633 : f32 to vector<16x16xf32>
    %635 = arith.mulf %603, %634 : vector<16x16xf32>
    %636 = arith.addf %632, %635 : vector<16x16xf32>
    %637 = vector.extract_strided_slice %614 {offsets = [0, 0], sizes = [16, 15], strides = [1, 1]} : vector<16x16xf32> to vector<16x15xf32>
    %638 = tpu.concatenate %444, %637 in 1 : vector<16x1xf32>, vector<16x15xf32> -> vector<16x16xf32>
    %639 = vector.extract_strided_slice %636 {offsets = [0, 1], sizes = [16, 15], strides = [1, 1]} : vector<16x16xf32> to vector<16x15xf32>
    %640 = tpu.concatenate %639, %444 in 1 : vector<16x15xf32>, vector<16x1xf32> -> vector<16x16xf32>
    %641 = arith.addf %638, %625 : vector<16x16xf32>
    %642 = arith.addf %641, %640 : vector<16x16xf32>
    %c159 = arith.constant 159 : index
    %643 = memref.load %arg3[%c159] : memref<164xf32, #tpu.memory_space<smem>>
    %644 = vector.broadcast %643 : f32 to vector<16x16xf32>
    %645 = arith.addf %642, %644 : vector<16x16xf32>
    %c0_91 = arith.constant 0 : index
    %c3_92 = arith.constant 3 : index
    %c0_93 = arith.constant 0 : index
    %c0_94 = arith.constant 0 : index
    %646 = vector.load %arg4[%c0_91, %c3_92, %c0_93, %c0_94] : memref<1x8x16x16xf32, #tpu.memory_space<vmem>>, vector<1x1x16x16xf32>
    %647 = vector.shape_cast %646 : vector<1x1x16x16xf32> to vector<16x16xf32>
    %648 = vector.shape_cast %645 : vector<16x16xf32> to vector<1x1x16x16xf32>
    tpu.vector_store %arg4[%c0_91, %c3_92, %c0_93, %c0_94], %648 {strides = array<i32>} : memref<1x8x16x16xf32, #tpu.memory_space<vmem>>, vector<1x1x16x16xf32>,
    %c4_95 = arith.constant 4 : index
    %c0_96 = arith.constant 0 : index
    %c0_97 = arith.constant 0 : index
    %649 = vector.load %arg5[%c4_95, %c0_96, %c0_97] : memref<8x18x16xf32, #tpu.memory_space<vmem>>, vector<1x16x16xf32>
    %650 = vector.shape_cast %649 : vector<1x16x16xf32> to vector<16x16xf32>
    %c4_98 = arith.constant 4 : index
    %c1_99 = arith.constant 1 : index
    %c0_100 = arith.constant 0 : index
    %651 = vector.load %arg5[%c4_98, %c1_99, %c0_100] : memref<8x18x16xf32, #tpu.memory_space<vmem>>, vector<1x16x16xf32>
    %652 = vector.shape_cast %651 : vector<1x16x16xf32> to vector<16x16xf32>
    %c4_101 = arith.constant 4 : index
    %c2_102 = arith.constant 2 : index
    %c0_103 = arith.constant 0 : index
    %653 = vector.load %arg5[%c4_101, %c2_102, %c0_103] : memref<8x18x16xf32, #tpu.memory_space<vmem>>, vector<1x16x16xf32>
    %654 = vector.shape_cast %653 : vector<1x16x16xf32> to vector<16x16xf32>
    %c88 = arith.constant 88 : index
    %655 = memref.load %arg3[%c88] : memref<164xf32, #tpu.memory_space<smem>>
    %656 = vector.broadcast %655 : f32 to vector<16x16xf32>
    %657 = arith.mulf %650, %656 : vector<16x16xf32>
    %c112 = arith.constant 112 : index
    %658 = memref.load %arg3[%c112] : memref<164xf32, #tpu.memory_space<smem>>
    %659 = vector.broadcast %658 : f32 to vector<16x16xf32>
    %660 = arith.mulf %652, %659 : vector<16x16xf32>
    %661 = arith.addf %657, %660 : vector<16x16xf32>
    %c136 = arith.constant 136 : index
    %662 = memref.load %arg3[%c136] : memref<164xf32, #tpu.memory_space<smem>>
    %663 = vector.broadcast %662 : f32 to vector<16x16xf32>
    %664 = arith.mulf %654, %663 : vector<16x16xf32>
    %665 = arith.addf %661, %664 : vector<16x16xf32>
    %c96 = arith.constant 96 : index
    %666 = memref.load %arg3[%c96] : memref<164xf32, #tpu.memory_space<smem>>
    %667 = vector.broadcast %666 : f32 to vector<16x16xf32>
    %668 = arith.mulf %650, %667 : vector<16x16xf32>
    %c120 = arith.constant 120 : index
    %669 = memref.load %arg3[%c120] : memref<164xf32, #tpu.memory_space<smem>>
    %670 = vector.broadcast %669 : f32 to vector<16x16xf32>
    %671 = arith.mulf %652, %670 : vector<16x16xf32>
    %672 = arith.addf %668, %671 : vector<16x16xf32>
    %c144 = arith.constant 144 : index
    %673 = memref.load %arg3[%c144] : memref<164xf32, #tpu.memory_space<smem>>
    %674 = vector.broadcast %673 : f32 to vector<16x16xf32>
    %675 = arith.mulf %654, %674 : vector<16x16xf32>
    %676 = arith.addf %672, %675 : vector<16x16xf32>
    %c104 = arith.constant 104 : index
    %677 = memref.load %arg3[%c104] : memref<164xf32, #tpu.memory_space<smem>>
    %678 = vector.broadcast %677 : f32 to vector<16x16xf32>
    %679 = arith.mulf %650, %678 : vector<16x16xf32>
    %c128 = arith.constant 128 : index
    %680 = memref.load %arg3[%c128] : memref<164xf32, #tpu.memory_space<smem>>
    %681 = vector.broadcast %680 : f32 to vector<16x16xf32>
    %682 = arith.mulf %652, %681 : vector<16x16xf32>
    %683 = arith.addf %679, %682 : vector<16x16xf32>
    %c152 = arith.constant 152 : index
    %684 = memref.load %arg3[%c152] : memref<164xf32, #tpu.memory_space<smem>>
    %685 = vector.broadcast %684 : f32 to vector<16x16xf32>
    %686 = arith.mulf %654, %685 : vector<16x16xf32>
    %687 = arith.addf %683, %686 : vector<16x16xf32>
    %688 = vector.extract_strided_slice %665 {offsets = [0, 0], sizes = [16, 15], strides = [1, 1]} : vector<16x16xf32> to vector<16x15xf32>
    %689 = tpu.concatenate %444, %688 in 1 : vector<16x1xf32>, vector<16x15xf32> -> vector<16x16xf32>
    %690 = vector.extract_strided_slice %687 {offsets = [0, 1], sizes = [16, 15], strides = [1, 1]} : vector<16x16xf32> to vector<16x15xf32>
    %691 = tpu.concatenate %690, %444 in 1 : vector<16x15xf32>, vector<16x1xf32> -> vector<16x16xf32>
    %692 = arith.addf %689, %676 : vector<16x16xf32>
    %693 = arith.addf %692, %691 : vector<16x16xf32>
    %c160 = arith.constant 160 : index
    %694 = memref.load %arg3[%c160] : memref<164xf32, #tpu.memory_space<smem>>
    %695 = vector.broadcast %694 : f32 to vector<16x16xf32>
    %696 = arith.addf %693, %695 : vector<16x16xf32>
    %c0_104 = arith.constant 0 : index
    %c4_105 = arith.constant 4 : index
    %c0_106 = arith.constant 0 : index
    %c0_107 = arith.constant 0 : index
    %697 = vector.load %arg4[%c0_104, %c4_105, %c0_106, %c0_107] : memref<1x8x16x16xf32, #tpu.memory_space<vmem>>, vector<1x1x16x16xf32>
    %698 = vector.shape_cast %697 : vector<1x1x16x16xf32> to vector<16x16xf32>
    %699 = vector.shape_cast %696 : vector<16x16xf32> to vector<1x1x16x16xf32>
    tpu.vector_store %arg4[%c0_104, %c4_105, %c0_106, %c0_107], %699 {strides = array<i32>} : memref<1x8x16x16xf32, #tpu.memory_space<vmem>>, vector<1x1x16x16xf32>,
    %c5_108 = arith.constant 5 : index
    %c0_109 = arith.constant 0 : index
    %c0_110 = arith.constant 0 : index
    %700 = vector.load %arg5[%c5_108, %c0_109, %c0_110] : memref<8x18x16xf32, #tpu.memory_space<vmem>>, vector<1x16x16xf32>
    %701 = vector.shape_cast %700 : vector<1x16x16xf32> to vector<16x16xf32>
    %c5_111 = arith.constant 5 : index
    %c1_112 = arith.constant 1 : index
    %c0_113 = arith.constant 0 : index
    %702 = vector.load %arg5[%c5_111, %c1_112, %c0_113] : memref<8x18x16xf32, #tpu.memory_space<vmem>>, vector<1x16x16xf32>
    %703 = vector.shape_cast %702 : vector<1x16x16xf32> to vector<16x16xf32>
    %c5_114 = arith.constant 5 : index
    %c2_115 = arith.constant 2 : index
    %c0_116 = arith.constant 0 : index
    %704 = vector.load %arg5[%c5_114, %c2_115, %c0_116] : memref<8x18x16xf32, #tpu.memory_space<vmem>>, vector<1x16x16xf32>
    %705 = vector.shape_cast %704 : vector<1x16x16xf32> to vector<16x16xf32>
    %c89 = arith.constant 89 : index
    %706 = memref.load %arg3[%c89] : memref<164xf32, #tpu.memory_space<smem>>
    %707 = vector.broadcast %706 : f32 to vector<16x16xf32>
    %708 = arith.mulf %701, %707 : vector<16x16xf32>
    %c113 = arith.constant 113 : index
    %709 = memref.load %arg3[%c113] : memref<164xf32, #tpu.memory_space<smem>>
    %710 = vector.broadcast %709 : f32 to vector<16x16xf32>
    %711 = arith.mulf %703, %710 : vector<16x16xf32>
    %712 = arith.addf %708, %711 : vector<16x16xf32>
    %c137 = arith.constant 137 : index
    %713 = memref.load %arg3[%c137] : memref<164xf32, #tpu.memory_space<smem>>
    %714 = vector.broadcast %713 : f32 to vector<16x16xf32>
    %715 = arith.mulf %705, %714 : vector<16x16xf32>
    %716 = arith.addf %712, %715 : vector<16x16xf32>
    %c97 = arith.constant 97 : index
    %717 = memref.load %arg3[%c97] : memref<164xf32, #tpu.memory_space<smem>>
    %718 = vector.broadcast %717 : f32 to vector<16x16xf32>
    %719 = arith.mulf %701, %718 : vector<16x16xf32>
    %c121 = arith.constant 121 : index
    %720 = memref.load %arg3[%c121] : memref<164xf32, #tpu.memory_space<smem>>
    %721 = vector.broadcast %720 : f32 to vector<16x16xf32>
    %722 = arith.mulf %703, %721 : vector<16x16xf32>
    %723 = arith.addf %719, %722 : vector<16x16xf32>
    %c145 = arith.constant 145 : index
    %724 = memref.load %arg3[%c145] : memref<164xf32, #tpu.memory_space<smem>>
    %725 = vector.broadcast %724 : f32 to vector<16x16xf32>
    %726 = arith.mulf %705, %725 : vector<16x16xf32>
    %727 = arith.addf %723, %726 : vector<16x16xf32>
    %c105 = arith.constant 105 : index
    %728 = memref.load %arg3[%c105] : memref<164xf32, #tpu.memory_space<smem>>
    %729 = vector.broadcast %728 : f32 to vector<16x16xf32>
    %730 = arith.mulf %701, %729 : vector<16x16xf32>
    %c129 = arith.constant 129 : index
    %731 = memref.load %arg3[%c129] : memref<164xf32, #tpu.memory_space<smem>>
    %732 = vector.broadcast %731 : f32 to vector<16x16xf32>
    %733 = arith.mulf %703, %732 : vector<16x16xf32>
    %734 = arith.addf %730, %733 : vector<16x16xf32>
    %c153 = arith.constant 153 : index
    %735 = memref.load %arg3[%c153] : memref<164xf32, #tpu.memory_space<smem>>
    %736 = vector.broadcast %735 : f32 to vector<16x16xf32>
    %737 = arith.mulf %705, %736 : vector<16x16xf32>
    %738 = arith.addf %734, %737 : vector<16x16xf32>
    %739 = vector.extract_strided_slice %716 {offsets = [0, 0], sizes = [16, 15], strides = [1, 1]} : vector<16x16xf32> to vector<16x15xf32>
    %740 = tpu.concatenate %444, %739 in 1 : vector<16x1xf32>, vector<16x15xf32> -> vector<16x16xf32>
    %741 = vector.extract_strided_slice %738 {offsets = [0, 1], sizes = [16, 15], strides = [1, 1]} : vector<16x16xf32> to vector<16x15xf32>
    %742 = tpu.concatenate %741, %444 in 1 : vector<16x15xf32>, vector<16x1xf32> -> vector<16x16xf32>
    %743 = arith.addf %740, %727 : vector<16x16xf32>
    %744 = arith.addf %743, %742 : vector<16x16xf32>
    %c161 = arith.constant 161 : index
    %745 = memref.load %arg3[%c161] : memref<164xf32, #tpu.memory_space<smem>>
    %746 = vector.broadcast %745 : f32 to vector<16x16xf32>
    %747 = arith.addf %744, %746 : vector<16x16xf32>
    %c0_117 = arith.constant 0 : index
    %c5_118 = arith.constant 5 : index
    %c0_119 = arith.constant 0 : index
    %c0_120 = arith.constant 0 : index
    %748 = vector.load %arg4[%c0_117, %c5_118, %c0_119, %c0_120] : memref<1x8x16x16xf32, #tpu.memory_space<vmem>>, vector<1x1x16x16xf32>
    %749 = vector.shape_cast %748 : vector<1x1x16x16xf32> to vector<16x16xf32>
    %750 = vector.shape_cast %747 : vector<16x16xf32> to vector<1x1x16x16xf32>
    tpu.vector_store %arg4[%c0_117, %c5_118, %c0_119, %c0_120], %750 {strides = array<i32>} : memref<1x8x16x16xf32, #tpu.memory_space<vmem>>, vector<1x1x16x16xf32>,
    %c6_121 = arith.constant 6 : index
    %c0_122 = arith.constant 0 : index
    %c0_123 = arith.constant 0 : index
    %751 = vector.load %arg5[%c6_121, %c0_122, %c0_123] : memref<8x18x16xf32, #tpu.memory_space<vmem>>, vector<1x16x16xf32>
    %752 = vector.shape_cast %751 : vector<1x16x16xf32> to vector<16x16xf32>
    %c6_124 = arith.constant 6 : index
    %c1_125 = arith.constant 1 : index
    %c0_126 = arith.constant 0 : index
    %753 = vector.load %arg5[%c6_124, %c1_125, %c0_126] : memref<8x18x16xf32, #tpu.memory_space<vmem>>, vector<1x16x16xf32>
    %754 = vector.shape_cast %753 : vector<1x16x16xf32> to vector<16x16xf32>
    %c6_127 = arith.constant 6 : index
    %c2_128 = arith.constant 2 : index
    %c0_129 = arith.constant 0 : index
    %755 = vector.load %arg5[%c6_127, %c2_128, %c0_129] : memref<8x18x16xf32, #tpu.memory_space<vmem>>, vector<1x16x16xf32>
    %756 = vector.shape_cast %755 : vector<1x16x16xf32> to vector<16x16xf32>
    %c90 = arith.constant 90 : index
    %757 = memref.load %arg3[%c90] : memref<164xf32, #tpu.memory_space<smem>>
    %758 = vector.broadcast %757 : f32 to vector<16x16xf32>
    %759 = arith.mulf %752, %758 : vector<16x16xf32>
    %c114 = arith.constant 114 : index
    %760 = memref.load %arg3[%c114] : memref<164xf32, #tpu.memory_space<smem>>
    %761 = vector.broadcast %760 : f32 to vector<16x16xf32>
    %762 = arith.mulf %754, %761 : vector<16x16xf32>
    %763 = arith.addf %759, %762 : vector<16x16xf32>
    %c138 = arith.constant 138 : index
    %764 = memref.load %arg3[%c138] : memref<164xf32, #tpu.memory_space<smem>>
    %765 = vector.broadcast %764 : f32 to vector<16x16xf32>
    %766 = arith.mulf %756, %765 : vector<16x16xf32>
    %767 = arith.addf %763, %766 : vector<16x16xf32>
    %c98 = arith.constant 98 : index
    %768 = memref.load %arg3[%c98] : memref<164xf32, #tpu.memory_space<smem>>
    %769 = vector.broadcast %768 : f32 to vector<16x16xf32>
    %770 = arith.mulf %752, %769 : vector<16x16xf32>
    %c122 = arith.constant 122 : index
    %771 = memref.load %arg3[%c122] : memref<164xf32, #tpu.memory_space<smem>>
    %772 = vector.broadcast %771 : f32 to vector<16x16xf32>
    %773 = arith.mulf %754, %772 : vector<16x16xf32>
    %774 = arith.addf %770, %773 : vector<16x16xf32>
    %c146 = arith.constant 146 : index
    %775 = memref.load %arg3[%c146] : memref<164xf32, #tpu.memory_space<smem>>
    %776 = vector.broadcast %775 : f32 to vector<16x16xf32>
    %777 = arith.mulf %756, %776 : vector<16x16xf32>
    %778 = arith.addf %774, %777 : vector<16x16xf32>
    %c106 = arith.constant 106 : index
    %779 = memref.load %arg3[%c106] : memref<164xf32, #tpu.memory_space<smem>>
    %780 = vector.broadcast %779 : f32 to vector<16x16xf32>
    %781 = arith.mulf %752, %780 : vector<16x16xf32>
    %c130 = arith.constant 130 : index
    %782 = memref.load %arg3[%c130] : memref<164xf32, #tpu.memory_space<smem>>
    %783 = vector.broadcast %782 : f32 to vector<16x16xf32>
    %784 = arith.mulf %754, %783 : vector<16x16xf32>
    %785 = arith.addf %781, %784 : vector<16x16xf32>
    %c154 = arith.constant 154 : index
    %786 = memref.load %arg3[%c154] : memref<164xf32, #tpu.memory_space<smem>>
    %787 = vector.broadcast %786 : f32 to vector<16x16xf32>
    %788 = arith.mulf %756, %787 : vector<16x16xf32>
    %789 = arith.addf %785, %788 : vector<16x16xf32>
    %790 = vector.extract_strided_slice %767 {offsets = [0, 0], sizes = [16, 15], strides = [1, 1]} : vector<16x16xf32> to vector<16x15xf32>
    %791 = tpu.concatenate %444, %790 in 1 : vector<16x1xf32>, vector<16x15xf32> -> vector<16x16xf32>
    %792 = vector.extract_strided_slice %789 {offsets = [0, 1], sizes = [16, 15], strides = [1, 1]} : vector<16x16xf32> to vector<16x15xf32>
    %793 = tpu.concatenate %792, %444 in 1 : vector<16x15xf32>, vector<16x1xf32> -> vector<16x16xf32>
    %794 = arith.addf %791, %778 : vector<16x16xf32>
    %795 = arith.addf %794, %793 : vector<16x16xf32>
    %c162 = arith.constant 162 : index
    %796 = memref.load %arg3[%c162] : memref<164xf32, #tpu.memory_space<smem>>
    %797 = vector.broadcast %796 : f32 to vector<16x16xf32>
    %798 = arith.addf %795, %797 : vector<16x16xf32>
    %c0_130 = arith.constant 0 : index
    %c6_131 = arith.constant 6 : index
    %c0_132 = arith.constant 0 : index
    %c0_133 = arith.constant 0 : index
    %799 = vector.load %arg4[%c0_130, %c6_131, %c0_132, %c0_133] : memref<1x8x16x16xf32, #tpu.memory_space<vmem>>, vector<1x1x16x16xf32>
    %800 = vector.shape_cast %799 : vector<1x1x16x16xf32> to vector<16x16xf32>
    %801 = vector.shape_cast %798 : vector<16x16xf32> to vector<1x1x16x16xf32>
    tpu.vector_store %arg4[%c0_130, %c6_131, %c0_132, %c0_133], %801 {strides = array<i32>} : memref<1x8x16x16xf32, #tpu.memory_space<vmem>>, vector<1x1x16x16xf32>,
    %c7_134 = arith.constant 7 : index
    %c0_135 = arith.constant 0 : index
    %c0_136 = arith.constant 0 : index
    %802 = vector.load %arg5[%c7_134, %c0_135, %c0_136] : memref<8x18x16xf32, #tpu.memory_space<vmem>>, vector<1x16x16xf32>
    %803 = vector.shape_cast %802 : vector<1x16x16xf32> to vector<16x16xf32>
    %c7_137 = arith.constant 7 : index
    %c1_138 = arith.constant 1 : index
    %c0_139 = arith.constant 0 : index
    %804 = vector.load %arg5[%c7_137, %c1_138, %c0_139] : memref<8x18x16xf32, #tpu.memory_space<vmem>>, vector<1x16x16xf32>
    %805 = vector.shape_cast %804 : vector<1x16x16xf32> to vector<16x16xf32>
    %c7_140 = arith.constant 7 : index
    %c2_141 = arith.constant 2 : index
    %c0_142 = arith.constant 0 : index
    %806 = vector.load %arg5[%c7_140, %c2_141, %c0_142] : memref<8x18x16xf32, #tpu.memory_space<vmem>>, vector<1x16x16xf32>
    %807 = vector.shape_cast %806 : vector<1x16x16xf32> to vector<16x16xf32>
    %c91 = arith.constant 91 : index
    %808 = memref.load %arg3[%c91] : memref<164xf32, #tpu.memory_space<smem>>
    %809 = vector.broadcast %808 : f32 to vector<16x16xf32>
    %810 = arith.mulf %803, %809 : vector<16x16xf32>
    %c115 = arith.constant 115 : index
    %811 = memref.load %arg3[%c115] : memref<164xf32, #tpu.memory_space<smem>>
    %812 = vector.broadcast %811 : f32 to vector<16x16xf32>
    %813 = arith.mulf %805, %812 : vector<16x16xf32>
    %814 = arith.addf %810, %813 : vector<16x16xf32>
    %c139 = arith.constant 139 : index
    %815 = memref.load %arg3[%c139] : memref<164xf32, #tpu.memory_space<smem>>
    %816 = vector.broadcast %815 : f32 to vector<16x16xf32>
    %817 = arith.mulf %807, %816 : vector<16x16xf32>
    %818 = arith.addf %814, %817 : vector<16x16xf32>
    %c99 = arith.constant 99 : index
    %819 = memref.load %arg3[%c99] : memref<164xf32, #tpu.memory_space<smem>>
    %820 = vector.broadcast %819 : f32 to vector<16x16xf32>
    %821 = arith.mulf %803, %820 : vector<16x16xf32>
    %c123 = arith.constant 123 : index
    %822 = memref.load %arg3[%c123] : memref<164xf32, #tpu.memory_space<smem>>
    %823 = vector.broadcast %822 : f32 to vector<16x16xf32>
    %824 = arith.mulf %805, %823 : vector<16x16xf32>
    %825 = arith.addf %821, %824 : vector<16x16xf32>
    %c147 = arith.constant 147 : index
    %826 = memref.load %arg3[%c147] : memref<164xf32, #tpu.memory_space<smem>>
    %827 = vector.broadcast %826 : f32 to vector<16x16xf32>
    %828 = arith.mulf %807, %827 : vector<16x16xf32>
    %829 = arith.addf %825, %828 : vector<16x16xf32>
    %c107 = arith.constant 107 : index
    %830 = memref.load %arg3[%c107] : memref<164xf32, #tpu.memory_space<smem>>
    %831 = vector.broadcast %830 : f32 to vector<16x16xf32>
    %832 = arith.mulf %803, %831 : vector<16x16xf32>
    %c131 = arith.constant 131 : index
    %833 = memref.load %arg3[%c131] : memref<164xf32, #tpu.memory_space<smem>>
    %834 = vector.broadcast %833 : f32 to vector<16x16xf32>
    %835 = arith.mulf %805, %834 : vector<16x16xf32>
    %836 = arith.addf %832, %835 : vector<16x16xf32>
    %c155 = arith.constant 155 : index
    %837 = memref.load %arg3[%c155] : memref<164xf32, #tpu.memory_space<smem>>
    %838 = vector.broadcast %837 : f32 to vector<16x16xf32>
    %839 = arith.mulf %807, %838 : vector<16x16xf32>
    %840 = arith.addf %836, %839 : vector<16x16xf32>
    %841 = vector.extract_strided_slice %818 {offsets = [0, 0], sizes = [16, 15], strides = [1, 1]} : vector<16x16xf32> to vector<16x15xf32>
    %842 = tpu.concatenate %444, %841 in 1 : vector<16x1xf32>, vector<16x15xf32> -> vector<16x16xf32>
    %843 = vector.extract_strided_slice %840 {offsets = [0, 1], sizes = [16, 15], strides = [1, 1]} : vector<16x16xf32> to vector<16x15xf32>
    %844 = tpu.concatenate %843, %444 in 1 : vector<16x15xf32>, vector<16x1xf32> -> vector<16x16xf32>
    %845 = arith.addf %842, %829 : vector<16x16xf32>
    %846 = arith.addf %845, %844 : vector<16x16xf32>
    %c163 = arith.constant 163 : index
    %847 = memref.load %arg3[%c163] : memref<164xf32, #tpu.memory_space<smem>>
    %848 = vector.broadcast %847 : f32 to vector<16x16xf32>
    %849 = arith.addf %846, %848 : vector<16x16xf32>
    %c0_143 = arith.constant 0 : index
    %c7_144 = arith.constant 7 : index
    %c0_145 = arith.constant 0 : index
    %c0_146 = arith.constant 0 : index
    %850 = vector.load %arg4[%c0_143, %c7_144, %c0_145, %c0_146] : memref<1x8x16x16xf32, #tpu.memory_space<vmem>>, vector<1x1x16x16xf32>
    %851 = vector.shape_cast %850 : vector<1x1x16x16xf32> to vector<16x16xf32>
    %852 = vector.shape_cast %849 : vector<16x16xf32> to vector<1x1x16x16xf32>
    tpu.vector_store %arg4[%c0_143, %c7_144, %c0_145, %c0_146], %852 {strides = array<i32>} : memref<1x8x16x16xf32, #tpu.memory_space<vmem>>, vector<1x1x16x16xf32>,
    return
  }
  func.func @transform_0(%arg0: i32, %arg1: i32) -> (i32, i32, i32, i32) {
    %c0_i32 = arith.constant 0 : i32
    %c0_i32_0 = arith.constant 0 : i32
    %c0_i32_1 = arith.constant 0 : i32
    %c0_i32_2 = arith.constant 0 : i32
    return %arg0, %c0_i32, %c0_i32_0, %c0_i32_1 : i32, i32, i32, i32
  }
  func.func @transform_1(%arg0: i32, %arg1: i32) -> i32 {
    %c0_i32 = arith.constant 0 : i32
    %c0_i32_0 = arith.constant 0 : i32
    return %c0_i32 : i32
  }
  func.func @transform_2(%arg0: i32, %arg1: i32) -> (i32, i32, i32, i32) {
    %c0_i32 = arith.constant 0 : i32
    %c0_i32_0 = arith.constant 0 : i32
    %c0_i32_1 = arith.constant 0 : i32
    return %arg0, %c0_i32, %arg1, %c0_i32_0 : i32, i32, i32, i32
  }
}

</mosaic_0001>

<bundles_post_ra>
// kernel: bsconvs_forward.1
= control target key start
LH: loop header
LB: loop body
LE: loop exit
PB: predicated region body
PF: predicated region fallthrough
CT: control target
= control target key end

     0   :  { %s4334_s0 = inlined_call_operand.vmem [shape: f32[2,4,18,16], index: 0, kind: input, shape index: {}]   ;;  %s4335_s1 = inlined_call_operand.vmem [shape: f32[164], index: 1, kind: input, shape index: {}]   ;;  %s4336_s2 = inlined_call_operand.hbm [shape: f32[2,8,16,16], index: 2, kind: output, shape index: {}]  }
   0x1   :  { %4447 = sst [smem:[#allocation80_spill]] %s4334_s0 }
   0x2   :  { %4448 = sst [smem:[#allocation81_spill]] %s4335_s1 }
   0x3   :  { %4449 = sst [smem:[#allocation82_spill]] %s4336_s2 }
   0x4   :  { %7 = vsyncpa [#allocation5], 0 }
   0x5   :  { %8 = vsyncpa [#allocation4], 0 }
   0x6   :  { %10 = vsyncpa [#allocation4 + $0x1], 0  ;;  %s2156_s9 = smov 0   ;;  %s2158_s10 = smov 0  }
   0x7   :  { %s2160_s11 = smov 0   ;;  %s2162_s12 = smov 0  }
   0x8   :  { %s2164_s13 = smov 0   ;;  %s2166_s14 = smov 0  }
   0x9 LB: > { %4450 = sst [smem:[#allocation9_spill]] %s2113_s9  ;;  %s1763_s15 = sadd.s32 4294967295, %s2133_s14   ;;  %s2133_s14 = sphi %s2166_s14, %s16_s14   ;;  %s2129_s13 = sphi %s2164_s13, %s4735_s13   ;;  %s2125_s12 = sphi %s2162_s12, %s4734_s12   ;;  %s2121_s11 = sphi %s2160_s11, %s4733_s11   ;;  %s2117_s10 = sphi %s2158_s10, %s4732_s10   ;;  %s2113_s9 = sphi %s2156_s9, %s4731_s9  }
   0xa   : > { %4451 = sst [smem:[#allocation10_spill]] %s2117_s10  ;;  %s1764_s16 = sadd.s32 4294967294, %s2133_s14  }
   0xb   : > { %4452 = sst [smem:[#allocation11_spill]] %s2121_s11  ;;  %s28_s17 = sadd.s32 1, %s2129_s13 }
   0xc   : > { %4453 = sst [smem:[#allocation12_spill]] %s2125_s12  ;;  %s84_s18 = sadd.s32 1, %s2121_s11 }
   0xd   : > { %4454 = sst [smem:[#allocation13_spill]] %s2129_s13  ;;  %p30_p0 = scmp.ge.s32.totalorder %s28_s17, 2 }
   0xe   : > { %4455 = sst [smem:[#allocation14_spill]] %s2133_s14  ;;  %p94_p1 = scmp.ne.s32.totalorder %s2121_s11, %s2117_s10 }
   0xf   : > { %p95_p2 = scmp.eq.s32.totalorder %s1763_s15, 1  ;;  %p100_p3 = scmp.ne.s32.totalorder %s2117_s10, %s2113_s9 }
  0x10   : > { %s4737_s17 = smov (%p30_p0, %s28_s17), 0  ;;  %p101_p5 = scmp.eq.s32.totalorder %s1764_s16, 1 }
  0x11   : > { %4456 = sst [smem:[#allocation15_spill]] %s4737_s17  ;;  %p2196_p4 = por %p95_p2, %p94_p1 }
  0x12   : > { %s79_s20 = ssub.s32 %s2129_s13, %s4737_s17  ;;  %p1765_p6 = scmp.ge.s32.totalorder %s2133_s14, 1 }
  0x13   : > { %s4457_s19 = scalar_select %p2196_p4, 1, 0 }
  0x14   : > { %p82_p7 = scmp.eq.s32.totalorder %s79_s20, 0  ;;  %p2203_p8 = por %p101_p5, %p100_p3 }
  0x15   : > { %4458 = sst [smem:[#allocation16_spill]] %s4457_s19  ;;  %p108_p9 = scmp.lt.s32.totalorder %s2133_s14, 3 }
  0x16   : > { %s4459_s21 = scalar_select %p2203_p8, 1, 0 }
  0x17   : > { %s2209_s22 = scalar_select %p82_p7, %s2121_s11, %s84_s18  }
  0x18   : > { %4460 = sst [smem:[#allocation17_spill]] %s4459_s21  ;;  %p2211_p10 = pnand %p1765_p6, %p108_p9 }
  0x19   : > { %4461 = sst [smem:[#allocation18_spill]] %s2209_s22  ;;  %p2215_p11 = scmp.eq.s32.totalorder %s1763_s15, 0 }
  0x1a   : > { %s4464_s1 = sld [smem:[#allocation81_spill]]  ;;  %p1962_p12 = pneg %p2211_p10 }
  0x1c   : > { %p1963_p13 = pnand %p2215_p11, %p1962_p12 }
  0x1e   : > { %p2040_p1 = pneg %p1963_p13 }
  0x20   : > { %s121_s27 = sshll.u32 %s4464_s1, 4  ;;  %s122_s27 = int_to_ptr.vmem [resolvable:$true] %s121_s27 }
  0x21   : > { %s2038_s28 = scalar_lea.vmem %s122_s27, 32  ;;  %p2046_p5 = scmp.lt.s32.totalorder %s122_s27, %s122_s27 }
  0x22   : > { %p2039_p0 = scmp.ne.s32.totalorder %s122_s27, %s2038_s28  ;;  %p2047_p6 = scmp.lt.s32.totalorder %s2038_s28, %s2038_s28 }
  0x24   : > { %p2041_p2 = pnand %p2040_p1, %p2039_p0  ;;  %p2048_p7 = por %p2047_p6, %p2046_p5 }
  0x26   : > { %p2042_p3 = pneg %p2041_p2 }
  0x28   : > { %p2049_p9 = pnand %p2048_p7, %p2042_p3 }
  0x2a   : > { %2052 = shalt.err (!%p2049_p9)
}
  0x2b   : > { %s2135_s29 = smov [#allocation3]   ;;  %142 = sbr.rel (%p2211_p10) target bundleno = 483 (0x1e3), region = 28 }
  0x2c   : > { %1965 = dma.vmem_to_smem (!%p1963_p13), %s122_s27, 32, %s2135_s29, [#allocation5]  }
  0x30   : > { %2104 = dma.done.wait (%p2215_p11), [#allocation5], 32  }
  0x31   : > { %2106 = vsyncadd (%p2215_p11), [#allocation5], 4294967264 }
  0x32   : > { %148 = sfence }
  0x33   : > { %p165_p12 = scmp.lt.s32.totalorder %s2125_s12, 1  ;;  %s185_s30 = sld [smem:[#allocation3]]  ;;  %vm834_vm1 = vcmask 130048   ;;  %vm837_vm3 = vcmask 123904   ;;  %vm1041_vm4 = vcmask 7168   ;;  %vm1052_vm5 = vcmask 121856  }
  0x34   : > { %s1772_s3 = sld [smem:[#allocation3 + $0x4]] }
  0x35   : > { %s166_s4 = scalar_select %p165_p12, %s2125_s12, 1 }
  0x36   : > { %s1773_s5 = sld [smem:[#allocation3 + $0x8]] }
  0x37   : > { %s1955_s6 = smul.u32 96, %s166_s4  ;;  %s1774_s7 = sld [smem:[#allocation3 + $0xc]] }
  0x38   : > { %s2234_s8 = sld [smem:[#allocation3 + $0x10]] }
  0x39   : > { %s4465_s0 = sld [smem:[#allocation80_spill]]  ;;  %v186_v0 = vstv %s185_s30 }
  0x3a   : > { %s2239_s20 = sld [smem:[#allocation3 + $0x1]]  ;;  %v191_v4 = vstv %s1772_s3 }
  0x3b   : > { %s2247_s23 = sld [smem:[#allocation3 + $0x5]] }
  0x3c   : > { %s2258_s24 = sld [smem:[#allocation3 + $0x9]]  ;;  %v199_v17 = vstv %s1773_s5 }
  0x3d   : > { %v207_v24 = vstv %s1774_s7  ;;  %s2278_s25 = sld [smem:[#allocation3 + $0xd]] }
  0x3e   : > { %s2281_s26 = sld [smem:[#allocation3 + $0x11]]  ;;  %v215_v31 = vstv %s2234_s8 }
  0x3f   : > { %s169_s18 = scalar_lea.vmem %s4465_s0, %s1955_s6  ;;  %s2287_s27 = sld [smem:[#allocation3 + $0x2]] }
  0x40   : > { %v2241_v1 = vld [vmem:[%s169_s18] sm:$0xff]  ;;  %v2243_v2 = vld [vmem:[%s169_s18 + $0x8] sm:$0xff]  ;;  %v2245_v3 = vld [vmem:[%s169_s18 + $0x10] sm:$0x3]  ;;  %v220_v32 = vstv %s2239_s20  ;;  %s2290_s28 = sld [smem:[#allocation3 + $0x6]] }
  0x41   : > { %v2249_v5 = vld [vmem:[%s169_s18 + $0x18] sm:$0xff]  ;;  %v2251_v6 = vld [vmem:[%s169_s18 + $0x20] sm:$0xff]  ;;  %v2253_v7 = vld [vmem:[%s169_s18 + $0x28] sm:$0x3]  ;;  %v187_v8 = vmul.f32 %v186_v0, %v2241_v1  ;;  %v188_v9 = vmul.f32 %v186_v0, %v2243_v2  ;;  %v189_v10 = vmul.f32 %v186_v0, %v2245_v3  ;;  %v221_v36 = vmul.f32 %v220_v32, %v2241_v1  ;;  %s2296_s29 = sld [smem:[#allocation3 + $0xa]] }
  0x42   : > { %v2260_v11 = vld [vmem:[%s169_s18 + $0x30] sm:$0xff]  ;;  %v2262_v12 = vld [vmem:[%s169_s18 + $0x38] sm:$0xff]  ;;  %v2264_v13 = vld [vmem:[%s169_s18 + $0x40] sm:$0x3]  ;;  %v192_v14 = vmul.f32 %v191_v4, %v2249_v5  ;;  %v193_v15 = vmul.f32 %v191_v4, %v2251_v6  ;;  %v194_v16 = vmul.f32 %v191_v4, %v2253_v7  ;;  %v222_v37 = vmul.f32 %v220_v32, %v2243_v2  ;;  %s2299_s30 = sld [smem:[#allocation3 + $0xe]] }
  0x43   : > { %v2269_v18 = vld [vmem:[%s169_s18 + $0x48] sm:$0xff]  ;;  %v2271_v19 = vld [vmem:[%s169_s18 + $0x50] sm:$0xff]  ;;  %v2273_v20 = vld [vmem:[%s169_s18 + $0x58] sm:$0x3]  ;;  %v200_v21 = vmul.f32 %v199_v17, %v2260_v11  ;;  %v201_v22 = vmul.f32 %v199_v17, %v2262_v12  ;;  %v202_v23 = vmul.f32 %v199_v17, %v2264_v13  ;;  %v223_v38 = vmul.f32 %v220_v32, %v2245_v3  ;;  %s2305_s3 = sld [smem:[#allocation3 + $0x12]] }
  0x44   : > { %v195_v25 = vadd.f32 %v192_v14, %v187_v8  ;;  %v196_v26 = vadd.f32 %v193_v15, %v188_v9  ;;  %v197_v27 = vadd.f32 %v194_v16, %v189_v10  ;;  %v208_v28 = vmul.f32 %v207_v24, %v2269_v18  ;;  %s2313_s4 = sld [smem:[#allocation3 + $0x3]] }
  0x45   : > { %v209_v29 = vmul.f32 %v207_v24, %v2271_v19  ;;  %v210_v30 = vmul.f32 %v207_v24, %v2273_v20  ;;  %v225_v39 = vstv %s2247_s23  ;;  %v233_v40 = vstv %s2258_s24  ;;  %s2317_s5 = sld [smem:[#allocation3 + $0x7]] }
  0x46   : > { %v203_v33 = vadd.f32 %v200_v21, %v195_v25  ;;  %v204_v34 = vadd.f32 %v201_v22, %v196_v26  ;;  %v205_v35 = vadd.f32 %v202_v23, %v197_v27  ;;  %v226_v44 = vmul.f32 %v225_v39, %v2249_v5  ;;  %s2329_s6 = sld [smem:[#allocation3 + $0xb]] }
  0x47   : > { %v227_v45 = vmul.f32 %v225_v39, %v2251_v6  ;;  %v228_v46 = vmul.f32 %v225_v39, %v2253_v7  ;;  %v234_v47 = vmul.f32 %v233_v40, %v2260_v11  ;;  %v235_v48 = vmul.f32 %v233_v40, %v2262_v12  ;;  %s2342_s7 = sld [smem:[#allocation3 + $0xf]] }
  0x48   : > { %v211_v41 = vadd.f32 %v208_v28, %v203_v33  ;;  %v212_v42 = vadd.f32 %v209_v29, %v204_v34  ;;  %v213_v43 = vadd.f32 %v210_v30, %v205_v35  ;;  %v229_v52 = vadd.f32 %v226_v44, %v221_v36  ;;  %s2345_s8 = sld [smem:[#allocation3 + $0x13]] }
  0x49   : > { %v230_v53 = vadd.f32 %v227_v45, %v222_v37  ;;  %v231_v54 = vadd.f32 %v228_v46, %v223_v38  ;;  %v236_v55 = vmul.f32 %v233_v40, %v2264_v13  ;;  %v241_v56 = vstv %s2278_s25  ;;  %s2361_s15 = sld [smem:[#allocation3 + $0x14]] }
  0x4a   : > { %v2307_v49 = vadd.f32 %v215_v31, %v211_v41  ;;  %v2309_v50 = vadd.f32 %v215_v31, %v212_v42  ;;  %v2311_v51 = vadd.f32 %v215_v31, %v213_v43  ;;  %v237_v57 = vadd.f32 %v234_v47, %v229_v52  ;;  %s2364_s16 = sld [smem:[#allocation3 + $0x18]] }
  0x4b   : > { %v242_v58 = vmul.f32 %v241_v56, %v2269_v18  ;;  %v243_v59 = vmul.f32 %v241_v56, %v2271_v19  ;;  %v244_v60 = vmul.f32 %v241_v56, %v2273_v20  ;;  %v238_v61 = vadd.f32 %v235_v48, %v230_v53  ;;  %s2367_s18 = sld [smem:[#allocation3 + $0x15]] }
  0x4c   : > { %v239_v62 = vadd.f32 %v236_v55, %v231_v54  ;;  %v249_v63 = vstv %s2281_s26  ;;  %v254_v0 = vstv %s2287_s27  ;;  %v259_v16 = vstv %s2290_s28  ;;  %s2372_s20 = sld [smem:[#allocation3 + $0x19]] }
  0x4d   : > { %v245_v4 = vadd.f32 %v242_v58, %v237_v57  ;;  %v255_v8 = vmul.f32 %v254_v0, %v2241_v1  ;;  %v256_v9 = vmul.f32 %v254_v0, %v2243_v2  ;;  %v257_v10 = vmul.f32 %v254_v0, %v2245_v3  ;;  %s2377_s23 = sld [smem:[#allocation3 + $0x16]] }
  0x4e   : > { %v246_v14 = vadd.f32 %v243_v59, %v238_v61  ;;  %v247_v15 = vadd.f32 %v244_v60, %v239_v62  ;;  %v267_v17 = vstv %s2296_s29  ;;  %v260_v22 = vmul.f32 %v259_v16, %v2249_v5  ;;  %s2385_s24 = sld [smem:[#allocation3 + $0x1a]] }
  0x4f   : > { %v2331_v21 = vadd.f32 %v249_v63, %v245_v4  ;;  %v261_v23 = vmul.f32 %v259_v16, %v2251_v6  ;;  %v262_v24 = vmul.f32 %v259_v16, %v2253_v7  ;;  %v268_v27 = vmul.f32 %v267_v17, %v2260_v11  ;;  %s2387_s25 = sld [smem:[#allocation3 + $0x17]] }
  0x50   : > { %v2336_v25 = vadd.f32 %v249_v63, %v246_v14  ;;  %v2338_v26 = vadd.f32 %v249_v63, %v247_v15  ;;  %v269_v28 = vmul.f32 %v267_v17, %v2262_v12  ;;  %v263_v29 = vadd.f32 %v260_v22, %v255_v8  ;;  %s2389_s26 = sld [smem:[#allocation3 + $0x1b]] }
  0x51   : > { %v264_v30 = vadd.f32 %v261_v23, %v256_v9  ;;  %v265_v31 = vadd.f32 %v262_v24, %v257_v10  ;;  %v270_v32 = vmul.f32 %v267_v17, %v2264_v13  ;;  %v275_v33 = vstv %s2299_s30  ;;  %s2391_s27 = sld [smem:[#allocation3 + $0x1c]] }
  0x52   : > { %v283_v34 = vstv %s2305_s3  ;;  %v288_v35 = vstv %s2313_s4  ;;  %v293_v36 = vstv %s2317_s5  ;;  %v271_v37 = vadd.f32 %v268_v27, %v263_v29  ;;  %s2393_s28 = sld [smem:[#allocation3 + $0x24]] }
  0x53   : > { %v272_v38 = vadd.f32 %v269_v28, %v264_v30  ;;  %v273_v39 = vadd.f32 %v270_v32, %v265_v31  ;;  %v276_v40 = vmul.f32 %v275_v33, %v2269_v18  ;;  %v277_v41 = vmul.f32 %v275_v33, %v2271_v19  ;;  %s2395_s29 = sld [smem:[#allocation3 + $0x2c]] }
  0x54   : > { %v278_v42 = vmul.f32 %v275_v33, %v2273_v20  ;;  %v289_v43 = vmul.f32 %v288_v35, %v2241_v1  ;;  %v290_v44 = vmul.f32 %v288_v35, %v2243_v2  ;;  %v291_v46 = vmul.f32 %v288_v35, %v2245_v3  ;;  %s2397_s30 = sld [smem:[#allocation3 + $0x34]] }
  0x55   : > { %v279_v45 = vadd.f32 %v276_v40, %v271_v37  ;;  %v294_v47 = vmul.f32 %v293_v36, %v2249_v5  ;;  %v295_v48 = vmul.f32 %v293_v36, %v2251_v6  ;;  %v280_v52 = vadd.f32 %v277_v41, %v272_v38  ;;  %s2399_s3 = sld [smem:[#allocation3 + $0x3c]] }
  0x56   : > { %v281_v53 = vadd.f32 %v278_v42, %v273_v39  ;;  %v296_v54 = vmul.f32 %v293_v36, %v2253_v7  ;;  %v301_v55 = vstv %s2329_s6  ;;  %v309_v60 = vstv %s2342_s7  ;;  %s2401_s4 = sld [smem:[#allocation3 + $0x1d]] }
  0x57   : > { %v284_v56 = vadd.f32 %v283_v34, %v279_v45  ;;  %v297_v1 = vadd.f32 %v294_v47, %v289_v43  ;;  %v298_v57 = vadd.f32 %v295_v48, %v290_v44  ;;  %v302_v2 = vmul.f32 %v301_v55, %v2260_v11  ;;  %s2415_s5 = sld [smem:[#allocation3 + $0x25]] }
  0x58   : > { %v285_v3 = vadd.f32 %v283_v34, %v280_v52  ;;  %v286_v5 = vadd.f32 %v283_v34, %v281_v53  ;;  %v299_v58 = vadd.f32 %v296_v54, %v291_v46  ;;  %v303_v6 = vmul.f32 %v301_v55, %v2262_v12  ;;  %s2427_s6 = sld [smem:[#allocation3 + $0x2d]] }
  0x59   : > { %v304_v7 = vmul.f32 %v301_v55, %v2264_v13  ;;  %v305_v59 = vadd.f32 %v302_v2, %v297_v1  ;;  %v317_v61 = vstv %s2345_s8  ;;  %v310_v63 = vmul.f32 %v309_v60, %v2269_v18  ;;  %s2437_s7 = sld [smem:[#allocation3 + $0x35]] }
  0x5a   : > { %v306_v62 = vadd.f32 %v303_v6, %v298_v57  ;;  %v311_v11 = vmul.f32 %v309_v60, %v2271_v19  ;;  %v312_v0 = vmul.f32 %v309_v60, %v2273_v20  ;;  %v321_v12 = vadd.f32 %v2331_v21, %v2307_v49  ;;  %s2447_s8 = sld [smem:[#allocation3 + $0x3d]] }
  0x5b   : > { %v307_v4 = vadd.f32 %v304_v7, %v299_v58  ;;  %v322_v13 = vadd.f32 %v2336_v25, %v2309_v50  ;;  %v323_v8 = vadd.f32 %v2338_v26, %v2311_v51  ;;  %v313_v9 = vadd.f32 %v310_v63, %v305_v59  ;;  %s2457_s0 = sld [smem:[#allocation3 + $0x1e]] }
  0x5c   : > { %v314_v18 = vadd.f32 %v311_v11, %v306_v62  ;;  %v324_v20 = vadd.f32 %v321_v12, %v284_v56  ;;  %s2463_s1 = sld [smem:[#allocation3 + $0x26]]  ;;  %v379_v60 = vstv %s2361_s15  ;;  %v392_v62 = vstv %s2367_s18 }
  0x5d   : > { %v315_v19 = vadd.f32 %v312_v0, %v307_v4  ;;  %v325_v10 = vadd.f32 %v322_v13, %v285_v3  ;;  %v326_v14 = vadd.f32 %v323_v8, %v286_v5  ;;  %v318_v15 = vadd.f32 %v317_v61, %v313_v9  ;;  %s2469_s17 = sld [smem:[#allocation3 + $0x2e]] }
  0x5e   : > { %v319_v16 = vadd.f32 %v317_v61, %v314_v18  ;;  %s2471_s13 = sld [smem:[#allocation3 + $0x36]]  ;;  %v2505_v63 = vstv %s2372_s20  ;;  %v2508_v11 = vstv %s2377_s23  ;;  %v2511_v0 = vstv %s2385_s24 }
  0x5f   : > { %v320_v17 = vadd.f32 %v317_v61, %v315_v19  ;;  %v327_v22 = vadd.f32 %v324_v20, %v318_v15  ;;  %s2473_s22 = sld [smem:[#allocation3 + $0x3e]]  ;;  %v2499_v61 = vstv %s2364_s16  ;;  %v2514_v4 = vstv %s2387_s25 }
  0x60   : > { %v328_v23 = vadd.f32 %v325_v10, %v319_v16  ;;  %s2475_s11 = sld [smem:[#allocation3 + $0x1f]]  ;;  %v2517_v12 = vstv %s2389_s26  ;;  %v2520_v13 = vstv %s2391_s27  ;;  %v2523_v8 = vstv %s2393_s28 }
  0x61   : > { %v329_v24 = vadd.f32 %v326_v14, %v320_v17  ;;  %v330_v27 = vmul.f32 0.25, %v327_v22  ;;  %s2477_s21 = sld [smem:[#allocation3 + $0x27]]  ;;  %v2526_v9 = vstv %s2395_s29  ;;  %v2529_v18 = vstv %s2397_s30 }
  0x62   : > { %v331_v28 = vmul.f32 0.25, %v328_v23  ;;  %s2479_s9 = sld [smem:[#allocation3 + $0x2f]]  ;;  %v2532_v19 = vstv %s2399_s3  ;;  %v2535_v20 = vstv %s2401_s4  ;;  %v2538_v10 = vstv %s2415_s5 }
  0x63   : > { %v332_v29 = vmul.f32 0.25, %v329_v24  ;;  %v2404_v30 = vsub.f32 %v2307_v49, %v330_v27  ;;  %v2410_v32 = vsub.f32 %v2331_v21, %v330_v27  ;;  %v2423_v36 = vsub.f32 %v284_v56, %v330_v27  ;;  %s2481_s14 = sld [smem:[#allocation3 + $0x37]] }
  0x64   : > { %v2407_v31 = vsub.f32 %v2309_v50, %v331_v28  ;;  %v2413_v33 = vsub.f32 %v2336_v25, %v331_v28  ;;  %v2425_v49 = vsub.f32 %v285_v3, %v331_v28  ;;  %v2431_v21 = vsub.f32 %v318_v15, %v330_v27  ;;  %s2483_s2 = sld [smem:[#allocation3 + $0x3f]] }
  0x65   : > { %v2418_v34 = vsub.f32 %v2311_v51, %v332_v29  ;;  %v2421_v35 = vsub.f32 %v2338_v26, %v332_v29  ;;  %v2429_v50 = vsub.f32 %v286_v5, %v332_v29  ;;  %v2433_v25 = vsub.f32 %v319_v16, %v331_v28  ;;  %s2485_s19 = sld [smem:[#allocation3 + $0x20]] }
  0x66   : > { %v2435_v37 = vsub.f32 %v320_v17, %v332_v29  ;;  %v345_v51 = vmul.f32 %v2404_v30, %v2404_v30  ;;  %v346_v26 = vmul.f32 %v2407_v31, %v2407_v31  ;;  %v348_v39 = vmul.f32 %v2410_v32, %v2410_v32  ;;  %s2487_s12 = sld [smem:[#allocation3 + $0x28]] }
  0x67   : > { %v347_v38 = vmul.f32 %v2418_v34, %v2418_v34  ;;  %v349_v40 = vmul.f32 %v2413_v33, %v2413_v33  ;;  %v350_v41 = vmul.f32 %v2421_v35, %v2421_v35  ;;  %v354_v42 = vmul.f32 %v2423_v36, %v2423_v36  ;;  %s2489_s10 = sld [smem:[#allocation3 + $0x30]] }
  0x68   : > { %v355_v43 = vmul.f32 %v2425_v49, %v2425_v49  ;;  %v351_v44 = vadd.f32 %v348_v39, %v345_v51  ;;  %v356_v45 = vmul.f32 %v2429_v50, %v2429_v50  ;;  %v360_v46 = vmul.f32 %v2431_v21, %v2431_v21  ;;  %s2852_s23 = sld [smem:[#allocation3 + $0x45]] }
  0x69   : > { %v352_v47 = vadd.f32 %v349_v40, %v346_v26  ;;  %v353_v48 = vadd.f32 %v350_v41, %v347_v38  ;;  %v361_v52 = vmul.f32 %v2433_v25, %v2433_v25  ;;  %v362_v53 = vmul.f32 %v2435_v37, %v2435_v37  ;;  %4466 = sst [smem:[#allocation19_spill]] %s2481_s14 }
  0x6a   : > { %v357_v54 = vadd.f32 %v354_v42, %v351_v44  ;;  %4467 = sst [smem:[#allocation20_spill]] %s2483_s2  ;;  %v2541_v14 = vstv %s2427_s6  ;;  %v2544_v15 = vstv %s2437_s7  ;;  %v2547_v16 = vstv %s2447_s8 }
  0x6b   : > { %v358_v55 = vadd.f32 %v355_v43, %v352_v47  ;;  %v359_v56 = vadd.f32 %v356_v45, %v353_v48  ;;  %4468 = sst [smem:[#allocation21_spill]] %s2485_s19  ;;  %v2550_v17 = vstv %s2457_s0  ;;  %v2553_v22 = vstv %s2463_s1 }
  0x6c   : > { %v363_v1 = vadd.f32 %v360_v46, %v357_v54  ;;  %s2491_s2 = sld [smem:[#allocation3 + $0x38]]  ;;  %v2556_v23 = vstv %s2469_s17  ;;  %v2559_v24 = vstv %s2471_s13  ;;  %v2562_v27 = vstv %s2473_s22 }
  0x6d   : > { %v364_v57 = vadd.f32 %v361_v52, %v358_v55  ;;  %v365_v2 = vadd.f32 %v362_v53, %v359_v56  ;;  %4469 = sst [smem:[#allocation22_spill]] %s2489_s10  ;;  %v2565_v28 = vstv %s2475_s11  ;;  %v2568_v29 = vstv %s2477_s21 }
  0x6e   : > { %v366_v3 = vmul.f32 0.25, %v363_v1  ;;  %s2493_s14 = sld [smem:[#allocation3 + $0x40]]  ;;  %v2571_v51 = vstv %s2479_s9  ;;  %v2583_v40 = vstv %s2487_s12 }
  0x6f   : > { %v367_v5 = vmul.f32 0.25, %v364_v57  ;;  %v368_v58 = vmul.f32 0.25, %v365_v2  ;;  %s2495_s19 = sld [smem:[#allocation3 + $0x21]] }
  0x70   : > { %v369_v6 = vadd.f32 1e-05, %v366_v3  ;;  %s2502_s10 = sld [smem:[#allocation3 + $0x29]] }
  0x71   : > { %v370_v7 = vadd.f32 1e-05, %v367_v5  ;;  %v371_v59 = vadd.f32 1e-05, %v368_v58  ;;  %s4470_s15 = sld [smem:[#allocation19_spill]] }
  0x72   : > { %2026 = vrsqrt.f32 %v369_v6  ;;  %s4471_s16 = sld [smem:[#allocation20_spill]]  ;;  %v2591_v43 = vstv %s2491_s2 }
  0x73   : > { %2028 = vrsqrt.f32 %v370_v7  ;;  %s4472_s18 = sld [smem:[#allocation21_spill]] }
  0x74   : > { %2030 = vrsqrt.f32 %v371_v59  ;;  %s4473_s20 = sld [smem:[#allocation22_spill]]  ;;  %v2594_v44 = vstv %s2493_s14 }
  0x75   : > { %s2588_s0 = sld [smem:[#allocation3 + $0x31]]  ;;  %4474 = vst [vmem:[#allocation23_spill] sm:$0xff] %v2594_v44  ;;  %v2597_v45 = vstv %s2495_s19 }
  0x76   : > { %v2600_v46 = vstv %s2502_s10  ;;  %s2602_s1 = sld [smem:[#allocation3 + $0x39]] }
  0x77   : > { %v2574_v26 = vstv %s4470_s15  ;;  %s2608_s9 = sld [smem:[#allocation3 + $0x41]] }
  0x78   : > { %v2577_v38 = vstv %s4471_s16  ;;  %s2614_s2 = sld [smem:[#allocation3 + $0x22]] }
  0x79   : > { %v2580_v39 = vstv %s4472_s18  ;;  %s2618_s10 = sld [smem:[#allocation3 + $0x2a]] }
  0x7a   : > { %v2586_v41 = vstv %s4473_s20  ;;  %s2622_s11 = sld [smem:[#allocation3 + $0x32]] }
  0x7b   : > { %s2638_s12 = sld [smem:[#allocation3 + $0x3a]] }
  0x7c   : > { %s2650_s13 = sld [smem:[#allocation3 + $0x42]] }
  0x7d   : > { %s2660_s14 = sld [smem:[#allocation3 + $0x23]] }
  0x7e   : > { %s2671_s17 = sld [smem:[#allocation3 + $0x2b]] }
  0x7f   : > { %v2027_v42 = vpop.eup %2026  ;;  %s2714_s19 = sld [smem:[#allocation3 + $0x33]] }
  0x80   : > { %v2029_v47 = vpop.eup %2028  ;;  %v375_v48 = vmul.f32 %v2027_v42, %v2404_v30  ;;  %v388_v52 = vmul.f32 %v2027_v42, %v2410_v32  ;;  %v401_v53 = vmul.f32 %v2027_v42, %v2423_v36  ;;  %v414_v54 = vmul.f32 %v2027_v42, %v2431_v21  ;;  %s2836_s21 = sld [smem:[#allocation3 + $0x3b]] }
  0x81   : > { %v2031_v55 = vpop.eup %2030  ;;  %v376_v56 = vmul.f32 %v2029_v47, %v2407_v31  ;;  %v389_v1 = vmul.f32 %v2029_v47, %v2413_v33  ;;  %v402_v57 = vmul.f32 %v2029_v47, %v2425_v49  ;;  %v415_v2 = vmul.f32 %v2029_v47, %v2433_v25  ;;  %s2842_s22 = sld [smem:[#allocation3 + $0x43]] }
  0x82   : > { %v377_v30 = vmul.f32 %v2031_v55, %v2418_v34  ;;  %v380_v32 = vmul.f32 %v379_v60, %v375_v48  ;;  %v390_v36 = vmul.f32 %v2031_v55, %v2421_v35  ;;  %v393_v3 = vmul.f32 %v392_v62, %v388_v52  ;;  %s2858_s24 = sld [smem:[#allocation3 + $0x4d]] }
  0x83   : > { %v381_v21 = vmul.f32 %v379_v60, %v376_v56  ;;  %v394_v5 = vmul.f32 %v392_v62, %v389_v1  ;;  %v403_v31 = vmul.f32 %v2031_v55, %v2429_v50  ;;  %v406_v33 = vmul.f32 %v2508_v11, %v401_v53  ;;  %s2869_s25 = sld [smem:[#allocation3 + $0x55]] }
  0x84   : > { %v382_v49 = vmul.f32 %v379_v60, %v377_v30  ;;  %v2625_v25 = vadd.f32 %v2499_v61, %v380_v32  ;;  %v395_v34 = vmul.f32 %v392_v62, %v390_v36  ;;  %v2628_v35 = vadd.f32 %v2505_v63, %v393_v3  ;;  %s2876_s26 = sld [smem:[#allocation3 + $0x6d]] }
  0x85   : > { %v2631_v58 = vadd.f32 %v2499_v61, %v381_v21  ;;  %v2634_v6 = vadd.f32 %v2505_v63, %v394_v5  ;;  %v407_v50 = vmul.f32 %v2508_v11, %v402_v57  ;;  %v408_v7 = vmul.f32 %v2508_v11, %v403_v31  ;;  %s2884_s27 = sld [smem:[#allocation3 + $0x85]] }
  0x86   : > { %v2641_v59 = vadd.f32 %v2499_v61, %v382_v49  ;;  %v2644_v60 = vadd.f32 %v2505_v63, %v395_v34  ;;  %v416_v62 = vmul.f32 %v2031_v55, %v2435_v37  ;;  %v2648_v42 = vstv %s2588_s0  ;;  %s2889_s28 = sld [smem:[#allocation3 + $0x44]] }
  0x87   : > { %v2653_v47 = vadd.f32 %v2511_v0, %v406_v33  ;;  %v419_v11 = vmul.f32 %v2514_v4, %v414_v54  ;;  %v420_v61 = vmul.f32 %v2514_v4, %v415_v2  ;;  %v2658_v48 = vstv %s2602_s1  ;;  %s2895_s29 = sld [smem:[#allocation3 + $0x4c]] }
  0x88   : > { %4475 = vst [vmem:[#allocation24_spill] sm:$0xff] %v2658_v48  ;;  %v2663_v37 = vadd.f32 %v2511_v0, %v407_v50  ;;  %v2666_v63 = vadd.f32 %v2511_v0, %v408_v7  ;;  %v421_v52 = vmul.f32 %v2514_v4, %v416_v62  ;;  %v429_v53 = vmul.f32 %v2520_v13, %v2625_v25  ;;  %s2903_s30 = sld [smem:[#allocation3 + $0x54]] }
  0x89   : > { %v430_v54 = vmul.f32 %v2520_v13, %v2631_v58  ;;  %v431_v55 = vmul.f32 %v2520_v13, %v2641_v59  ;;  %v434_v56 = vmul.f32 %v2523_v8, %v2628_v35  ;;  %v435_v0 = vmul.f32 %v2523_v8, %v2634_v6  ;;  %4483 = sst [smem:[#allocation19_spill]] %s2869_s25 }
  0x8a   : > { %v436_v4 = vmul.f32 %v2523_v8, %v2644_v60  ;;  %v2684_v1 = vstv %s2608_s9  ;;  %v2687_v57 = vstv %s2614_s2  ;;  %v2690_v2 = vstv %s2618_s10  ;;  %4484 = sst [smem:[#allocation20_spill]] %s2876_s26 }
  0x8b   : > { %4476 = vst [vmem:[#allocation25_spill] sm:$0xff] %v2684_v1  ;;  %4477 = vst [vmem:[#allocation26_spill] sm:$0xff] %v2690_v2  ;;  %v2693_v30 = vadd.f32 %v2517_v12, %v419_v11  ;;  %v2696_v13 = vadd.f32 %v2517_v12, %v420_v61  ;;  %v2699_v32 = vadd.f32 %v2517_v12, %v421_v52  ;;  %v2702_v36 = vstv %s2622_s11  ;;  %4485 = sst [smem:[#allocation21_spill]] %s2884_s27 }
  0x8c   : > { %4478 = vst [vmem:[#allocation27_spill] sm:$0xff] %v2702_v36  ;;  %v437_v8 = vadd.f32 %v434_v56, %v429_v53  ;;  %v442_v3 = vmul.f32 %v2526_v9, %v2653_v47  ;;  %v443_v21 = vmul.f32 %v2526_v9, %v2663_v37  ;;  %v463_v5 = vmul.f32 %v2535_v20, %v2625_v25  ;;  %s2913_s3 = sld [smem:[#allocation3 + $0x6c]] }
  0x8d   : > { %v438_v31 = vadd.f32 %v435_v0, %v430_v54  ;;  %v439_v33 = vadd.f32 %v436_v4, %v431_v55  ;;  %v444_v12 = vmul.f32 %v2526_v9, %v2666_v63  ;;  %v464_v49 = vmul.f32 %v2535_v20, %v2631_v58  ;;  %s2927_s4 = sld [smem:[#allocation3 + $0x84]] }
  0x8e   : > { %v465_v34 = vmul.f32 %v2535_v20, %v2641_v59  ;;  %v468_v50 = vmul.f32 %v2538_v10, %v2628_v35  ;;  %v469_v7 = vmul.f32 %v2538_v10, %v2634_v6  ;;  %v470_v62 = vmul.f32 %v2538_v10, %v2644_v60  ;;  %4488 = sst [smem:[#allocation22_spill]] %s2903_s30 }
  0x8f   : > { %v476_v9 = vmul.f32 %v2541_v14, %v2653_v47  ;;  %v2727_v11 = vstv %s2638_s12  ;;  %v2730_v61 = vstv %s2650_s13  ;;  %v2733_v52 = vstv %s2660_s14  ;;  %s2933_s5 = sld [smem:[#allocation3 + $0x46]] }
  0x90   : > { %4479 = vst [vmem:[#allocation28_spill] sm:$0xff] %v2727_v11  ;;  %4480 = vst [vmem:[#allocation29_spill] sm:$0xff] %v2730_v61  ;;  %v471_v53 = vadd.f32 %v468_v50, %v463_v5  ;;  %v472_v20 = vadd.f32 %v469_v7, %v464_v49  ;;  %v477_v54 = vmul.f32 %v2541_v14, %v2663_v37  ;;  %v2738_v55 = vstv %s2671_s17  ;;  %s2940_s6 = sld [smem:[#allocation3 + $0x4e]] }
  0x91   : > { %4481 = vst [vmem:[#allocation30_spill] sm:$0xff] %v2733_v52  ;;  %4482 = vst [vmem:[#allocation31_spill] sm:$0xff] %v2738_v55  ;;  %v445_v56 = vadd.f32 %v442_v3, %v437_v8  ;;  %v450_v10 = vmul.f32 %v2529_v18, %v2693_v30  ;;  %v451_v0 = vmul.f32 %v2529_v18, %v2696_v13  ;;  %s2946_s7 = sld [smem:[#allocation3 + $0x56]] }
  0x92   : > { %v452_v4 = vmul.f32 %v2529_v18, %v2699_v32  ;;  %v446_v61 = vadd.f32 %v443_v21, %v438_v31  ;;  %v447_v1 = vadd.f32 %v444_v12, %v439_v33  ;;  %v473_v5 = vadd.f32 %v470_v62, %v465_v34  ;;  %4489 = sst [smem:[#allocation32_spill]] %s2913_s3 }
  0x93   : > { %v478_v49 = vmul.f32 %v2541_v14, %v2666_v63  ;;  %v479_v50 = vadd.f32 %v476_v9, %v471_v53  ;;  %v484_v8 = vmul.f32 %v2544_v15, %v2693_v30  ;;  %v497_v3 = vmul.f32 %v2550_v17, %v2625_v25  ;;  %4491 = sst [smem:[#allocation33_spill]] %s2927_s4 }
  0x94   : > { %v498_v7 = vmul.f32 %v2550_v17, %v2631_v58  ;;  %v480_v11 = vadd.f32 %v477_v54, %v472_v20  ;;  %v485_v18 = vmul.f32 %v2544_v15, %v2696_v13  ;;  %v499_v21 = vmul.f32 %v2550_v17, %v2641_v59  ;;  %s2956_s8 = sld [smem:[#allocation3 + $0x6e]] }
  0x95   : > { %v502_v14 = vmul.f32 %v2553_v22, %v2628_v35  ;;  %v503_v31 = vmul.f32 %v2553_v22, %v2634_v6  ;;  %v504_v33 = vmul.f32 %v2553_v22, %v2644_v60  ;;  %v510_v12 = vmul.f32 %v2556_v23, %v2653_v47  ;;  %s2962_s15 = sld [smem:[#allocation3 + $0x86]] }
  0x96   : > { %v2767_v34 = vstv %s2714_s19  ;;  %v453_v62 = vadd.f32 %v450_v10, %v445_v56  ;;  %v454_v9 = vadd.f32 %v451_v0, %v446_v61  ;;  %v511_v17 = vmul.f32 %v2556_v23, %v2663_v37  ;;  %s2968_s16 = sld [smem:[#allocation3 + $0x47]] }
  0x97   : > { %v505_v53 = vadd.f32 %v502_v14, %v497_v3  ;;  %v455_v20 = vadd.f32 %v452_v4, %v447_v1  ;;  %v481_v54 = vadd.f32 %v478_v49, %v473_v5  ;;  %v486_v55 = vmul.f32 %v2544_v15, %v2699_v32  ;;  %4494 = sst [smem:[#allocation34_spill]] %s2946_s7 }
  0x98   : > { %v506_v52 = vadd.f32 %v503_v31, %v498_v7  ;;  %v487_v36 = vadd.f32 %v484_v8, %v479_v50  ;;  %v488_v44 = vadd.f32 %v485_v18, %v480_v11  ;;  %v507_v22 = vadd.f32 %v504_v33, %v499_v21  ;;  %s2974_s18 = sld [smem:[#allocation3 + $0x4f]] }
  0x99   : > { %v512_v2 = vmul.f32 %v2556_v23, %v2666_v63  ;;  %v513_v48 = vadd.f32 %v510_v12, %v505_v53  ;;  %v518_v61 = vmul.f32 %v2559_v24, %v2693_v30  ;;  %v519_v56 = vmul.f32 %v2559_v24, %v2696_v13  ;;  %s2979_s20 = sld [smem:[#allocation3 + $0x57]] }
  0x9a   : > { %v531_v1 = vmul.f32 %v2565_v28, %v2625_v25  ;;  %v514_v10 = vadd.f32 %v511_v17, %v506_v52  ;;  %v532_v15 = vmul.f32 %v2565_v28, %v2631_v58  ;;  %v536_v11 = vmul.f32 %v2568_v29, %v2628_v35  ;;  %4496 = sst [smem:[#allocation35_spill]] %s2956_s8 }
  0x9b   : > { %v537_v23 = vmul.f32 %v2568_v29, %v2634_v6  ;;  %v2788_v0 = vadd.f32 %v2532_v19, %v453_v62  ;;  %v2791_v4 = vadd.f32 %v2532_v19, %v454_v9  ;;  %v533_v5 = vmul.f32 %v2565_v28, %v2641_v59  ;;  %4497 = sst [smem:[#allocation36_spill]] %s2962_s15 }
  0x9c   : > { %v538_v52 = vmul.f32 %v2568_v29, %v2644_v60  ;;  %v2798_v49 = vadd.f32 %v2532_v19, %v455_v20  ;;  %v489_v50 = vadd.f32 %v486_v55, %v481_v54  ;;  %v539_v8 = vadd.f32 %v536_v11, %v531_v1  ;;  %s2983_s0 = sld [smem:[#allocation3 + $0x6f]] }
  0x9d   : > { %v544_v3 = vmul.f32 %v2571_v51, %v2653_v47  ;;  %v2803_v7 = vadd.f32 %v2547_v16, %v487_v36  ;;  %v2806_v18 = vadd.f32 %v2547_v16, %v488_v44  ;;  %v515_v21 = vadd.f32 %v512_v2, %v507_v22  ;;  %s2992_s1 = sld [smem:[#allocation3 + $0x87]] }
  0x9e   : > { %v520_v28 = vmul.f32 %v2559_v24, %v2699_v32  ;;  %v521_v14 = vadd.f32 %v518_v61, %v513_v48  ;;  %v522_v29 = vadd.f32 %v519_v56, %v514_v10  ;;  %v540_v31 = vadd.f32 %v537_v23, %v532_v15  ;;  %s3000_s9 = sld [smem:[#allocation3 + $0x48]] }
  0x9f   : > { %v545_v19 = vmul.f32 %v2571_v51, %v2663_v37  ;;  %v541_v55 = vadd.f32 %v538_v52, %v533_v5  ;;  %v546_v33 = vmul.f32 %v2571_v51, %v2666_v63  ;;  %v565_v36 = vmul.f32 %v2580_v39, %v2625_v25  ;;  %4499 = sst [smem:[#allocation37_spill]] %s2979_s20 }
  0xa0   : > { %v566_v44 = vmul.f32 %v2580_v39, %v2631_v58  ;;  %v547_v2 = vadd.f32 %v544_v3, %v539_v8  ;;  %v552_v24 = vmul.f32 %v2574_v26, %v2693_v30  ;;  %v567_v48 = vmul.f32 %v2580_v39, %v2641_v59  ;;  %s3005_s2 = sld [smem:[#allocation3 + $0x50]] }
  0xa1   : > { %v570_v12 = vmul.f32 %v2583_v40, %v2628_v35  ;;  %v523_v62 = vadd.f32 %v520_v28, %v515_v21  ;;  %v571_v51 = vmul.f32 %v2583_v40, %v2634_v6  ;;  %v572_v9 = vmul.f32 %v2583_v40, %v2644_v60  ;;  %s3011_s10 = sld [smem:[#allocation3 + $0x58]] }
  0xa2   : > { %v578_v53 = vmul.f32 %v2586_v41, %v2653_v47  ;;  %v548_v17 = vadd.f32 %v545_v19, %v540_v31  ;;  %v553_v20 = vmul.f32 %v2574_v26, %v2696_v13  ;;  %v579_v39 = vmul.f32 %v2586_v41, %v2663_v37  ;;  %4500 = sst [smem:[#allocation38_spill]] %s2983_s0 }
  0xa3   : > { %v573_v54 = vadd.f32 %v570_v12, %v565_v36  ;;  %v549_v22 = vadd.f32 %v546_v33, %v541_v55  ;;  %v574_v61 = vadd.f32 %v571_v51, %v566_v44  ;;  %v575_v56 = vadd.f32 %v572_v9, %v567_v48  ;;  %v4486_v9 = vld [vmem:[#allocation24_spill] sm:$0xff]  ;;  %4501 = sst [smem:[#allocation39_spill]] %s2992_s1 }
  0xa4   : > { %v580_v1 = vmul.f32 %v2586_v41, %v2666_v63  ;;  %v554_v40 = vmul.f32 %v2574_v26, %v2699_v32  ;;  %v555_v10 = vadd.f32 %v552_v24, %v547_v2  ;;  %v586_v11 = vmul.f32 %v2591_v43, %v2693_v30  ;;  %s3016_s11 = sld [smem:[#allocation3 + $0x70]] }
  0xa5   : > { %v581_v15 = vadd.f32 %v578_v53, %v573_v54  ;;  %v587_v23 = vmul.f32 %v2591_v43, %v2696_v13  ;;  %v588_v5 = vmul.f32 %v2591_v43, %v2699_v32  ;;  %v599_v41 = vmul.f32 %v2597_v45, %v2625_v25  ;;  %s3022_s12 = sld [smem:[#allocation3 + $0x88]] }
  0xa6   : > { %v600_v52 = vmul.f32 %v2597_v45, %v2631_v58  ;;  %v582_v26 = vadd.f32 %v579_v39, %v574_v61  ;;  %v583_v8 = vadd.f32 %v580_v1, %v575_v56  ;;  %v604_v3 = vmul.f32 %v2600_v46, %v2628_v35  ;;  %s3030_s13 = sld [smem:[#allocation3 + $0x49]] }
  0xa7   : > { %v605_v21 = vmul.f32 %v2600_v46, %v2634_v6  ;;  %v2861_v43 = vadd.f32 %v2547_v16, %v489_v50  ;;  %v601_v28 = vmul.f32 %v2597_v45, %v2641_v59  ;;  %v606_v31 = vmul.f32 %v2600_v46, %v2644_v60  ;;  %4503 = sst [smem:[#allocation40_spill]] %s3011_s10 }
  0xa8   : > { %v612_v19 = vmul.f32 %v2648_v42, %v2653_v47  ;;  %v2872_v55 = vadd.f32 %v2562_v27, %v521_v14  ;;  %v607_v33 = vadd.f32 %v604_v3, %v599_v41  ;;  %v613_v16 = vmul.f32 %v2648_v42, %v2663_v37  ;;  %s3036_s14 = sld [smem:[#allocation3 + $0x51]] }
  0xa9   : > { %v608_v36 = vadd.f32 %v605_v21, %v600_v52  ;;  %v2879_v45 = vadd.f32 %v2562_v27, %v522_v29  ;;  %v2882_v46 = vadd.f32 %v2562_v27, %v523_v62  ;;  %v556_v50 = vadd.f32 %v553_v20, %v548_v17  ;;  %v4487_v20 = vld [vmem:[#allocation26_spill] sm:$0xff]  ;;  %s3043_s17 = sld [smem:[#allocation3 + $0x59]] }
  0xaa   : > { %v557_v44 = vadd.f32 %v554_v40, %v549_v22  ;;  %v2887_v14 = vadd.f32 %v2577_v38, %v555_v10  ;;  %v589_v2 = vadd.f32 %v586_v11, %v581_v15  ;;  %v590_v24 = vadd.f32 %v587_v23, %v582_v26  ;;  %v4490_v40 = vld [vmem:[#allocation23_spill] sm:$0xff]  ;;  %4504 = sst [smem:[#allocation41_spill]] %s3016_s11 }
  0xab   : > { %v591_v48 = vadd.f32 %v588_v5, %v583_v8  ;;  %v609_v12 = vadd.f32 %v606_v31, %v601_v28  ;;  %v614_v29 = vmul.f32 %v2648_v42, %v2666_v63  ;;  %v615_v51 = vadd.f32 %v612_v19, %v607_v33  ;;  %v4492_v5 = vld [vmem:[#allocation27_spill] sm:$0xff]  ;;  %v4493_v28 = vld [vmem:[#allocation30_spill] sm:$0xff]  ;;  %4506 = sst [smem:[#allocation42_spill]] %s3022_s12 }
  0xac   : > { %v633_v27 = vmul.f32 %v2687_v57, %v2625_v25  ;;  %v616_v62 = vadd.f32 %v613_v16, %v608_v36  ;;  %v620_v53 = vmul.f32 %v4486_v9, %v2693_v30  ;;  %v621_v17 = vmul.f32 %v4486_v9, %v2696_v13  ;;  %v4495_v16 = vld [vmem:[#allocation31_spill] sm:$0xff]  ;;  %4507 = sst [smem:[#allocation43_spill]] %s3030_s13 }
  0xad   : > { %v638_v54 = vmul.f32 %v4487_v20, %v2628_v35  ;;  %v634_v42 = vmul.f32 %v2687_v57, %v2631_v58  ;;  %v635_v39 = vmul.f32 %v2687_v57, %v2641_v59  ;;  %v639_v22 = vmul.f32 %v4487_v20, %v2634_v6  ;;  %s3045_s19 = sld [smem:[#allocation3 + $0x71]] }
  0xae   : > { %v640_v61 = vmul.f32 %v4487_v20, %v2644_v60  ;;  %v2916_v56 = vadd.f32 %v2577_v38, %v556_v50  ;;  %v2919_v1 = vadd.f32 %v2577_v38, %v557_v44  ;;  %v2922_v10 = vadd.f32 %v4490_v40, %v589_v2  ;;  %4508 = sst [smem:[#allocation44_spill]] %s3036_s14 }
  0xaf   : > { %v2925_v15 = vadd.f32 %v4490_v40, %v590_v24  ;;  %v617_v57 = vadd.f32 %v614_v29, %v609_v12  ;;  %v622_v11 = vmul.f32 %v4486_v9, %v2699_v32  ;;  %v641_v23 = vadd.f32 %v638_v54, %v633_v27  ;;  %4509 = sst [smem:[#allocation45_spill]] %s3043_s17 }
  0xb0   : > { %v646_v41 = vmul.f32 %v4492_v5, %v2653_v47  ;;  %v2936_v38 = vadd.f32 %v4490_v40, %v591_v48  ;;  %v623_v52 = vadd.f32 %v620_v53, %v615_v51  ;;  %v624_v26 = vadd.f32 %v621_v17, %v616_v62  ;;  %s3056_s14 = sld [smem:[#allocation3 + $0x52]] }
  0xb1   : > { %v647_v8 = vmul.f32 %v4492_v5, %v2663_v37  ;;  %v642_v3 = vadd.f32 %v639_v22, %v634_v42  ;;  %v643_v21 = vadd.f32 %v640_v61, %v635_v39  ;;  %v667_v31 = vmul.f32 %v4493_v28, %v2625_v25  ;;  %v4502_v22 = vld [vmem:[#allocation25_spill] sm:$0xff]  ;;  %s3058_s17 = sld [smem:[#allocation3 + $0x5a]] }
  0xb2   : > { %v668_v19 = vmul.f32 %v4493_v28, %v2631_v58  ;;  %v648_v33 = vmul.f32 %v4492_v5, %v2666_v63  ;;  %v669_v36 = vmul.f32 %v4493_v28, %v2641_v59  ;;  %v672_v50 = vmul.f32 %v4495_v16, %v2628_v35  ;;  %v4498_v59 = vld [vmem:[#allocation28_spill] sm:$0xff]  ;;  %s3062_s13 = sld [smem:[#allocation3 + $0x8a]] }
  0xb3   : > { %v673_v44 = vmul.f32 %v4495_v16, %v2634_v6  ;;  %v625_v25 = vadd.f32 %v622_v11, %v617_v57  ;;  %v649_v2 = vadd.f32 %v646_v41, %v641_v23  ;;  %v674_v58 = vmul.f32 %v4495_v16, %v2644_v60  ;;  %4510 = sst [smem:[#allocation46_spill]] %s3045_s19 }
  0xb4   : > { %v680_v24 = vmul.f32 %v2767_v34, %v2653_v47  ;;  %v654_v48 = vmul.f32 %v4498_v59, %v2693_v30  ;;  %v675_v35 = vadd.f32 %v672_v50, %v667_v31  ;;  %v681_v6 = vmul.f32 %v2767_v34, %v2663_v37  ;;  %v4505_v31 = vld [vmem:[#allocation29_spill] sm:$0xff]  ;;  %s3060_s19 = sld [smem:[#allocation3 + $0x72]] }
  0xb5   : > { %v676_v12 = vadd.f32 %v673_v44, %v668_v19  ;;  %v650_v29 = vadd.f32 %v647_v8, %v642_v3  ;;  %v655_v60 = vmul.f32 %v4498_v59, %v2696_v13  ;;  %v677_v51 = vadd.f32 %v674_v58, %v669_v36  ;;  %s3278_s8 = sld [smem:[#allocation3 + $0x83]] }
  0xb6   : > { %v682_v47 = vmul.f32 %v2767_v34, %v2666_v63  ;;  %v651_v27 = vadd.f32 %v648_v33, %v643_v21  ;;  %v656_v62 = vmul.f32 %v4498_v59, %v2699_v32  ;;  %v683_v9 = vadd.f32 %v680_v24, %v675_v35  ;;  %4512 = sst [smem:[#allocation48_spill]] %s3056_s14 }
  0xb7   : > { %v687_v53 = vstv %s2836_s21  ;;  %v684_v37 = vadd.f32 %v681_v6, %v676_v12  ;;  %v699_v34 = vadd.f32 %v2803_v7, %v2788_v0  ;;  %v700_v42 = vadd.f32 %v2806_v18, %v2791_v4  ;;  %s3049_s21 = sld [smem:[#allocation3 + $0x89]] }
  0xb8   : > { %v685_v17 = vadd.f32 %v682_v47, %v677_v51  ;;  %v688_v20 = vmul.f32 %v687_v53, %v2693_v30  ;;  %v689_v54 = vmul.f32 %v687_v53, %v2696_v13  ;;  %v690_v63 = vmul.f32 %v687_v53, %v2699_v32  ;;  %4513 = sst [smem:[#allocation49_spill]] %s3062_s13 }
  0xb9   : > { %v701_v39 = vadd.f32 %v2861_v43, %v2798_v49  ;;  %v2995_v30 = vadd.f32 %v4502_v22, %v623_v52  ;;  %v2998_v13 = vadd.f32 %v4502_v22, %v624_v26  ;;  %v657_v61 = vadd.f32 %v654_v48, %v649_v2  ;;  %s3075_s14 = sld [smem:[#allocation3 + $0x53]] }
  0xba   : > { %v658_v32 = vadd.f32 %v655_v60, %v650_v29  ;;  %v659_v40 = vadd.f32 %v656_v62, %v651_v27  ;;  %v702_v57 = vadd.f32 %v699_v34, %v2872_v55  ;;  %v703_v11 = vadd.f32 %v700_v42, %v2879_v45  ;;  %s3201_s13 = sld [smem:[#allocation3 + $0x67]] }
  0xbb   : > { %v704_v23 = vadd.f32 %v701_v39, %v2882_v46  ;;  %v3008_v5 = vadd.f32 %v4502_v22, %v625_v25  ;;  %v691_v41 = vadd.f32 %v688_v20, %v683_v9  ;;  %v692_v52 = vadd.f32 %v689_v54, %v684_v37  ;;  %s3305_s12 = sld [smem:[#allocation3 + $0x75]] }
  0xbc   : > { %v695_v26 = vstv %s2842_s22  ;;  %v693_v8 = vadd.f32 %v690_v63, %v685_v17  ;;  %v705_v3 = vadd.f32 %v702_v57, %v2887_v14  ;;  %v706_v21 = vadd.f32 %v703_v11, %v2916_v56  ;;  %s3051_s22 = sld [smem:[#allocation3 + $0x4a]] }
  0xbd   : > { %v707_v28 = vadd.f32 %v704_v23, %v2919_v1  ;;  %v662_v19 = vadd.f32 %v4505_v31, %v657_v61  ;;  %v3020_v33 = vadd.f32 %v4505_v31, %v658_v32  ;;  %v3025_v36 = vadd.f32 %v4505_v31, %v659_v40  ;;  %4511 = sst [smem:[#allocation47_spill]] %s3049_s21 }
  0xbe   : > { %v708_v16 = vadd.f32 %v705_v3, %v2922_v10  ;;  %v709_v50 = vadd.f32 %v706_v21, %v2925_v15  ;;  %v3032_v25 = vadd.f32 %v695_v26, %v691_v41  ;;  %v3034_v2 = vadd.f32 %v695_v26, %v692_v52  ;;  %s3064_s21 = sld [smem:[#allocation3 + $0x4b]] }
  0xbf   : > { %v710_v44 = vadd.f32 %v707_v28, %v2936_v38  ;;  %v3038_v58 = vadd.f32 %v695_v26, %v693_v8  ;;  %4515 = sst [smem:[#allocation51_spill]] %s3075_s14 }
  0xc0   : > { %v711_v24 = vadd.f32 %v708_v16, %v2995_v30  ;;  %v712_v59 = vadd.f32 %v709_v50, %v2998_v13  ;;  %s3103_s14 = sld [smem:[#allocation3 + $0x73]] }
  0xc1   : > { %v713_v48 = vadd.f32 %v710_v44, %v3008_v5  ;;  %4528 = sst [smem:[#allocation64_spill]] %s3201_s13 }
  0xc2   : > { %v714_v35 = vadd.f32 %v711_v24, %v662_v19  ;;  %v715_v12 = vadd.f32 %v712_v59, %v3020_v33  ;;  %v801_v59 = vlaneseq  ;;  %s3217_s13 = sld [smem:[#allocation3 + $0x68]] }
  0xc3   : > { %v716_v6 = vadd.f32 %v713_v48, %v3025_v36  ;;  %s4546_s20 = sld [smem:[#allocation51_spill]] }
  0xc4   : > { %v717_v29 = vadd.f32 %v714_v35, %v3032_v25  ;;  %v718_v60 = vadd.f32 %v715_v12, %v3034_v2  ;;  %4514 = sst [smem:[#allocation50_spill]] %s3064_s21 }
  0xc5   : > { %v719_v51 = vadd.f32 %v716_v6, %v3038_v58  ;;  %s3089_s21 = sld [smem:[#allocation3 + $0x5b]] }
  0xc6   : > { %v720_v47 = vmul.f32 0.125, %v717_v29  ;;  %v721_v27 = vmul.f32 0.125, %v718_v60  ;;  %4517 = sst [smem:[#allocation53_spill]] %s3103_s14 }
  0xc7   : > { %v722_v62 = vmul.f32 0.125, %v719_v51  ;;  %s3130_s14 = sld [smem:[#allocation3 + $0x64]] }
  0xc8   : > { %v3067_v9 = vsub.f32 %v2788_v0, %v720_v47  ;;  %v3070_v53 = vsub.f32 %v2791_v4, %v721_v27  ;;  %v3078_v17 = vsub.f32 %v2803_v7, %v720_v47  ;;  %v3081_v20 = vsub.f32 %v2806_v18, %v721_v27  ;;  %4531 = sst [smem:[#allocation67_spill]] %s3217_s13 }
  0xc9   : > { %v3073_v37 = vsub.f32 %v2798_v49, %v722_v62  ;;  %v3084_v54 = vsub.f32 %v2861_v43, %v722_v62  ;;  %v3087_v0 = vsub.f32 %v2872_v55, %v720_v47  ;;  %v3092_v4 = vsub.f32 %v2879_v45, %v721_v27  ;;  %s3234_s13 = sld [smem:[#allocation3 + $0x69]] }
  0xca   : > { %v3095_v49 = vsub.f32 %v2882_v46, %v722_v62  ;;  %v3098_v7 = vsub.f32 %v2887_v14, %v720_v47  ;;  %v3101_v18 = vsub.f32 %v2916_v56, %v721_v27  ;;  %v3106_v43 = vsub.f32 %v2919_v1, %v722_v62  ;;  %s4545_s15 = sld [smem:[#allocation50_spill]] }
  0xcb   : > { %4516 = sst [smem:[#allocation52_spill]] %s3089_s21  ;;  %v3109_v55 = vsub.f32 %v2922_v10, %v720_v47  ;;  %v3112_v45 = vsub.f32 %v2925_v15, %v721_v27  ;;  %v3115_v46 = vsub.f32 %v2936_v38, %v722_v62  ;;  %v3120_v14 = vsub.f32 %v2995_v30, %v720_v47 }
  0xcc   : > { %s3117_s21 = sld [smem:[#allocation3 + $0x8b]]  ;;  %v3123_v56 = vsub.f32 %v2998_v13, %v721_v27  ;;  %v3126_v1 = vsub.f32 %v3008_v5, %v722_v62  ;;  %v3128_v63 = vsub.f32 %v662_v19, %v720_v47  ;;  %v747_v10 = vmul.f32 %v3067_v9, %v3067_v9 }
  0xcd   : > { %4519 = sst [smem:[#allocation55_spill]] %s3130_s14  ;;  %v748_v15 = vmul.f32 %v3070_v53, %v3070_v53  ;;  %v749_v38 = vmul.f32 %v3073_v37, %v3073_v37  ;;  %v750_v34 = vmul.f32 %v3078_v17, %v3078_v17  ;;  %v751_v42 = vmul.f32 %v3081_v20, %v3081_v20 }
  0xce   : > { %v752_v39 = vmul.f32 %v3084_v54, %v3084_v54  ;;  %v756_v22 = vmul.f32 %v3087_v0, %v3087_v0  ;;  %v757_v30 = vmul.f32 %v3092_v4, %v3092_v4  ;;  %s3150_s14 = sld [smem:[#allocation3 + $0x94]]  ;;  %v3153_v13 = vsub.f32 %v3020_v33, %v721_v27 }
  0xcf   : > { %v753_v61 = vadd.f32 %v750_v34, %v747_v10  ;;  %v758_v32 = vmul.f32 %v3095_v49, %v3095_v49  ;;  %v762_v40 = vmul.f32 %v3098_v7, %v3098_v7  ;;  %v754_v57 = vadd.f32 %v751_v42, %v748_v15  ;;  %s4547_s0 = sld [smem:[#allocation52_spill]] }
  0xd0   : > { %v755_v11 = vadd.f32 %v752_v39, %v749_v38  ;;  %v763_v23 = vmul.f32 %v3101_v18, %v3101_v18  ;;  %v764_v5 = vmul.f32 %v3106_v43, %v3106_v43  ;;  %v3168_v41 = vsub.f32 %v3025_v36, %v722_v62  ;;  %4556 = sst [smem:[#allocation50_spill]] %s3305_s12 }
  0xd1   : > { %v3171_v52 = vsub.f32 %v3032_v25, %v720_v47  ;;  %v759_v26 = vadd.f32 %v756_v22, %v753_v61  ;;  %v768_v8 = vmul.f32 %v3109_v55, %v3109_v55  ;;  %v760_v3 = vadd.f32 %v757_v30, %v754_v57  ;;  %s4565_s12 = sld [smem:[#allocation67_spill]] }
  0xd2   : > { %4518 = sst [smem:[#allocation54_spill]] %s3117_s21  ;;  %v761_v21 = vadd.f32 %v758_v32, %v755_v11  ;;  %v769_v28 = vmul.f32 %v3112_v45, %v3112_v45  ;;  %v770_v31 = vmul.f32 %v3115_v46, %v3115_v46  ;;  %v3184_v19 = vsub.f32 %v3034_v2, %v721_v27 }
  0xd3   : > { %s3140_s21 = sld [smem:[#allocation3 + $0x7c]]  ;;  %v3187_v33 = vsub.f32 %v3038_v58, %v722_v62  ;;  %v765_v36 = vadd.f32 %v762_v40, %v759_v26  ;;  %v774_v16 = vmul.f32 %v3120_v14, %v3120_v14  ;;  %v766_v50 = vadd.f32 %v763_v23, %v760_v3 }
  0xd4   : > { %4521 = sst [smem:[#allocation57_spill]] %s3150_s14  ;;  %v767_v44 = vadd.f32 %v764_v5, %v761_v21  ;;  %v775_v25 = vmul.f32 %v3123_v56, %v3123_v56  ;;  %v776_v24 = vmul.f32 %v3126_v1, %v3126_v1  ;;  %v780_v58 = vmul.f32 %v3128_v63, %v3128_v63 }
  0xd5   : > { %s3165_s14 = sld [smem:[#allocation3 + $0x7d]]  ;;  %v771_v2 = vadd.f32 %v768_v8, %v765_v36  ;;  %v772_v48 = vadd.f32 %v769_v28, %v766_v50  ;;  %v781_v12 = vmul.f32 %v3153_v13, %v3153_v13  ;;  %v782_v6 = vmul.f32 %v3168_v41, %v3168_v41 }
  0xd6   : > { %v773_v35 = vadd.f32 %v770_v31, %v767_v44  ;;  %v786_v60 = vmul.f32 %v3171_v52, %v3171_v52  ;;  %v787_v27 = vmul.f32 %v3184_v19, %v3184_v19  ;;  %v788_v62 = vmul.f32 %v3187_v33, %v3187_v33  ;;  %s4553_s10 = sld [smem:[#allocation57_spill]] }
  0xd7   : > { %v777_v29 = vadd.f32 %v774_v16, %v771_v2  ;;  %v778_v51 = vadd.f32 %v775_v25, %v772_v48  ;;  %v3219_v15 = vshrl.u32 %v801_v59, 7  ;;  %v3229_v22 = vstv %s2852_s23  ;;  %s3247_s23 = sld [smem:[#allocation3 + $0x99]] }
  0xd8   : > { %v779_v47 = vadd.f32 %v776_v24, %v773_v35  ;;  %v3232_v30 = vstv %s2858_s24  ;;  %v1072_v40 = vstv %s2869_s25  ;;  %v1076_v57 = vstv %s2876_s26  ;;  %s3251_s24 = sld [smem:[#allocation3 + $0x6a]] }
  0xd9   : > { %4520 = sst [smem:[#allocation56_spill]] %s3140_s21  ;;  %v783_v10 = vadd.f32 %v780_v58, %v777_v29  ;;  %v784_v38 = vadd.f32 %v781_v12, %v778_v51  ;;  %v3226_v39 = vadd.s32 16, %v3219_v15  ;;  %v1082_v23 = vstv %s2884_s27 }
  0xda   : > { %s3159_s21 = sld [smem:[#allocation3 + $0x65]]  ;;  %v785_v34 = vadd.f32 %v782_v6, %v779_v47  ;;  %v3242_v5 = vstv %s2889_s28  ;;  %v3245_v26 = vstv %s2895_s29  ;;  %v986_v21 = vstv %s2903_s30 }
  0xdb   : > { %4523 = sst [smem:[#allocation59_spill]] %s3165_s14  ;;  %v789_v42 = vadd.f32 %v786_v60, %v783_v10  ;;  %v790_v61 = vadd.f32 %v787_v27, %v784_v38  ;;  %v990_v28 = vstv %s2913_s3  ;;  %v996_v36 = vstv %s2927_s4 }
  0xdc   : > { %s3181_s14 = sld [smem:[#allocation3 + $0x66]]  ;;  %v791_v32 = vadd.f32 %v788_v62, %v785_v34  ;;  %v3255_v16 = vstv %s2933_s5  ;;  %v3258_v50 = vstv %s2940_s6  ;;  %v1157_v24 = vstv %s2946_s7 }
  0xdd   : > { %v792_v11 = vmul.f32 0.125, %v789_v42  ;;  %v793_v8 = vmul.f32 0.125, %v790_v61  ;;  %s3260_s28 = sld [smem:[#allocation3 + $0x82]]  ;;  %v3268_v59 = vstv %s2968_s16  ;;  %v3271_v48 = vstv %s2974_s18 }
  0xde   : > { %v794_v3 = vmul.f32 0.125, %v791_v32  ;;  %s3264_s29 = sld [smem:[#allocation3 + $0x9a]]  ;;  %v3281_v29 = vstv %s3000_s9  ;;  %v3284_v60 = vstv %s3005_s2  ;;  %v3303_v61 = vstv %s3051_s22 }
  0xdf   : > { %v795_v31 = vadd.f32 1e-05, %v792_v11  ;;  %v796_v44 = vadd.f32 1e-05, %v793_v8  ;;  %s4535_s5 = sld [smem:[#allocation43_spill]]  ;;  %vm809_vm0 = vcmp.ge.s32.totalorder %v3219_v15, 1 }
  0xe0   : > { %4522 = sst [smem:[#allocation58_spill]] %s3159_s21  ;;  %v797_v25 = vadd.f32 1e-05, %v794_v3  ;;  %vm814_vm2 = vcmp.le.s32.totalorder %v3226_v39, 16 }
  0xe1   : > { %s3175_s21 = sld [smem:[#allocation3 + $0x95]]  ;;  %2032 = vrsqrt.f32 %v795_v31  ;;  %v3316_v31 = vstv %s4545_s15 }
  0xe2   : > { %4525 = sst [smem:[#allocation61_spill]] %s3181_s14  ;;  %2034 = vrsqrt.f32 %v796_v44  ;;  %v3319_v44 = vstv %s4546_s20  ;;  %s2136_s20 = smov 1  }
  0xe3   : > { %s3197_s14 = sld [smem:[#allocation3 + $0x96]]  ;;  %2036 = vrsqrt.f32 %v797_v25 }
  0xe4   : > { %4533 = sst [smem:[#allocation69_spill]] %s3260_s28 }
  0xe5   : > { %4534 = sst [smem:[#allocation70_spill]] %s3264_s29  ;;  %v3292_v62 = vstv %s4535_s5 }
  0xe6   : > { %s4536_s6 = sld [smem:[#allocation44_spill]] }
  0xe7   : > { %4524 = sst [smem:[#allocation60_spill]] %s3175_s21 }
  0xe8   : > { %s3191_s21 = sld [smem:[#allocation3 + $0x7e]] }
  0xe9   : > { %4527 = sst [smem:[#allocation63_spill]] %s3197_s14 }
  0xea   : > { %s3211_s14 = sld [smem:[#allocation3 + $0x97]] }
  0xeb   : > { %s3273_s4 = sld [smem:[#allocation3 + $0x6b]] }
  0xec   : > { %4541 = sst [smem:[#allocation44_spill]] %s3278_s8  ;;  %v3295_v10 = vstv %s4536_s6 }
  0xed   : > { %s4542_s27 = sld [smem:[#allocation48_spill]] }
  0xee   : > { %4526 = sst [smem:[#allocation62_spill]] %s3191_s21  ;;  %v3349_v35 = vpop.eup %2032 }
  0xef   : > { %s3207_s21 = sld [smem:[#allocation3 + $0x7f]]  ;;  %v3355_v27 = vpop.eup %2034  ;;  %v839_v47 = vmul.f32 %v3349_v35, %v3078_v17  ;;  %v818_v25 = vmul.f32 %v3349_v35, %v3067_v9  ;;  %v859_v42 = vmul.f32 %v3349_v35, %v3087_v0  ;;  %v879_v38 = vmul.f32 %v3349_v35, %v3098_v7 }
  0xf0   : > { %4530 = sst [smem:[#allocation66_spill]] %s3211_s14  ;;  %v3365_v12 = vpop.eup %2036  ;;  %v840_v3 = vmul.f32 %v3355_v27, %v3081_v20  ;;  %v819_v2 = vmul.f32 %v3355_v27, %v3070_v53  ;;  %v860_v17 = vmul.f32 %v3355_v27, %v3092_v4  ;;  %v880_v9 = vmul.f32 %v3355_v27, %v3101_v18 }
  0xf1   : > { %s3223_s14 = sld [smem:[#allocation3 + $0x98]]  ;;  %v841_v0 = vmul.f32 %v3365_v12, %v3084_v54  ;;  %v844_v58 = vmul.f32 %v3229_v22, %v839_v47  ;;  %v820_v7 = vmul.f32 %v3365_v12, %v3073_v37  ;;  %v823_v11 = vmul.f32 %v3242_v5, %v818_v25 }
  0xf2   : > { %4537 = sst [smem:[#allocation43_spill]] %s3273_s4  ;;  %v845_v20 = vmul.f32 %v3229_v22, %v840_v3  ;;  %v824_v53 = vmul.f32 %v3242_v5, %v819_v2  ;;  %v861_v4 = vmul.f32 %v3365_v12, %v3095_v49  ;;  %v865_v34 = vmul.f32 %v3255_v16, %v860_v17 }
  0xf3   : > { %s4543_s16 = sld [smem:[#allocation49_spill]]  ;;  %v3308_v32 = vstv %s4542_s27  ;;  %v846_v18 = vmul.f32 %v3229_v22, %v841_v0  ;;  %v849_v54 = vadd.f32 %v3232_v30, %v844_v58  ;;  %v825_v47 = vmul.f32 %v3242_v5, %v820_v7 }
  0xf4   : > { %s3287_s18 = sld [smem:[#allocation3 + $0x9b]]  ;;  %v828_v6 = vadd.f32 %v3245_v26, %v823_v11  ;;  %v850_v37 = vadd.f32 %v3232_v30, %v845_v20  ;;  %v829_v25 = vadd.f32 %v3245_v26, %v824_v53  ;;  %v866_v3 = vmul.f32 %v3255_v16, %v861_v4 }
  0xf5   : > { %4529 = sst [smem:[#allocation65_spill]] %s3207_s21  ;;  %v870_v2 = vadd.f32 %v3258_v50, %v865_v34  ;;  %v851_v49 = vadd.f32 %v3232_v30, %v846_v18  ;;  %v852_v17 = vsel %vm809_vm0, %v849_v54, 0.0  ;;  %v830_v22 = vadd.f32 %v3245_v26, %v825_v47 }
  0xf6   : > { %s3221_s21 = sld [smem:[#allocation3 + $0x80]]  ;;  %v831_v5 = vsel %vm809_vm0, %v828_v6, 0.0  ;;  %856 = vst.msk [vmem:[#allocation2 + $0x18] sm:$0xff] %vm834_vm1, %v852_v17  ;;  %857 = vst.msk [vmem:[#allocation2 + $0x20] sm:$0xff] %vm834_vm1, %v850_v37  ;;  %v871_v58 = vadd.f32 %v3258_v50, %v866_v3  ;;  %v864_v30 = vmul.f32 %v3255_v16, %v859_v42  ;;  %v881_v26 = vmul.f32 %v3365_v12, %v3106_v43 }
  0xf7   : > { %4532 = sst [smem:[#allocation68_spill]] %s3223_s14  ;;  %835 = vst.msk [vmem:[#allocation2] sm:$0xff] %vm834_vm1, %v831_v5  ;;  %836 = vst.msk [vmem:[#allocation2 + $0x8] sm:$0xff] %vm834_vm1, %v829_v25  ;;  %v885_v34 = vmul.f32 %v3268_v59, %v880_v9  ;;  %v854_v6 = vsel %vm814_vm2, %v851_v49, 0.0  ;;  %v833_v11 = vsel %vm814_vm2, %v830_v22, 0.0  ;;  %v884_v0 = vmul.f32 %v3268_v59, %v879_v38 }
  0xf8   : > { %s3238_s14 = sld [smem:[#allocation3 + $0x81]]  ;;  %877 = vst.msk [vmem:[#allocation2 + $0x38] sm:$0xff] %vm834_vm1, %v870_v2  ;;  %v900_v7 = vmul.f32 %v3355_v27, %v3112_v45  ;;  %v874_v43 = vsel %vm814_vm2, %v871_v58, 0.0  ;;  %v869_v16 = vadd.f32 %v3258_v50, %v864_v30  ;;  %v886_v42 = vmul.f32 %v3268_v59, %v881_v26 }
  0xf9   : > { %s3297_s9 = sld [smem:[#allocation3 + $0x5d]]  ;;  %858 = vst.msk [vmem:[#allocation2 + $0x28] sm:$0x3] %vm837_vm3, %v854_v6  ;;  %838 = vst.msk [vmem:[#allocation2 + $0x10] sm:$0x3] %vm837_vm3, %v833_v11  ;;  %v890_v9 = vadd.f32 %v3271_v48, %v885_v34  ;;  %v889_v38 = vadd.f32 %v3271_v48, %v884_v0  ;;  %v901_v45 = vmul.f32 %v3365_v12, %v3115_v46 }
  0xfa   : > { %4544 = sst [smem:[#allocation48_spill]] %s3287_s18  ;;  %878 = vst.msk [vmem:[#allocation2 + $0x40] sm:$0x3] %vm837_vm3, %v874_v43  ;;  %v905_v20 = vmul.f32 %v3281_v29, %v900_v7  ;;  %v899_v53 = vmul.f32 %v3349_v35, %v3109_v55  ;;  %v872_v4 = vsel %vm809_vm0, %v869_v16, 0.0  ;;  %v891_v50 = vadd.f32 %v3271_v48, %v886_v42 }
  0xfb   : > { %s4551_s25 = sld [smem:[#allocation55_spill]]  ;;  %897 = vst.msk [vmem:[#allocation2 + $0x50] sm:$0xff] %vm834_vm1, %v890_v9  ;;  %v920_v59 = vmul.f32 %v3355_v27, %v3123_v56  ;;  %v921_v18 = vmul.f32 %v3365_v12, %v3126_v1  ;;  %876 = vst.msk [vmem:[#allocation2 + $0x30] sm:$0xff] %vm834_vm1, %v872_v4  ;;  %v892_v46 = vsel %vm809_vm0, %v889_v38, 0.0  ;;  %v906_v55 = vmul.f32 %v3281_v29, %v901_v45 }
  0xfc   : > { %s4552_s2 = sld [smem:[#allocation56_spill]]  ;;  %v910_v54 = vadd.f32 %v3284_v60, %v905_v20  ;;  %v904_v47 = vmul.f32 %v3281_v29, %v899_v53  ;;  %v894_v48 = vsel %vm814_vm2, %v891_v50, 0.0  ;;  %896 = vst.msk [vmem:[#allocation2 + $0x48] sm:$0xff] %vm834_vm1, %v892_v46  ;;  %v3454_v37 = vmul.f32 %v3349_v35, %v3120_v14 }
  0xfd   : > { %s4554_s18 = sld [smem:[#allocation58_spill]]  ;;  %v925_v56 = vmul.f32 %v3292_v62, %v920_v59  ;;  %v3450_v1 = vmul.f32 %v3292_v62, %v921_v18  ;;  %v3456_v25 = vld [vmem:[#allocation2 + $0x18] sm:$0xff]  ;;  %v3458_v29 = vld [vmem:[#allocation2 + $0x20] sm:$0xff]  ;;  %898 = vst.msk [vmem:[#allocation2 + $0x58] sm:$0x3] %vm837_vm3, %v894_v48  ;;  %v911_v2 = vadd.f32 %v3284_v60, %v906_v55  ;;  %v3468_v14 = vmul.f32 %v3355_v27, %v3153_v13 }
  0xfe   : > { %s4555_s11 = sld [smem:[#allocation59_spill]]  ;;  %v3460_v3 = vld [vmem:[#allocation2 + $0x19] sm:$0xff]  ;;  %917 = vst.msk [vmem:[#allocation2 + $0x68] sm:$0xff] %vm834_vm1, %v910_v54  ;;  %v909_v49 = vadd.f32 %v3284_v60, %v904_v47  ;;  %v3472_v17 = vmul.f32 %v3365_v12, %v3168_v41  ;;  %v1073_v5 = vmul.f32 %v1072_v40, %v3456_v25  ;;  %v1074_v58 = vmul.f32 %v1072_v40, %v3458_v29  ;;  %v3487_v13 = vld [vmem:[#allocation2 + $0x8] sm:$0xff] }
  0xff   : > { %4550 = sst [smem:[#allocation49_spill]] %s3297_s9  ;;  %v3474_v22 = vld [vmem:[#allocation2 + $0x1a] sm:$0xff]  ;;  %v1077_v60 = vmul.f32 %v1076_v57, %v3460_v3  ;;  %v930_v41 = vadd.f32 %v3295_v10, %v925_v56  ;;  %v988_v0 = vmul.f32 %v986_v21, %v3487_v13  ;;  %v914_v7 = vsel %vm814_vm2, %v911_v2, 0.0  ;;  %v3515_v38 = vld [vmem:[#allocation2 + $0x2] sm:$0xff] }
 0x100   : > { %s4557_s5 = sld [smem:[#allocation60_spill]]  ;;  %v3485_v30 = vld [vmem:[#allocation2] sm:$0xff]  ;;  %v1083_v6 = vmul.f32 %v1082_v23, %v3474_v22  ;;  %v3513_v9 = vld [vmem:[#allocation2 + $0x9] sm:$0xff]  ;;  %918 = vst.msk [vmem:[#allocation2 + $0x70] sm:$0x3] %vm837_vm3, %v914_v7  ;;  %v3533_v53 = vld [vmem:[#allocation2 + $0x38] sm:$0xff] }
 0x101   : > { %s4558_s6 = sld [smem:[#allocation61_spill]]  ;;  %v3490_v26 = vld [vmem:[#allocation2 + $0x21] sm:$0xff]  ;;  %v987_v11 = vmul.f32 %v986_v21, %v3485_v30  ;;  %v1079_v16 = vadd.f32 %v1077_v60, %v1073_v5  ;;  %v3517_v45 = vld [vmem:[#allocation2 + $0xa] sm:$0xff]  ;;  %937 = vst.msk [vmem:[#allocation2 + $0x80] sm:$0xff] %vm834_vm1, %v930_v41  ;;  %4581 = vst [vmem:[#allocation26_spill] sm:$0xff] %v3533_v53  ;;  %v912_v59 = vsel %vm809_vm0, %v909_v49, 0.0  ;;  %v1159_v55 = vmul.f32 %v1157_v24, %v3533_v53 }
 0x102   : > { %s4559_s8 = sld [smem:[#allocation62_spill]]  ;;  %v3492_v34 = vld [vmem:[#allocation2 + $0x22] sm:$0xff]  ;;  %v1078_v43 = vmul.f32 %v1076_v57, %v3490_v26  ;;  %4578 = vst [vmem:[#allocation24_spill] sm:$0xff] %v3517_v45  ;;  %v992_v57 = vmul.f32 %v990_v28, %v3513_v9  ;;  %v998_v20 = vmul.f32 %v996_v36, %v3517_v45  ;;  %v3535_v4 = vld [vmem:[#allocation2 + $0x39] sm:$0xff]  ;;  %v3544_v54 = vld [vmem:[#allocation2 + $0x30] sm:$0xff] }
 0x103   : > { %s4560_s9 = sld [smem:[#allocation63_spill]]  ;;  %v3497_v40 = vld [vmem:[#allocation2 + $0x1] sm:$0xff]  ;;  %v1084_v42 = vmul.f32 %v1082_v23, %v3492_v34  ;;  %v997_v23 = vmul.f32 %v996_v36, %v3515_v38  ;;  %4582 = vst [vmem:[#allocation23_spill] sm:$0xff] %v3535_v4  ;;  %v1085_v18 = vadd.f32 %v1083_v6, %v1079_v16  ;;  %4584 = vst [vmem:[#allocation30_spill] sm:$0xff] %v3544_v54  ;;  %v3546_v36 = vld [vmem:[#allocation2 + $0x31] sm:$0xff] }
 0x104   : > { %s3313_s3 = sld [smem:[#allocation3 + $0x8d]]  ;;  %v991_v21 = vmul.f32 %v990_v28, %v3497_v40  ;;  %v3537_v50 = vld [vmem:[#allocation2 + $0x3a] sm:$0xff]  ;;  %v1080_v46 = vadd.f32 %v1078_v43, %v1074_v58  ;;  %4585 = vst [vmem:[#allocation31_spill] sm:$0xff] %v3546_v36  ;;  %v3548_v47 = vld [vmem:[#allocation2 + $0x32] sm:$0xff]  ;;  %916 = vst.msk [vmem:[#allocation2 + $0x60] sm:$0xff] %vm834_vm1, %v912_v59  ;;  %v994_v48 = vadd.f32 %v992_v57, %v988_v0 }
 0x105   : > { %s4562_s30 = sld [smem:[#allocation64_spill]]  ;;  %4583 = vst [vmem:[#allocation27_spill] sm:$0xff] %v3537_v50  ;;  %v1158_v58 = vmul.f32 %v1157_v24, %v3544_v54  ;;  %v3560_v60 = vld [vmem:[#allocation2 + $0x50] sm:$0xff]  ;;  %v3562_v41 = vld [vmem:[#allocation2 + $0x48] sm:$0xff]  ;;  %1121 = vrot.lane.b32.xlu1 %v1085_v18, %s2136_s20 }
 0x106   : > { %s4563_s7 = sld [smem:[#allocation65_spill]]  ;;  %v993_v28 = vadd.f32 %v991_v21, %v987_v11  ;;  %4590 = vst [vmem:[#allocation28_spill] sm:$0xff] %v3560_v60  ;;  %4591 = vst [vmem:[#allocation25_spill] sm:$0xff] %v3562_v41  ;;  %v3564_v6 = vld [vmem:[#allocation2 + $0x49] sm:$0xff]  ;;  %v1086_v0 = vadd.f32 %v1084_v42, %v1080_v46  ;;  %v3573_v21 = vld [vmem:[#allocation2 + $0x51] sm:$0xff] }
 0x107   : > { %s4564_s22 = sld [smem:[#allocation66_spill]]  ;;  %4592 = vst [vmem:[#allocation29_spill] sm:$0xff] %v3564_v6  ;;  %4596 = vst [vmem:[#allocation71_spill] sm:$0xff] %v3573_v21  ;;  %v3575_v57 = vld [vmem:[#allocation2 + $0x52] sm:$0xff]  ;;  %v3577_v59 = vld [vmem:[#allocation2 + $0x4a] sm:$0xff] }
 0x108   : > { %s4566_s27 = sld [smem:[#allocation68_spill]]  ;;  %v999_v11 = vadd.f32 %v997_v23, %v993_v28  ;;  %4597 = vst [vmem:[#allocation72_spill] sm:$0xff] %v3575_v57  ;;  %4598 = vst [vmem:[#allocation73_spill] sm:$0xff] %v3577_v59 }
 0x109   : > { %s4579_s26 = sld [smem:[#allocation35_spill]]  ;;  %1123 = vrot.lane.b32.xlu1 %v1086_v0, %s2136_s20  ;;  %v931_v0 = vadd.f32 %v3295_v10, %v3450_v1 }
 0x10a   : > { %4561 = sst [smem:[#allocation51_spill]] %s3313_s3  ;;  %1035 = vrot.lane.b32.xlu0 %v999_v11, %s2136_s20  ;;  %v3602_v11 = vld [vmem:[#allocation2 + $0x6a] sm:$0xff] }
 0x10b   : > { %s4580_s1 = sld [smem:[#allocation36_spill]]  ;;  %4611 = vst [vmem:[#allocation76_spill] sm:$0xff] %v3602_v11 }
 0x10c   : > { %s4588_s4 = sld [smem:[#allocation37_spill]] }
 0x10d   : > { %s4589_s15 = sld [smem:[#allocation38_spill]] }
 0x10e   : > { %s4593_s29 = sld [smem:[#allocation39_spill]] }
 0x10f   : > { %v4586_v56 = vstv %s4579_s26  ;;  %s4599_s3 = sld [smem:[#allocation40_spill]] }
 0x110   : > { %v1163_v2 = vmul.f32 %v4586_v56, %v3535_v4  ;;  %v4594_v7 = vmov %v4586_v56  ;;  %v1000_v56 = vadd.f32 %v998_v20, %v994_v48  ;;  %s4603_s26 = sld [smem:[#allocation41_spill]] }
 0x111   : > { %v4587_v49 = vstv %s4580_s1  ;;  %v1162_v43 = vmul.f32 %v4594_v7, %v3546_v36  ;;  %s4604_s1 = sld [smem:[#allocation42_spill]] }
 0x112   : > { %v1169_v5 = vmul.f32 %v4587_v49, %v3537_v50  ;;  %v4595_v24 = vmov %v4587_v49  ;;  %v1165_v18 = vadd.f32 %v1163_v2, %v1159_v55  ;;  %v4600_v23 = vstv %s4588_s4  ;;  %v3585_v49 = vld [vmem:[#allocation2 + $0x68] sm:$0xff]  ;;  %s4609_s28 = sld [smem:[#allocation45_spill]]  ;;  %1037 = vrot.lane.b32.xlu0 %v1000_v56, %s2136_s20 }
 0x113   : > { %v1168_v16 = vmul.f32 %v4595_v24, %v3548_v47  ;;  %v1244_v28 = vmul.f32 %v4600_v23, %v3560_v60  ;;  %v4601_v42 = vstv %s4589_s15  ;;  %4602 = vst [vmem:[#allocation74_spill] sm:$0xff] %v3585_v49  ;;  %v1164_v7 = vadd.f32 %v1162_v43, %v1158_v58  ;;  %v3600_v60 = vld [vmem:[#allocation2 + $0x69] sm:$0xff]  ;;  %s4625_s4 = sld [smem:[#allocation47_spill]] }
 0x114   : > { %v1248_v46 = vmul.f32 %v4601_v42, %v3573_v21  ;;  %v4605_v24 = vstv %s4593_s29  ;;  %v4606_v51 = vmov %v4600_v23  ;;  %v4607_v55 = vmov %v4601_v42  ;;  %4610 = vst [vmem:[#allocation75_spill] sm:$0xff] %v3600_v60  ;;  %s4624_s29 = sld [smem:[#allocation46_spill]] }
 0x115   : > { %v1254_v8 = vmul.f32 %v4605_v24, %v3575_v57  ;;  %v1243_v20 = vmul.f32 %v4606_v51, %v3562_v41  ;;  %v1247_v48 = vmul.f32 %v4607_v55, %v3564_v6  ;;  %v1171_v2 = vadd.f32 %v1169_v5, %v1165_v18  ;;  %v3618_v6 = vld [vmem:[#allocation2 + $0x61] sm:$0xff]  ;;  %s4037_s15 = sld [smem:[#allocation3 + $0x79]] }
 0x116   : > { %v1250_v23 = vadd.f32 %v1248_v46, %v1244_v28  ;;  %v4608_v42 = vmov %v4605_v24  ;;  %v4612_v58 = vstv %s4599_s3  ;;  %v3607_v24 = vld [vmem:[#allocation2 + $0x80] sm:$0xff]  ;;  %v1170_v51 = vadd.f32 %v1168_v16, %v1164_v7 }
 0x117   : > { %v1253_v21 = vmul.f32 %v4608_v42, %v3577_v59  ;;  %v1329_v43 = vmul.f32 %v4612_v58, %v3585_v49  ;;  %4613 = vst [vmem:[#allocation77_spill] sm:$0xff] %v3607_v24  ;;  %v1249_v5 = vadd.f32 %v1247_v48, %v1243_v20  ;;  %v4614_v18 = vstv %s4603_s26  ;;  %v3616_v59 = vld [vmem:[#allocation2 + $0x60] sm:$0xff]  ;;  %1208 = vrot.lane.b32.xlu1 %v1171_v2, %s2136_s20 }
 0x118   : > { %v1333_v28 = vmul.f32 %v4614_v18, %v3600_v60  ;;  %v4615_v46 = vstv %s4604_s1  ;;  %v1256_v42 = vadd.f32 %v1254_v8, %v1250_v23  ;;  %v3620_v58 = vld [vmem:[#allocation2 + $0x62] sm:$0xff]  ;;  %v4616_v16 = vstv %s4609_s28  ;;  %1206 = vrot.lane.b32.xlu0 %v1170_v51, %s2136_s20 }
 0x119   : > { %v1339_v55 = vmul.f32 %v4615_v46, %v3602_v11  ;;  %v3627_v7 = vmul.f32 %v4616_v16, %v3607_v24  ;;  %v924_v20 = vmul.f32 %v3292_v62, %v3454_v37  ;;  %v1255_v48 = vadd.f32 %v1253_v21, %v1249_v5 }
 0x11a   : > { %v1335_v8 = vadd.f32 %v1333_v28, %v1329_v43  ;;  %v4617_v23 = vstv %s4599_s3  ;;  %v4618_v46 = vstv %s4603_s26  ;;  %v4619_v60 = vstv %s4604_s1  ;;  %s4051_s3 = sld [smem:[#allocation3 + $0x62]] }
 0x11b   : > { %v1328_v18 = vmul.f32 %v4617_v23, %v3616_v59  ;;  %v1332_v11 = vmul.f32 %v4618_v46, %v3618_v6  ;;  %v1338_v1 = vmul.f32 %v4619_v60, %v3620_v58  ;;  %v934_v16 = vsel %vm814_vm2, %v931_v0, 0.0  ;;  %1293 = vrot.lane.b32.xlu1 %v1256_v42, %s2136_s20  ;;  %s4056_s26 = sld [smem:[#allocation3 + $0x7a]] }
 0x11c   : > { %v929_v24 = vadd.f32 %v3295_v10, %v924_v20  ;;  %v945_v62 = vmul.f32 %v3303_v61, %v3468_v14  ;;  %v1341_v37 = vadd.f32 %v1339_v55, %v1335_v8  ;;  %938 = vst.msk [vmem:[#allocation2 + $0x88] sm:$0x3] %vm837_vm3, %v934_v16  ;;  %v946_v56 = vmul.f32 %v3303_v61, %v3472_v17  ;;  %s4065_s1 = sld [smem:[#allocation3 + $0x92]] }
 0x11d   : > { %v1334_v21 = vadd.f32 %v1332_v11, %v1328_v18  ;;  %v939_v60 = vmul.f32 %v3349_v35, %v3128_v63  ;;  %v960_v14 = vmul.f32 %v3355_v27, %v3184_v19  ;;  %v961_v2 = vmul.f32 %v3365_v12, %v3187_v33  ;;  %1291 = vrot.lane.b32.xlu0 %v1255_v48, %s2136_s20 }
 0x11e   : > { %v932_v10 = vsel %vm809_vm0, %v929_v24, 0.0  ;;  %v950_v43 = vadd.f32 %v3308_v32, %v945_v62  ;;  %v951_v17 = vadd.f32 %v3308_v32, %v946_v56  ;;  %v959_v24 = vmul.f32 %v3349_v35, %v3171_v52 }
 0x11f   : > { %v1340_v11 = vadd.f32 %v1338_v1, %v1334_v21  ;;  %936 = vst.msk [vmem:[#allocation2 + $0x78] sm:$0xff] %vm834_vm1, %v932_v10  ;;  %v944_v63 = vmul.f32 %v3303_v61, %v939_v60  ;;  %v965_v19 = vmul.f32 %v3316_v31, %v960_v14  ;;  %v966_v33 = vmul.f32 %v3316_v31, %v961_v2 }
 0x120   : > { %957 = vst.msk [vmem:[#allocation2 + $0x98] sm:$0xff] %vm834_vm1, %v950_v43  ;;  %v4620_v12 = vstv %s4551_s25  ;;  %v4621_v51 = vstv %s4552_s2  ;;  %v954_v61 = vsel %vm814_vm2, %v951_v17, 0.0  ;;  %v964_v35 = vmul.f32 %v3316_v31, %v959_v24  ;;  %1378 = vrot.lane.b32.xlu1 %v1341_v37, %s2136_s20  ;;  %s4645_s25 = sld [smem:[#allocation53_spill]] }
 0x121   : > { %v1020_v27 = vmul.f32 %v4620_v12, %v3487_v13  ;;  %v1024_v5 = vmul.f32 %v4621_v51, %v3513_v9  ;;  %v949_v52 = vadd.f32 %v3308_v32, %v944_v63  ;;  %v4622_v28 = vstv %s4553_s10  ;;  %958 = vst.msk [vmem:[#allocation2 + $0xa0] sm:$0x3] %vm837_vm3, %v954_v61  ;;  %1376 = vrot.lane.b32.xlu0 %v1340_v11, %s2136_s20  ;;  %s4646_s10 = sld [smem:[#allocation54_spill]] }
 0x122   : > { %v1030_v55 = vmul.f32 %v4622_v28, %v3517_v45  ;;  %v970_v0 = vadd.f32 %v3319_v44, %v965_v19  ;;  %v971_v20 = vadd.f32 %v3319_v44, %v966_v33  ;;  %v4623_v42 = vmov %v4620_v12  ;;  %s3994_s2 = sld [smem:[#allocation3 + $0x8f]] }
 0x123   : > { %v1026_v8 = vadd.f32 %v1024_v5, %v1020_v27  ;;  %v1019_v23 = vmul.f32 %v4623_v42, %v3485_v30  ;;  %v952_v32 = vsel %vm809_vm0, %v949_v52, 0.0  ;;  %v969_v31 = vadd.f32 %v3319_v44, %v964_v35  ;;  %v3698_v62 = vld [vmem:[#allocation2 + $0x81] sm:$0xff] }
 0x124   : > { %v4626_v18 = vmov %v4621_v51  ;;  %v4627_v1 = vmov %v4622_v28  ;;  %v3700_v21 = vld [vmem:[#allocation2 + $0x82] sm:$0xff]  ;;  %956 = vst.msk [vmem:[#allocation2 + $0x90] sm:$0xff] %vm834_vm1, %v952_v32  ;;  %v974_v48 = vsel %vm814_vm2, %v971_v20, 0.0  ;;  %977 = vst.msk [vmem:[#allocation2 + $0xb0] sm:$0xff] %vm834_vm1, %v970_v0  ;;  %v4628_v56 = vstv %s4554_s18  ;;  %s3981_s18 = sld [smem:[#allocation3 + $0x5f]] }
 0x125   : > { %v1023_v46 = vmul.f32 %v4626_v18, %v3497_v40  ;;  %v1029_v16 = vmul.f32 %v4627_v1, %v3515_v38  ;;  %v3706_v44 = vadd.f32 %v1030_v55, %v1026_v8  ;;  %v1106_v60 = vmul.f32 %v4628_v56, %v3458_v29  ;;  %978 = vst.msk [vmem:[#allocation2 + $0xb8] sm:$0x3] %vm837_vm3, %v974_v48 }
 0x126   : > { %v4629_v10 = vstv %s4555_s11  ;;  %v4630_v14 = vstv %s4624_s29  ;;  %v4631_v2 = vstv %s4625_s4  ;;  %v972_v63 = vsel %vm809_vm0, %v969_v31, 0.0  ;;  %v3724_v19 = vld [vmem:[#allocation2 + $0x78] sm:$0xff]  ;;  %s4687_s11 = sld [smem:[#allocation43_spill]] }
 0x127   : > { %v1110_v43 = vmul.f32 %v4629_v10, %v3490_v26  ;;  %v1418_v39 = vmul.f32 %v4630_v14, %v3698_v62  ;;  %v1424_v17 = vmul.f32 %v4631_v2, %v3700_v21  ;;  %v1025_v24 = vadd.f32 %v1023_v46, %v1019_v23  ;;  %v3726_v33 = vld [vmem:[#allocation2 + $0x79] sm:$0xff]  ;;  %976 = vst.msk [vmem:[#allocation2 + $0xa8] sm:$0xff] %vm834_vm1, %v972_v63  ;;  %s4076_s29 = sld [smem:[#allocation3 + $0x63]] }
 0x128   : > { %v3728_v37 = vld [vmem:[#allocation2 + $0x7a] sm:$0xff]  ;;  %v4632_v27 = vstv %s4557_s5  ;;  %v4633_v5 = vmov %v4628_v56  ;;  %v4634_v15 = vmov %v4629_v10  ;;  %v4635_v28 = vstv %s4609_s28  ;;  %s3948_s28 = sld [smem:[#allocation3 + $0x76]] }
 0x129   : > { %v1112_v12 = vadd.f32 %v1110_v43, %v1106_v60  ;;  %v1116_v51 = vmul.f32 %v4632_v27, %v3492_v34  ;;  %v1105_v61 = vmul.f32 %v4633_v5, %v3456_v25  ;;  %v1109_v52 = vmul.f32 %v4634_v15, %v3460_v3  ;;  %v3751_v23 = vld [vmem:[#allocation2 + $0x98] sm:$0xff]  ;;  %s4007_s5 = sld [smem:[#allocation3 + $0x60]] }
 0x12a   : > { %v1420_v35 = vadd.f32 %v1418_v39, %v3627_v7  ;;  %v1413_v55 = vmul.f32 %v4635_v28, %v3724_v19  ;;  %v4636_v0 = vmov %v4630_v14  ;;  %v4637_v8 = vmov %v4631_v2  ;;  %v3760_v48 = vld [vmem:[#allocation2 + $0x99] sm:$0xff]  ;;  %s4083_s4 = sld [smem:[#allocation3 + $0x7b]] }
 0x12b   : > { %v1417_v20 = vmul.f32 %v4636_v0, %v3726_v33  ;;  %v1423_v42 = vmul.f32 %v4637_v8, %v3728_v37  ;;  %v4638_v32 = vstv %s3058_s17  ;;  %v3756_v31 = vadd.f32 %v1029_v16, %v1025_v24  ;;  %v3762_v56 = vld [vmem:[#allocation2 + $0x9a] sm:$0xff]  ;;  %v3783_v5 = vld [vmem:[#allocation2 + $0x90] sm:$0xff]  ;;  %s4688_s17 = sld [smem:[#allocation44_spill]] }
 0x12c   : > { %v1499_v11 = vmul.f32 %v4638_v32, %v3751_v23  ;;  %v3758_v7 = vadd.f32 %v1116_v51, %v1112_v12  ;;  %v1111_v18 = vadd.f32 %v1109_v52, %v1105_v61  ;;  %v1426_v46 = vadd.f32 %v1424_v17, %v1420_v35  ;;  %v3785_v61 = vld [vmem:[#allocation2 + $0x91] sm:$0xff] }
 0x12d   : > { %v1419_v1 = vadd.f32 %v1417_v20, %v1413_v55  ;;  %v4639_v60 = vmov %v4632_v27  ;;  %v4640_v43 = vstv %s4558_s6  ;;  %v4641_v14 = vstv %s3060_s19  ;;  %v3787_v15 = vld [vmem:[#allocation2 + $0x92] sm:$0xff]  ;;  %s3935_s19 = sld [smem:[#allocation3 + $0x5e]] }
 0x12e   : > { %v1115_v10 = vmul.f32 %v4639_v60, %v3474_v22  ;;  %v1191_v16 = vmul.f32 %v4640_v43, %v3533_v53  ;;  %v1503_v39 = vmul.f32 %v4641_v14, %v3760_v48  ;;  %v4642_v2 = vstv %s4543_s16  ;;  %1463 = vrot.lane.b32.xlu1 %v1426_v46, %s2136_s20  ;;  %s3958_s16 = sld [smem:[#allocation3 + $0x8e]] }
 0x12f   : > { %v1509_v17 = vmul.f32 %v4642_v2, %v3762_v56  ;;  %v4643_v63 = vstv %s4559_s8  ;;  %v4644_v12 = vstv %s4560_s9  ;;  %v1425_v51 = vadd.f32 %v1423_v42, %v1419_v1  ;;  %s4682_s8 = sld [smem:[#allocation70_spill]] }
 0x130   : > { %v1195_v24 = vmul.f32 %v4643_v63, %v3535_v4  ;;  %v1201_v27 = vmul.f32 %v4644_v12, %v3537_v50  ;;  %v3789_v52 = vadd.f32 %v1115_v10, %v1111_v18  ;;  %v4647_v35 = vmov %v4640_v43  ;;  %v3806_v18 = vld [vmem:[#allocation2 + $0xb0] sm:$0xff]  ;;  %s4015_s6 = sld [smem:[#allocation3 + $0x78]] }
 0x131   : > { %v1190_v28 = vmul.f32 %v4647_v35, %v3544_v54  ;;  %v4648_v55 = vmov %v4643_v63  ;;  %v1505_v20 = vadd.f32 %v1503_v39, %v1499_v11  ;;  %v4649_v8 = vmov %v4638_v32  ;;  %v3808_v10 = vld [vmem:[#allocation2 + $0xb1] sm:$0xff]  ;;  %1461 = vrot.lane.b32.xlu0 %v1425_v51, %s2136_s20  ;;  %v3822_v35 = vld [vmem:[#allocation2 + $0xa8] sm:$0xff] }
 0x132   : > { %v1194_v0 = vmul.f32 %v4648_v55, %v3546_v36  ;;  %v1498_v42 = vmul.f32 %v4649_v8, %v3783_v5  ;;  %v4650_v32 = vmov %v4641_v14  ;;  %v4651_v1 = vmov %v4642_v2  ;;  %v3810_v43 = vld [vmem:[#allocation2 + $0xb2] sm:$0xff]  ;;  %4656 = vst [vmem:[#allocation79_spill] sm:$0xff] %v3822_v35  ;;  %v3824_v55 = vld [vmem:[#allocation2 + $0xa9] sm:$0xff] }
 0x133   : > { %v1502_v46 = vmul.f32 %v4650_v32, %v3785_v61  ;;  %v1508_v60 = vmul.f32 %v4651_v1, %v3787_v15  ;;  %4652 = vst [vmem:[#allocation78_spill] sm:$0xff] %v3810_v43  ;;  %v4653_v11 = vstv %s4547_s0  ;;  %v4654_v39 = vstv %s4645_s25  ;;  %v3826_v8 = vld [vmem:[#allocation2 + $0xaa] sm:$0xff]  ;;  %s3902_s0 = sld [smem:[#allocation3 + $0x74]] }
 0x134   : > { %v1584_v14 = vmul.f32 %v4653_v11, %v3806_v18  ;;  %v1588_v2 = vmul.f32 %v4654_v39, %v3808_v10  ;;  %v4655_v63 = vstv %s4646_s10  ;;  %v1197_v32 = vadd.f32 %v1195_v24, %v1191_v16 }
 0x135   : > { %v1594_v12 = vmul.f32 %v4655_v63, %v3810_v43  ;;  %v1511_v51 = vadd.f32 %v1509_v17, %v1505_v20  ;;  %v1504_v1 = vadd.f32 %v1502_v46, %v1498_v42  ;;  %v1583_v39 = vmul.f32 %v4653_v11, %v3822_v35  ;;  %v4666_v11 = vld [vmem:[#allocation29_spill] sm:$0xff] }
 0x136   : > { %v4657_v36 = vstv %s4645_s25  ;;  %v1590_v54 = vadd.f32 %v1588_v2, %v1584_v14  ;;  %v4658_v50 = vstv %s4646_s10  ;;  %v3837_v53 = vadd.f32 %v1201_v27, %v1197_v32  ;;  %s4091_s25 = sld [smem:[#allocation3 + $0x93]] }
 0x137   : > { %v1587_v63 = vmul.f32 %v4657_v36, %v3824_v55  ;;  %v1593_v4 = vmul.f32 %v4658_v50, %v3826_v8  ;;  %v1196_v45 = vadd.f32 %v1194_v0, %v1190_v28  ;;  %1548 = vrot.lane.b32.xlu1 %v1511_v51, %s2136_s20  ;;  %v1510_v16 = vadd.f32 %v1508_v60, %v1504_v1  ;;  %v4660_v36 = vld [vmem:[#allocation28_spill] sm:$0xff]  ;;  %s4724_s10 = sld [smem:[#allocation10_spill]] }
 0x138   : > { %v4659_v24 = vstv %s4560_s9  ;;  %v4661_v42 = vstv %s4562_s30  ;;  %v1596_v14 = vadd.f32 %v1594_v12, %v1590_v54  ;;  %v4662_v50 = vld [vmem:[#allocation71_spill] sm:$0xff]  ;;  %v4663_v2 = vstv %s4563_s7  ;;  %s3891_s30 = sld [smem:[#allocation3 + $0x5c]] }
 0x139   : > { %v1589_v17 = vadd.f32 %v1587_v63, %v1583_v39  ;;  %v1200_v20 = vmul.f32 %v4659_v24, %v3548_v47  ;;  %v1276_v46 = vmul.f32 %v4661_v42, %v4660_v36  ;;  %v1280_v27 = vmul.f32 %v4663_v2, %v4662_v50  ;;  %1546 = vrot.lane.b32.xlu0 %v1510_v16, %s2136_s20  ;;  %v4668_v39 = vld [vmem:[#allocation73_spill] sm:$0xff]  ;;  %v4673_v16 = vld [vmem:[#allocation76_spill] sm:$0xff]  ;;  %s4681_s7 = sld [smem:[#allocation69_spill]] }
 0x13a   : > { %v4664_v28 = vstv %s4564_s22  ;;  %v4665_v60 = vmov %v4661_v42  ;;  %v4667_v54 = vmov %v4663_v2  ;;  %v4670_v2 = vstv %s4565_s12  ;;  %s3912_s12 = sld [smem:[#allocation3 + $0x8c]] }
 0x13b   : > { %v1286_v0 = vmul.f32 %v4664_v28, %v3575_v57  ;;  %v1275_v32 = vmul.f32 %v4665_v60, %v3562_v41  ;;  %v1595_v51 = vadd.f32 %v1593_v4, %v1589_v17  ;;  %v3856_v1 = vadd.f32 %v1200_v20, %v1196_v45  ;;  %v4671_v57 = vld [vmem:[#allocation75_spill] sm:$0xff]  ;;  %1633 = vrot.lane.b32.xlu1 %v1596_v14, %s2136_s20  ;;  %s3989_s9 = sld [smem:[#allocation3 + $0x77]] }
 0x13c   : > { %v1279_v12 = vmul.f32 %v4667_v54, %v4666_v11  ;;  %v4669_v63 = vmov %v4664_v28  ;;  %v1282_v42 = vadd.f32 %v1280_v27, %v1276_v46  ;;  %v1361_v28 = vmul.f32 %v4670_v2, %v3585_v49  ;;  %s4022_s22 = sld [smem:[#allocation3 + $0x90]] }
 0x13d   : > { %v1285_v24 = vmul.f32 %v4669_v63, %v4668_v39  ;;  %v4672_v50 = vstv %s3221_s21  ;;  %v4674_v41 = vstv %s4566_s27  ;;  %v4675_v17 = vmov %v4670_v2  ;;  %1631 = vrot.lane.b32.xlu0 %v1595_v51, %s2136_s20  ;;  %s4696_s21 = sld [smem:[#allocation49_spill]] }
 0x13e   : > { %v1365_v60 = vmul.f32 %v4672_v50, %v4671_v57  ;;  %v1371_v4 = vmul.f32 %v4674_v41, %v4673_v16  ;;  %v1281_v45 = vadd.f32 %v1279_v12, %v1275_v32  ;;  %v1360_v20 = vmul.f32 %v4675_v17, %v3616_v59  ;;  %v4678_v57 = vld [vmem:[#allocation77_spill] sm:$0xff]  ;;  %s4029_s27 = sld [smem:[#allocation3 + $0x61]] }
 0x13f   : > { %v4676_v54 = vmov %v4672_v50  ;;  %v4677_v27 = vmov %v4674_v41  ;;  %v3883_v2 = vadd.f32 %v1286_v0, %v1282_v42  ;;  %v4679_v49 = vstv %s3234_s13  ;;  %s2137_s13 = smov 127   ;;  %s4043_s20 = sld [smem:[#allocation3 + $0x91]] }
 0x140   : > { %v1364_v46 = vmul.f32 %v4676_v54, %v3618_v6  ;;  %v1370_v63 = vmul.f32 %v4677_v27, %v3620_v58  ;;  %v1367_v50 = vadd.f32 %v1365_v60, %v1361_v28  ;;  %v1446_v41 = vmul.f32 %v4679_v49, %v4678_v57  ;;  %1048 = vrot.lane.b32.xlu1 %v3706_v44, %s2137_s13 }
 0x141   : > { %v4680_v14 = vstv %s3238_s14  ;;  %v3894_v12 = vadd.f32 %v1285_v24, %v1281_v45  ;;  %v4683_v0 = vstv %s3247_s23  ;;  %v4684_v28 = vmov %v4679_v49  ;;  %s4691_s14 = sld [smem:[#allocation48_spill]]  ;;  %1046 = vrot.lane.b32.xlu0 %v3756_v31, %s2137_s13 }
 0x142   : > { %v1450_v32 = vmul.f32 %v4680_v14, %v3698_v62  ;;  %v1366_v17 = vadd.f32 %v1364_v46, %v1360_v20  ;;  %v1456_v42 = vmul.f32 %v4683_v0, %v3700_v21  ;;  %v1445_v49 = vmul.f32 %v4684_v28, %v3724_v19  ;;  %s4698_s23 = sld [smem:[#allocation50_spill]] }
 0x143   : > { %v3904_v60 = vadd.f32 %v1371_v4, %v1367_v50  ;;  %v4685_v27 = vmov %v4680_v14  ;;  %v4686_v24 = vmov %v4683_v0  ;;  %v4689_v4 = vstv %s3251_s24  ;;  %s4700_s24 = sld [smem:[#allocation51_spill]] }
 0x144   : > { %v1452_v54 = vadd.f32 %v1450_v32, %v1446_v41  ;;  %v1449_v51 = vmul.f32 %v4685_v27, %v3726_v33  ;;  %v1455_v45 = vmul.f32 %v4686_v24, %v3728_v37  ;;  %v3916_v20 = vadd.f32 %v1370_v63, %v1366_v17  ;;  %1133 = vrot.lane.b32.xlu1 %v3758_v7, %s2137_s13 }
 0x145   : > { %v1531_v46 = vmul.f32 %v4689_v4, %v3751_v23  ;;  %v4690_v50 = vstv %s4681_s7  ;;  %v4692_v14 = vstv %s4682_s8  ;;  %v4693_v27 = vmov %v4689_v4  ;;  %1131 = vrot.lane.b32.xlu0 %v3789_v52, %s2137_s13  ;;  %s162_s7 = sand.u32 1, %s4724_s10   ;;  %s4163_s8 = sld [smem:[#allocation3 + $0x9d]] }
 0x146   : > { %v1535_v41 = vmul.f32 %v4690_v50, %v3760_v48  ;;  %v1541_v32 = vmul.f32 %v4692_v14, %v3762_v56  ;;  %v3927_v0 = vadd.f32 %v1456_v42, %v1452_v54  ;;  %v1451_v28 = vadd.f32 %v1449_v51, %v1445_v49 }
 0x147   : > { %v1530_v24 = vmul.f32 %v4693_v27, %v3783_v5  ;;  %v4694_v44 = vmov %v4690_v50  ;;  %v4695_v4 = vmov %v4692_v14  ;;  %v4697_v49 = vstv %s4687_s11  ;;  %s4174_s11 = sld [smem:[#allocation3 + $0x9e]] }
 0x148   : > { %v1534_v63 = vmul.f32 %v4694_v44, %v3785_v61  ;;  %v1537_v17 = vadd.f32 %v1535_v41, %v1531_v46  ;;  %v1540_v42 = vmul.f32 %v4695_v4, %v3787_v15  ;;  %v1616_v54 = vmul.f32 %v4697_v49, %v3806_v18  ;;  %1218 = vrot.lane.b32.xlu1 %v3837_v53, %s2137_s13 }
 0x149   : > { %v4699_v51 = vstv %s4688_s17  ;;  %v3950_v14 = vadd.f32 %v1455_v45, %v1451_v28  ;;  %v4701_v31 = vstv %s4691_s14  ;;  %v4702_v41 = vmov %v4697_v49  ;;  %1216 = vrot.lane.b32.xlu0 %v3856_v1, %s2137_s13  ;;  %s4212_s14 = sld [smem:[#allocation3 + $0xa1]] }
 0x14a   : > { %v1620_v50 = vmul.f32 %v4699_v51, %v3808_v10  ;;  %v1536_v27 = vadd.f32 %v1534_v63, %v1530_v24  ;;  %v1626_v46 = vmul.f32 %v4701_v31, %v3810_v43  ;;  %v1615_v44 = vmul.f32 %v4702_v41, %v3822_v35 }
 0x14b   : > { %v3962_v4 = vadd.f32 %v1541_v32, %v1537_v17  ;;  %v4703_v45 = vmov %v4699_v51  ;;  %v4704_v24 = vmov %v4701_v31  ;;  %v4705_v31 = vstv %s4696_s21  ;;  %s4242_s21 = sld [smem:[#allocation3 + $0xa3]] }
 0x14c   : > { %v1622_v49 = vadd.f32 %v1620_v50, %v1616_v54  ;;  %v1619_v28 = vmul.f32 %v4703_v45, %v3824_v55  ;;  %v1625_v63 = vmul.f32 %v4704_v24, %v3826_v8  ;;  %v3970_v51 = vadd.f32 %v1540_v42, %v1536_v27  ;;  %1303 = vrot.lane.b32.xlu1 %v3883_v2, %s2137_s13 }
 0x14d   : > { %v1089_v41 = vmul.f32 %v4705_v31, %v3456_v25  ;;  %v4706_v43 = vstv %s4698_s23  ;;  %v4707_v7 = vstv %s4700_s24  ;;  %v1002_v54 = vstv %s3891_s30  ;;  %1301 = vrot.lane.b32.xlu0 %v3894_v12, %s2137_s13  ;;  %s4155_s30 = sld [smem:[#allocation3 + $0x9c]] }
 0x14e   : > { %v1093_v35 = vmul.f32 %v4706_v43, %v3460_v3  ;;  %v1099_v32 = vmul.f32 %v4707_v7, %v3474_v22  ;;  %v3985_v17 = vadd.f32 %v1626_v46, %v1622_v49  ;;  %v1621_v42 = vadd.f32 %v1619_v28, %v1615_v44 }
 0x14f   : > { %v1006_v50 = vstv %s3902_s0  ;;  %v1003_v3 = vmul.f32 %v1002_v54, %v3485_v30  ;;  %v1012_v43 = vstv %s3912_s12  ;;  %v4708_v46 = vmov %v4705_v31  ;;  %s1770_s0 = sshll.u32 %s162_s7, 7  ;;  %s4183_s12 = sld [smem:[#allocation3 + $0x9f]] }
 0x150   : > { %v1095_v25 = vadd.f32 %v1093_v35, %v1089_v41  ;;  %v1007_v22 = vmul.f32 %v1006_v50, %v3497_v40  ;;  %v3998_v52 = vadd.f32 %v1625_v63, %v1621_v42  ;;  %v1013_v27 = vmul.f32 %v1012_v43, %v3515_v38  ;;  %v4712_v41 = vld [vmem:[#allocation26_spill] sm:$0xff]  ;;  %1388 = vrot.lane.b32.xlu1 %v3904_v60, %s2137_s13  ;;  %s4186_s17 = scalar_lea.vmem [#allocation6], %s1770_s0 }
 0x151   : > { %v1090_v44 = vmul.f32 %v4708_v46, %v3458_v29  ;;  %v4709_v35 = vstv %s4698_s23  ;;  %v4710_v45 = vmov %v4707_v7  ;;  %v1004_v28 = vmul.f32 %v1002_v54, %v3487_v13  ;;  %v4714_v54 = vld [vmem:[#allocation27_spill] sm:$0xff]  ;;  %1386 = vrot.lane.b32.xlu0 %v3916_v20, %s2137_s13  ;;  %s4725_s23 = sld [smem:[#allocation12_spill]] }
 0x152   : > { %v1094_v30 = vmul.f32 %v4709_v35, %v3490_v26  ;;  %v4009_v40 = vadd.f32 %v1099_v32, %v1095_v25  ;;  %v1009_v49 = vadd.f32 %v1007_v22, %v1003_v3  ;;  %v1100_v53 = vmul.f32 %v4710_v45, %v3492_v34  ;;  %v4711_v26 = vld [vmem:[#allocation24_spill] sm:$0xff]  ;;  %v4713_v32 = vld [vmem:[#allocation23_spill] sm:$0xff]  ;;  %v4715_v25 = vld [vmem:[#allocation30_spill] sm:$0xff] }
 0x153   : > { %v1008_v38 = vmul.f32 %v1006_v50, %v3513_v9  ;;  %v1014_v24 = vmul.f32 %v1012_v43, %v4711_v26  ;;  %v1173_v63 = vstv %s3935_s19  ;;  %v1177_v7 = vstv %s3948_s28  ;;  %v4716_v22 = vld [vmem:[#allocation31_spill] sm:$0xff]  ;;  %v4717_v45 = vld [vmem:[#allocation71_spill] sm:$0xff]  ;;  %s4227_s19 = sld [smem:[#allocation3 + $0xa2]] }
 0x154   : > { %v1096_v29 = vadd.f32 %v1094_v30, %v1090_v44  ;;  %v4024_v31 = vadd.f32 %v1013_v27, %v1009_v49  ;;  %v1175_v34 = vmul.f32 %v1173_v63, %v4712_v41  ;;  %v1183_v13 = vstv %s3958_s16  ;;  %1473 = vrot.lane.b32.xlu1 %v3927_v0, %s2137_s13  ;;  %s1676_s16 = sshll.u32 %s4186_s17, 4  ;;  %s4281_s16 = int_to_ptr.vmem [resolvable:$true] %s1676_s16 }
 0x155   : > { %v1010_v9 = vadd.f32 %v1008_v38, %v1004_v28  ;;  %v1179_v42 = vmul.f32 %v1177_v7, %v4713_v32  ;;  %v1185_v50 = vmul.f32 %v1183_v13, %v4714_v54  ;;  %v1174_v3 = vmul.f32 %v1173_v63, %v4715_v25  ;;  %v4718_v28 = vld [vmem:[#allocation25_spill] sm:$0xff]  ;;  %v4721_v32 = vld [vmem:[#allocation75_spill] sm:$0xff]  ;;  %1471 = vrot.lane.b32.xlu0 %v3950_v14, %s2137_s13 }
 0x156   : > { %v4033_v1 = vadd.f32 %v1100_v53, %v1096_v29  ;;  %v1178_v43 = vmul.f32 %v1177_v7, %v4716_v22  ;;  %v1184_v27 = vmul.f32 %v1183_v13, %v3548_v47  ;;  %v1258_v46 = vstv %s3981_s18  ;;  %v4720_v13 = vld [vmem:[#allocation74_spill] sm:$0xff] }
 0x157   : > { %v4047_v2 = vadd.f32 %v1014_v24, %v1010_v9  ;;  %v1181_v44 = vadd.f32 %v1179_v42, %v1175_v34  ;;  %v1260_v35 = vmul.f32 %v1258_v46, %v4660_v36  ;;  %v1262_v30 = vstv %s3989_s9  ;;  %v4719_v36 = vld [vmem:[#allocation72_spill] sm:$0xff]  ;;  %s1954_s28 = sshll.u32 %s4725_s23, 11 }
 0x158   : > { %v1180_v49 = vadd.f32 %v1178_v43, %v1174_v3  ;;  %v1264_v53 = vmul.f32 %v1262_v30, %v4717_v45  ;;  %v1268_v47 = vstv %s3994_s2  ;;  %v1259_v29 = vmul.f32 %v1258_v46, %v4718_v28  ;;  %1558 = vrot.lane.b32.xlu1 %v3962_v4, %s2137_s13  ;;  %s4727_s2 = sld [smem:[#allocation82_spill]] }
 0x159   : > { %v4060_v12 = vadd.f32 %v1185_v50, %v1181_v44  ;;  %v1270_v38 = vmul.f32 %v1268_v47, %v4719_v36  ;;  %v1263_v26 = vmul.f32 %v1262_v30, %v4666_v11  ;;  %v1269_v24 = vmul.f32 %v1268_v47, %v4668_v39  ;;  %1556 = vrot.lane.b32.xlu0 %v3970_v51, %s2137_s13 }
 0x15a   : > { %v4067_v63 = vadd.f32 %v1184_v27, %v1180_v49  ;;  %v1266_v41 = vadd.f32 %v1264_v53, %v1260_v35  ;;  %v1343_v34 = vstv %s4007_s5  ;;  %v1347_v7 = vstv %s4015_s6  ;;  %s4289_s6 = scalar_lea.sflag [#allocation4], %s162_s7 }
 0x15b   : > { %v1265_v60 = vadd.f32 %v1263_v26, %v1259_v29  ;;  %v1345_v9 = vmul.f32 %v1343_v34, %v4720_v13  ;;  %v1349_v42 = vmul.f32 %v1347_v7, %v4721_v32  ;;  %v1353_v11 = vstv %s4022_s22  ;;  %v4722_v26 = vld [vmem:[#allocation79_spill] sm:$0xff]  ;;  %s2053_s22 = scalar_lea.vmem %s4281_s16, 2048 }
 0x15c   : > { %v4078_v39 = vadd.f32 %v1270_v38, %v1266_v41  ;;  %v1355_v54 = vmul.f32 %v1353_v11, %v4673_v16  ;;  %v1344_v50 = vmul.f32 %v1343_v34, %v3616_v59  ;;  %v1348_v25 = vmul.f32 %v1347_v7, %v3618_v6  ;;  %1643 = vrot.lane.b32.xlu1 %v3985_v17, %s2137_s13  ;;  %p2054_p10 = scmp.ne.s32.totalorder %s4281_s16, %s2053_s22 }
 0x15d   : > { %v4087_v20 = vadd.f32 %v1269_v24, %v1265_v60  ;;  %v1351_v3 = vadd.f32 %v1349_v42, %v1345_v9  ;;  %v1354_v22 = vmul.f32 %v1353_v11, %v3620_v58  ;;  %v1428_v43 = vstv %s4029_s27  ;;  %1641 = vrot.lane.b32.xlu0 %v3998_v52, %s2137_s13  ;;  %s4198_s13 = sld [smem:[#allocation3 + $0xa0]]  ;;  %s2138_s27 = smov [#allocation6]  }
 0x15e   : > { %v1350_v27 = vadd.f32 %v1348_v25, %v1344_v50  ;;  %v1430_v59 = vmul.f32 %v1428_v43, %v4678_v57  ;;  %v1432_v6 = vstv %s4037_s15  ;;  %v1438_v16 = vstv %s4043_s20  ;;  %s4279_s5 = scalar_lea.hbm %s4727_s2, %s1954_s28  ;;  %p2055_p11 = pnand %p2054_p10, %p2196_p4 }
 0x15f   : > { %v4098_v0 = vadd.f32 %v1355_v54, %v1351_v3  ;;  %v1434_v46 = vmul.f32 %v1432_v6, %v3698_v62  ;;  %v1440_v44 = vmul.f32 %v1438_v16, %v3700_v21  ;;  %v1429_v58 = vmul.f32 %v1428_v43, %v3724_v19  ;;  %s2057_s15 = sshll.u32 %s2138_s27, 4  ;;  %s2058_s15 = int_to_ptr.vmem [resolvable:$false] %s2057_s15 }
 0x160   : > { %v4103_v35 = vadd.f32 %v1354_v22, %v1350_v27  ;;  %v1433_v30 = vmul.f32 %v1432_v6, %v3726_v33  ;;  %v1439_v57 = vmul.f32 %v1438_v16, %v3728_v37  ;;  %v1513_v49 = vstv %s4051_s3  ;;  %p2056_p13 = pneg %p2055_p11  ;;  %s2059_s20 = scalar_lea.vmem %s2058_s15, 4096 }
 0x161   : > { %v1436_v14 = vadd.f32 %v1434_v46, %v1430_v59  ;;  %v1515_v45 = vmul.f32 %v1513_v49, %v3751_v23  ;;  %v1517_v62 = vstv %s4056_s26  ;;  %v1523_v53 = vstv %s4065_s1  ;;  %p2060_p0 = scmp.lt.s32.totalorder %s4281_s16, %s2058_s15  ;;  %p2061_p1 = scmp.lt.s32.totalorder %s2059_s20, %s2053_s22 }
 0x162   : > { %v1435_v21 = vadd.f32 %v1433_v30, %v1429_v58  ;;  %v1519_v19 = vmul.f32 %v1517_v62, %v3760_v48  ;;  %v1525_v47 = vmul.f32 %v1523_v53, %v3762_v56  ;;  %v1514_v33 = vmul.f32 %v1513_v49, %v3783_v5 }
 0x163   : > { %v4118_v37 = vadd.f32 %v1440_v44, %v1436_v14  ;;  %v1518_v4 = vmul.f32 %v1517_v62, %v3785_v61  ;;  %v1524_v28 = vmul.f32 %v1523_v53, %v3787_v15  ;;  %v1598_v23 = vstv %s4076_s29  ;;  %v4723_v61 = vld [vmem:[#allocation78_spill] sm:$0xff]  ;;  %p2062_p2 = por %p2061_p1, %p2060_p0 }
 0x164   : > { %v4123_v29 = vadd.f32 %v1439_v57, %v1435_v21  ;;  %v1521_v36 = vadd.f32 %v1519_v19, %v1515_v45  ;;  %v1600_v38 = vmul.f32 %v1598_v23, %v3806_v18  ;;  %v1602_v48 = vstv %s4083_s4 }
 0x165   : > { %v1520_v56 = vadd.f32 %v1518_v4, %v1514_v33  ;;  %v1604_v5 = vmul.f32 %v1602_v48, %v3808_v10  ;;  %v1608_v51 = vstv %s4091_s25  ;;  %v1599_v24 = vmul.f32 %v1598_v23, %v4722_v26  ;;  %p2063_p3 = pnand %p2062_p2, %p2056_p13 }
 0x166   : > { %v4132_v41 = vadd.f32 %v1525_v47, %v1521_v36  ;;  %v1610_v15 = vmul.f32 %v1608_v51, %v4723_v61  ;;  %v1603_v34 = vmul.f32 %v1602_v48, %v3824_v55  ;;  %v1609_v7 = vmul.f32 %v1608_v51, %v3826_v8 }
 0x167   : > { %v4139_v18 = vadd.f32 %v1524_v28, %v1520_v56  ;;  %v1606_v17 = vadd.f32 %v1604_v5, %v1600_v38  ;;  %v1060_v57 = vstv %s4155_s30  ;;  %v1144_v28 = vstv %s4163_s8 }
 0x168   : > { %v1605_v60 = vadd.f32 %v1603_v34, %v1599_v24  ;;  %v1229_v61 = vstv %s4174_s11 }
 0x169   : > { %v4141_v13 = vadd.f32 %v1610_v15, %v1606_v17 }
 0x16a   : > { %v4143_v10 = vadd.f32 %v1609_v7, %v1605_v60 }
 0x177   : > { %v1122_v9 = vpop.permute.xlu1 %1121 }
 0x178   : > { %v1127_v53 = vsel %vm1041_vm4, 0.0, %v1122_v9 }
 0x17b   : > { %v1124_v42 = vpop.permute.xlu1 %1123 }
 0x17c   : > { %v1036_v32 = vpop.permute.xlu0 %1035  ;;  %v1128_v30 = vsel %vm1041_vm4, 0.0, %v1124_v42 }
 0x17d   : > { %v1042_v46 = vsel %vm1041_vm4, 0.0, %v1036_v32 }
 0x17e   : > { %v1055_v14 = vadd.f32 %v1042_v46, %v4024_v31  ;;  %v1139_v31 = vadd.f32 %v1127_v53, %v4009_v40 }
 0x184   : > { %v1038_v11 = vpop.permute.xlu0 %1037 }
 0x185   : > { %v1043_v6 = vsel %vm1041_vm4, 0.0, %v1038_v11 }
 0x186   : > { %v1056_v44 = vadd.f32 %v1043_v6, %v4047_v2  ;;  %v1140_v2 = vadd.f32 %v1128_v30, %v4033_v1 }
 0x189   : > { %v1209_v54 = vpop.permute.xlu1 %1208 }
 0x18a   : > { %v1207_v55 = vpop.permute.xlu0 %1206  ;;  %v1213_v4 = vsel %vm1041_vm4, 0.0, %v1209_v54 }
 0x18b   : > { %v1212_v48 = vsel %vm1041_vm4, 0.0, %v1207_v55  ;;  %v1225_v5 = vadd.f32 %v1213_v4, %v4060_v12  ;;  %v1314_v55 = vstv %s4183_s12  ;;  %v1484_v4 = vstv %s4212_s14 }
 0x18c   : > { %v1224_v34 = vadd.f32 %v1212_v48, %v4067_v63 }
 0x18d   : > { %v1294_v50 = vpop.permute.xlu1 %1293 }
 0x18e   : > { %v1298_v24 = vsel %vm1041_vm4, 0.0, %v1294_v50 }
 0x18f   : > { %v1292_v8 = vpop.permute.xlu0 %1291  ;;  %v1310_v32 = vadd.f32 %v1298_v24, %v4078_v39 }
 0x190   : > { %v1297_v60 = vsel %vm1041_vm4, 0.0, %v1292_v8 }
 0x191   : > { %v1309_v8 = vadd.f32 %v1297_v60, %v4087_v20 }
 0x192   : > { %v4145_v25 = vpop.permute.xlu1 %1378 }
 0x193   : > { %v4147_v52 = vpop.permute.xlu0 %1376  ;;  %v1383_v63 = vsel %vm1041_vm4, 0.0, %v4145_v25 }
 0x194   : > { %v1395_v25 = vadd.f32 %v1383_v63, %v4098_v0 }
 0x1a0   : > { %v4149_v3 = vpop.permute.xlu1 %1463 }
 0x1a1   : > { %v1468_v20 = vsel %vm1041_vm4, 0.0, %v4149_v3 }
 0x1a2   : > { %v1480_v3 = vadd.f32 %v1468_v20, %v4118_v37 }
 0x1a3   : > { %v4151_v22 = vpop.permute.xlu0 %1461 }
 0x1a9   : > { %v4153_v43 = vpop.permute.xlu1 %1548 }
 0x1ab   : > { %v4157_v27 = vpop.permute.xlu0 %1546 }
 0x1ad   : > { %v4159_v59 = vpop.permute.xlu1 %1633 }
 0x1af   : > { %v4165_v16 = vpop.permute.xlu0 %1631 }
 0x1b0   : > { %v1637_v24 = vsel %vm1041_vm4, 0.0, %v4165_v16 }
 0x1b2   : > { %v1049_v58 = vpop.permute.xlu1 %1048 }
 0x1b3   : > { %v1054_v49 = vsel %vm1052_vm5, %v1049_v58, 0.0  ;;  %v1047_v62 = vpop.permute.xlu0 %1046 }
 0x1b4   : > { %v1058_v45 = vadd.f32 %v1056_v44, %v1054_v49  ;;  %v1053_v21 = vsel %vm1052_vm5, %v1047_v62, 0.0  ;;  %v1382_v44 = vsel %vm1041_vm4, 0.0, %v4147_v52 }
 0x1b5   : > { %v1057_v47 = vadd.f32 %v1055_v14, %v1053_v21  ;;  %v1399_v14 = vstv %s4198_s13  ;;  %v1394_v52 = vadd.f32 %v1382_v44, %v4103_v35  ;;  %v1467_v21 = vsel %vm1041_vm4, 0.0, %v4151_v22 }
 0x1b6   : > { %v1062_v19 = vadd.f32 %v1060_v57, %v1058_v45  ;;  %v1134_v33 = vpop.permute.xlu1 %1133  ;;  %v1553_v35 = vsel %vm1041_vm4, 0.0, %v4153_v43  ;;  %v1479_v22 = vadd.f32 %v1467_v21, %v4123_v29  ;;  %v1638_v29 = vsel %vm1041_vm4, 0.0, %v4159_v59 }
 0x1b7   : > { %v1138_v23 = vsel %vm1052_vm5, %v1134_v33, 0.0  ;;  %v1061_v1 = vadd.f32 %v1060_v57, %v1057_v47  ;;  %v1132_v38 = vpop.permute.xlu0 %1131  ;;  %v1565_v43 = vadd.f32 %v1553_v35, %v4132_v41  ;;  %v1650_v59 = vadd.f32 %v1638_v29, %v4141_v13 }
 0x1b8   : > { %1064 = vst.msk [vmem:[%s4186_s17 + $0x8] sm:$0xff] %vm834_vm1, %v1062_v19  ;;  %v1142_v36 = vadd.f32 %v1140_v2, %v1138_v23  ;;  %v1137_v56 = vsel %vm1052_vm5, %v1132_v38, 0.0 }
 0x1b9   : > { %1063 = vst.msk [vmem:[%s4186_s17] sm:$0xff] %vm834_vm1, %v1061_v1  ;;  %v1141_v51 = vadd.f32 %v1139_v31, %v1137_v56  ;;  %v1552_v1 = vsel %vm1041_vm4, 0.0, %v4157_v27 }
 0x1ba   : > { %v1146_v40 = vadd.f32 %v1144_v28, %v1142_v36  ;;  %v1219_v26 = vpop.permute.xlu1 %1218  ;;  %v1564_v27 = vadd.f32 %v1552_v1, %v4139_v18 }
 0x1bb   : > { %v1223_v15 = vsel %vm1052_vm5, %v1219_v26, 0.0  ;;  %v1145_v12 = vadd.f32 %v1144_v28, %v1141_v51  ;;  %v1217_v17 = vpop.permute.xlu0 %1216 }
 0x1bc   : > { %1876 = vst.msk [vmem:[%s4186_s17 + $0x18] sm:$0xff] %vm834_vm1, %v1146_v40  ;;  %v1227_v7 = vadd.f32 %v1225_v5, %v1223_v15  ;;  %v1222_v9 = vsel %vm1052_vm5, %v1217_v17, 0.0  ;;  %v1569_v5 = vstv %s4227_s19  ;;  %v1649_v17 = vadd.f32 %v1637_v24, %v4143_v10 }
 0x1bd   : > { %1875 = vst.msk [vmem:[%s4186_s17 + $0x10] sm:$0xff] %vm834_vm1, %v1145_v12  ;;  %v1226_v11 = vadd.f32 %v1224_v34, %v1222_v9  ;;  %v1654_v12 = vstv %s4242_s21 }
 0x1be   : > { %v1231_v42 = vadd.f32 %v1229_v61, %v1227_v7  ;;  %v1304_v54 = vpop.permute.xlu1 %1303 }
 0x1bf   : > { %v1308_v50 = vsel %vm1052_vm5, %v1304_v54, 0.0  ;;  %v1230_v39 = vadd.f32 %v1229_v61, %v1226_v11  ;;  %v1302_v46 = vpop.permute.xlu0 %1301 }
 0x1c0   : > { %1888 = vst.msk [vmem:[%s4186_s17 + $0x28] sm:$0xff] %vm834_vm1, %v1231_v42  ;;  %v1312_v6 = vadd.f32 %v1310_v32, %v1308_v50  ;;  %v1307_v58 = vsel %vm1052_vm5, %v1302_v46, 0.0 }
 0x1c1   : > { %1887 = vst.msk [vmem:[%s4186_s17 + $0x20] sm:$0xff] %vm834_vm1, %v1230_v39  ;;  %v1311_v57 = vadd.f32 %v1309_v8, %v1307_v58 }
 0x1c2   : > { %v1316_v30 = vadd.f32 %v1314_v55, %v1312_v6  ;;  %v1389_v49 = vpop.permute.xlu1 %1388 }
 0x1c3   : > { %v1393_v45 = vsel %vm1052_vm5, %v1389_v49, 0.0  ;;  %v1315_v0 = vadd.f32 %v1314_v55, %v1311_v57  ;;  %v1387_v53 = vpop.permute.xlu0 %1386 }
 0x1c4   : > { %1900 = vst.msk [vmem:[%s4186_s17 + $0x38] sm:$0xff] %vm834_vm1, %v1316_v30  ;;  %v1397_v62 = vadd.f32 %v1395_v25, %v1393_v45  ;;  %v1392_v2 = vsel %vm1052_vm5, %v1387_v53, 0.0 }
 0x1c5   : > { %1899 = vst.msk [vmem:[%s4186_s17 + $0x30] sm:$0xff] %vm834_vm1, %v1315_v0  ;;  %v1396_v47 = vadd.f32 %v1394_v52, %v1392_v2 }
 0x1c6   : > { %v1401_v19 = vadd.f32 %v1399_v14, %v1397_v62  ;;  %v1474_v33 = vpop.permute.xlu1 %1473 }
 0x1c7   : > { %v1478_v28 = vsel %vm1052_vm5, %v1474_v33, 0.0  ;;  %v1400_v37 = vadd.f32 %v1399_v14, %v1396_v47  ;;  %v1472_v31 = vpop.permute.xlu0 %1471 }
 0x1c8   : > { %1912 = vst.msk [vmem:[%s4186_s17 + $0x48] sm:$0xff] %vm834_vm1, %v1401_v19  ;;  %v1482_v23 = vadd.f32 %v1480_v3, %v1478_v28  ;;  %v1477_v36 = vsel %vm1052_vm5, %v1472_v31, 0.0 }
 0x1c9   : > { %1911 = vst.msk [vmem:[%s4186_s17 + $0x40] sm:$0xff] %vm834_vm1, %v1400_v37  ;;  %v1481_v48 = vadd.f32 %v1479_v22, %v1477_v36 }
 0x1ca   : > { %v1486_v38 = vadd.f32 %v1484_v4, %v1482_v23  ;;  %v1559_v56 = vpop.permute.xlu1 %1558 }
 0x1cb   : > { %v1563_v40 = vsel %vm1052_vm5, %v1559_v56, 0.0  ;;  %v1485_v51 = vadd.f32 %v1484_v4, %v1481_v48  ;;  %v1557_v26 = vpop.permute.xlu0 %1556 }
 0x1cc   : > { %1924 = vst.msk [vmem:[%s4186_s17 + $0x58] sm:$0xff] %vm834_vm1, %v1486_v38  ;;  %v1567_v41 = vadd.f32 %v1565_v43, %v1563_v40  ;;  %v1562_v61 = vsel %vm1052_vm5, %v1557_v26, 0.0 }
 0x1cd   : > { %1923 = vst.msk [vmem:[%s4186_s17 + $0x50] sm:$0xff] %vm834_vm1, %v1485_v51  ;;  %v1566_v34 = vadd.f32 %v1564_v27, %v1562_v61 }
 0x1ce   : > { %v1571_v15 = vadd.f32 %v1569_v5, %v1567_v41  ;;  %v1644_v18 = vpop.permute.xlu1 %1643 }
 0x1cf   : > { %v1648_v7 = vsel %vm1052_vm5, %v1644_v18, 0.0  ;;  %v1570_v16 = vadd.f32 %v1569_v5, %v1566_v34  ;;  %v1642_v9 = vpop.permute.xlu0 %1641 }
 0x1d0   : > { %1936 = vst.msk [vmem:[%s4186_s17 + $0x68] sm:$0xff] %vm834_vm1, %v1571_v15  ;;  %v1652_v60 = vadd.f32 %v1650_v59, %v1648_v7  ;;  %v1647_v13 = vsel %vm1052_vm5, %v1642_v9, 0.0 }
 0x1d1   : > { %1935 = vst.msk [vmem:[%s4186_s17 + $0x60] sm:$0xff] %vm834_vm1, %v1570_v16  ;;  %v1651_v42 = vadd.f32 %v1649_v17, %v1647_v13 }
 0x1d2   : > { %v1656_v32 = vadd.f32 %v1654_v12, %v1652_v60 }
 0x1d3   : > { %v1655_v10 = vadd.f32 %v1654_v12, %v1651_v42 }
 0x1d4   : > { %1948 = vst.msk [vmem:[%s4186_s17 + $0x78] sm:$0xff] %vm834_vm1, %v1656_v32 }
 0x1d5   : > { %1947 = vst.msk [vmem:[%s4186_s17 + $0x70] sm:$0xff] %vm834_vm1, %v1655_v10 }
 0x1d6   : > { %2066 = shalt.err (!%p2063_p3)
}
 0x1d7   : > { %s2067_s3 = scalar_lea.hbm %s4279_s5, 2048  ;;  %s2071_s29 = scalar_lea.hbm %s4727_s2, 4096 }
 0x1d8   : > { %p2068_p5 = scmp.ne.s32.totalorder %s4279_s5, %s2067_s3  ;;  %p2072_p9 = scmp.lt.s32.totalorder %s4279_s5, %s4727_s2 }
 0x1d9   : > { %p2073_p12 = scmp.lt.s32.totalorder %s2071_s29, %s2067_s3 }
 0x1da   : > { %p2069_p6 = pnand %p2068_p5, %p2196_p4 }
 0x1db   : > { %p2074_p10 = por %p2073_p12, %p2072_p9 }
 0x1dc   : > { %p2070_p7 = pneg %p2069_p6 }
 0x1de   : > { %p2075_p11 = pnand %p2074_p10, %p2070_p7 }
 0x1e0   : > { %2078 = shalt.err (!%p2075_p11)
}
 0x1e1   : > { %s2139_s10 = smov 128   ;;  %s2140_s30 = smov 8  }
 0x1e2   : > { %1960 = dma.vmem_to_hbm [thread:$0]  (%p2196_p4), %s4281_s16, 2048, %s4279_s5, %s4289_s6, %s2139_s10, %s2139_s10, %s2140_s30  }
 0x1e3 PF: > { %s4728_s7 = sld [smem:[#allocation14_spill]] }
 0x1e4   : > { %s4729_s8 = sld [smem:[#allocation9_spill]] }
 0x1e9   : > { %p1972_p13 = scmp.ge.s32.totalorder %s4728_s7, 2 }
 0x1ea   : > { %s1691_s11 = sand.u32 1, %s4729_s8  }
 0x1eb   : > { %p1967_p0 = pnand %p1972_p13, %p2203_p8  ;;  %s1692_s12 = scalar_lea.sflag [#allocation4], %s1691_s11 }
 0x1ed   : > { %p1968_p1 = pneg %p1967_p0 }
 0x1ef   : > { %2108 = dma.done.wait (%p1968_p1), %s1692_s12, 2048  }
 0x1f0   : > { %2110 = vsyncadd (%p1968_p1), %s1692_s12, 4294965248  ;;  %s16_s14 = sadd.s32 1, %s4728_s7   ;;  %s4731_s9 = sld [smem:[#allocation10_spill]] }
 0x1f1   : > { %p13_p2 = scmp.ge.s32.totalorder %s16_s14, 4   ;;  %s4732_s10 = sld [smem:[#allocation11_spill]] }
 0x1f2   : > { %s4733_s11 = sld [smem:[#allocation18_spill]] }
 0x1f3   : > { %s4734_s12 = sld [smem:[#allocation13_spill]]  ;;  %15 = sbr.rel (!%p13_p2) target bundleno = 9 (0x9), region = 83 }
 0x1f4   : > { %s4735_s13 = sld [smem:[#allocation15_spill]] }
 0x1f8   :  { %1697 = vsyncpa [#allocation4], 1 }
 0x1f9   :  { %1699 = vsyncpa [#allocation4 + $0x1], 1 }
 0x1fa   :  { %1700 = vsyncpa [#allocation5], 1 }
 0x1fb   :  { %1702 = vsyncpa [#allocation5 + $0x1], 1 }

</bundles_post_ra>
